<compile_context>
chip_gen: v6e
topology: v6e:2x2x1
jax: 0.10.0
libtpu: 0.0.40
codegen_flags: <defaults>
</compile_context>

<pallas_src>
import jax
import jax.numpy as jnp
from jax import lax
from jax.experimental import pallas as pl
from jax.experimental.pallas import tpu as pltpu


# ----------------------------------------------------------------------------
# Generation-aware configuration helpers (plain-Python, trace-time)
# ----------------------------------------------------------------------------
def _num_tensorcores():
    """2 on v7x (2 TC/chip); 1 on v5e/v6e. Conservative default: 1."""
    try:
        kind = jax.devices()[0].device_kind.lower()
    except Exception:
        return 1
    return 2 if "v7" in kind else 1


def _vmem_limit_bytes():
    """~3/4 of physical VMEM, capped at 100 MiB, floor 32 MiB."""
    try:
        cap = int(pltpu.get_tpu_info().vmem_capacity_bytes)
    except Exception:
        cap = 64 * 1024 * 1024
    return max(min((cap * 3) // 4, 100 * 1024 * 1024), 32 * 1024 * 1024)


_BUFFERED_OK = None


def _probe_buffered():
    """Feature-detect BlockSpec(pipeline_mode=pl.Buffered(1)) once, OUTSIDE jit."""
    global _BUFFERED_OK
    if _BUFFERED_OK is not None:
        return _BUFFERED_OK
    try:
        def _copy(x_ref, o_ref):
            o_ref[...] = x_ref[...]

        spec = pl.BlockSpec((8, 128), lambda i: (0, 0), pipeline_mode=pl.Buffered(1))
        y = pl.pallas_call(
            _copy,
            out_shape=jax.ShapeDtypeStruct((8, 128), jnp.float32),
            grid_spec=pltpu.PrefetchScalarGridSpec(
                num_scalar_prefetch=0,
                grid=(1,),
                in_specs=[spec],
                out_specs=pl.BlockSpec((8, 128), lambda i: (0, 0)),
            ),
        )(jnp.ones((8, 128), jnp.float32))
        jax.block_until_ready(y)
        _BUFFERED_OK = True
    except Exception:
        _BUFFERED_OK = False
    return _BUFFERED_OK


def _resident_spec(shape, index_map):
    """Spec for a grid-invariant (resident) block; single-buffered when supported."""
    if _BUFFERED_OK:
        return pl.BlockSpec(shape, index_map, pipeline_mode=pl.Buffered(1))
    return pl.BlockSpec(shape, index_map)


def _pick_batch_shard(bp):
    """Split the padded batch across TensorCores only on multi-TC chips (v7x)."""
    if _num_tensorcores() >= 2 and bp >= 32 and bp % 32 == 0:
        return bp // 2          # multiple of 16 -> safe for bf16 blocks
    return bp


def _pick_time_chunk(t, bs, hp, vmem_limit, max_chunk=64):
    """Largest divisor of T that keeps the pipelined chunks within ~1/4 of VMEM."""
    per_t = bs * hp * (4 + 2) * 2          # f32 x-in + bf16 h-out, double buffered
    cap = max(1, vmem_limit // (4 * max(per_t, 1)))
    limit = max(1, min(t, max_chunk, cap))
    tc = 1
    for c in range(1, limit + 1):
        if t % c == 0:
            tc = c
    return tc


# ----------------------------------------------------------------------------
# Pallas kernels
# ----------------------------------------------------------------------------
def _lstm_cell(gates, h, c, hp):
    """Gate math on lane-aligned (hp = multiple of 128) gate slices; f32 carries."""
    i_g = jax.nn.sigmoid(gates[:, 0 * hp:1 * hp])
    f_g = jax.nn.sigmoid(gates[:, 1 * hp:2 * hp])
    g_g = jnp.tanh(gates[:, 2 * hp:3 * hp])
    o_g = jax.nn.sigmoid(gates[:, 3 * hp:4 * hp])
    c_new = f_g * c + i_g * g_g
    h_new = o_g * jnp.tanh(c_new)
    return h_new, c_new


def _lstm_layer_kernel(x_ref, wih_ref, whh_ref, b_ref, out_ref, h_scr, c_scr):
    """One fused LSTM layer over a time chunk; emits the hidden chunk in bf16."""
    @pl.when(pl.program_id(1) == 0)
    def _():
        h_scr[...] = jnp.zeros_like(h_scr)
        c_scr[...] = jnp.zeros_like(c_scr)

    tc, bs, _ = x_ref.shape
    hp = h_scr.shape[-1]
    wih = wih_ref[...]                               # resident bf16 (Din, 4Hp)
    whh = whh_ref[...]                               # resident bf16 (Hp, 4Hp)
    bias = jnp.broadcast_to(b_ref[...], (bs, 4 * hp))  # hoisted broadcast

    def body(i, carry):
        h, c = carry
        gates = (jnp.dot(x_ref[i].astype(jnp.bfloat16), wih,
                         preferred_element_type=jnp.float32)
                 + bias
                 + jnp.dot(h.astype(jnp.bfloat16), whh,
                           preferred_element_type=jnp.float32))
        h, c = _lstm_cell(gates, h, c, hp)
        out_ref[i] = h.astype(out_ref.dtype)
        return h, c

    h_fin, c_fin = lax.fori_loop(0, tc, body, (h_scr[...], c_scr[...]),
                                 unroll=min(tc, 8))
    h_scr[...] = h_fin
    c_scr[...] = c_fin


def _lstm_last_fc_kernel(x_ref, wih_ref, whh_ref, b_ref, wfc_ref, bfc_ref, out_ref,
                         h_scr, c_scr):
    """Last LSTM layer fused with the final Linear; FC runs only on the last chunk."""
    t_idx = pl.program_id(1)

    @pl.when(t_idx == 0)
    def _():
        h_scr[...] = jnp.zeros_like(h_scr)
        c_scr[...] = jnp.zeros_like(c_scr)

    tc, bs, _ = x_ref.shape
    hp = h_scr.shape[-1]
    wih = wih_ref[...]
    whh = whh_ref[...]
    bias = jnp.broadcast_to(b_ref[...], (bs, 4 * hp))

    def body(i, carry):
        h, c = carry
        gates = (jnp.dot(x_ref[i].astype(jnp.bfloat16), wih,
                         preferred_element_type=jnp.float32)
                 + bias
                 + jnp.dot(h.astype(jnp.bfloat16), whh,
                           preferred_element_type=jnp.float32))
        return _lstm_cell(gates, h, c, hp)

    h_fin, c_fin = lax.fori_loop(0, tc, body, (h_scr[...], c_scr[...]),
                                 unroll=min(tc, 8))
    h_scr[...] = h_fin
    c_scr[...] = c_fin

    # Fused final Linear on h_T only (guarded: no redundant per-chunk FC matmul).
    @pl.when(t_idx == pl.num_programs(1) - 1)
    def _():
        out_ref[...] = (
            jnp.dot(h_fin.astype(jnp.bfloat16), wfc_ref[...],
                    preferred_element_type=jnp.float32) + bfc_ref[...]
        ).astype(out_ref.dtype)


# ----------------------------------------------------------------------------
# pallas_call wrappers
# ----------------------------------------------------------------------------
def _lstm_layer(x_seq, w_ih, w_hh, b, tc, b_shard, vmem_limit):
    """Fused LSTM layer. x_seq: (T, Bp, Din) -> (T, Bp, Hp) bf16."""
    T, Bp, din = x_seq.shape
    hp = w_hh.shape[0]
    g4 = 4 * hp
    n_bs = Bp // b_shard
    return pl.pallas_call(
        _lstm_layer_kernel,
        out_shape=jax.ShapeDtypeStruct((T, Bp, hp), jnp.bfloat16),
        grid_spec=pltpu.PrefetchScalarGridSpec(
            num_scalar_prefetch=0,
            grid=(n_bs, T // tc),
            in_specs=[
                pl.BlockSpec((tc, b_shard, din), lambda bi, t: (t, bi, 0)),
                _resident_spec((din, g4), lambda bi, t: (0, 0)),   # W_ih (bf16)
                _resident_spec((hp, g4), lambda bi, t: (0, 0)),    # W_hh (bf16)
                _resident_spec((1, g4), lambda bi, t: (0, 0)),     # fused bias (f32)
            ],
            out_specs=pl.BlockSpec((tc, b_shard, hp), lambda bi, t: (t, bi, 0)),
            scratch_shapes=[
                pltpu.VMEM((b_shard, hp), jnp.float32),            # h carry
                pltpu.VMEM((b_shard, hp), jnp.float32),            # c carry
            ],
        ),
        compiler_params=pltpu.CompilerParams(
            dimension_semantics=("parallel", "arbitrary"),
            vmem_limit_bytes=vmem_limit,
        ),
    )(x_seq, w_ih, w_hh, b)


def _lstm_last_fc(x_seq, w_ih, w_hh, b, w_fc, b_fc, tc, b_shard, vmem_limit):
    """Last LSTM layer + fused Linear. Emits only (Bp, out_pad) f32."""
    T, Bp, din = x_seq.shape
    hp = w_hh.shape[0]
    g4 = 4 * hp
    op = w_fc.shape[1]
    n_bs = Bp // b_shard
    return pl.pallas_call(
        _lstm_last_fc_kernel,
        out_shape=jax.ShapeDtypeStruct((Bp, op), jnp.float32),
        grid_spec=pltpu.PrefetchScalarGridSpec(
            num_scalar_prefetch=0,
            grid=(n_bs, T // tc),
            in_specs=[
                pl.BlockSpec((tc, b_shard, din), lambda bi, t: (t, bi, 0)),
                _resident_spec((din, g4), lambda bi, t: (0, 0)),   # W_ih
                _resident_spec((hp, g4), lambda bi, t: (0, 0)),    # W_hh
                _resident_spec((1, g4), lambda bi, t: (0, 0)),     # bias
                _resident_spec((hp, op), lambda bi, t: (0, 0)),    # W_fc (bf16)
                _resident_spec((1, op), lambda bi, t: (0, 0)),     # b_fc (f32)
            ],
            out_specs=pl.BlockSpec((b_shard, op), lambda bi, t: (bi, 0)),
            scratch_shapes=[
                pltpu.VMEM((b_shard, hp), jnp.float32),
                pltpu.VMEM((b_shard, hp), jnp.float32),
            ],
        ),
        compiler_params=pltpu.CompilerParams(
            dimension_semantics=("parallel", "arbitrary"),
            vmem_limit_bytes=vmem_limit,
        ),
    )(x_seq, w_ih, w_hh, b, w_fc, b_fc)


# ----------------------------------------------------------------------------
# Parameter init (PyTorch-like) and packing (pad + bf16 cast)
# ----------------------------------------------------------------------------
def init_params(key, in_dim, hid_dim, n_layers, out_dim):
    """Deterministic init, mirroring PyTorch's uniform(-1/sqrt(H), 1/sqrt(H))."""
    k = 1.0 / jnp.sqrt(jnp.float32(hid_dim))
    params = {"lstm": [], "fc": None}
    for layer in range(n_layers):
        d_in = in_dim if layer == 0 else hid_dim
        key, k1, k2, k3, k4 = jax.random.split(key, 5)
        w_ih = jax.random.uniform(k1, (d_in, 4 * hid_dim), jnp.float32, -k, k)
        w_hh = jax.random.uniform(k2, (hid_dim, 4 * hid_dim), jnp.float32, -k, k)
        b_ih = jax.random.uniform(k3, (4 * hid_dim,), jnp.float32, -k, k)
        b_hh = jax.random.uniform(k4, (4 * hid_dim,), jnp.float32, -k, k)
        params["lstm"].append((w_ih, w_hh, (b_ih + b_hh)[None, :]))
    key, k5, k6 = jax.random.split(key, 3)
    w_fc = jax.random.uniform(k5, (hid_dim, out_dim), jnp.float32, -k, k)
    b_fc = jax.random.uniform(k6, (out_dim,), jnp.float32, -k, k)[None, :]
    params["fc"] = (w_fc, b_fc)
    return params


def _round_up(x, m):
    return ((x + m - 1) // m) * m


def _pad_gate_cols(w, h, hp):
    """(rows, 4h) -> (rows, 4hp): zero-pad each i/f/g/o gate block from h to hp cols."""
    rows = w.shape[0]
    w4 = w.reshape(rows, 4, h)
    return jnp.zeros((rows, 4, hp), w.dtype).at[:, :, :h].set(w4).reshape(rows, 4 * hp)


def _pad_rows(w, rp):
    return jnp.zeros((rp, w.shape[1]), w.dtype).at[: w.shape[0]].set(w)


def pack_params(params):
    """Pad H (and FC out) to multiples of 128; cast matmul weights to bf16.

    Zero padding is exact: padded gate columns get gates==0 -> padded h/c stay 0."""
    hid_dim = params["lstm"][0][1].shape[0]
    hp = _round_up(hid_dim, 128)
    lstm = []
    for li, (w_ih, w_hh, b) in enumerate(params["lstm"]):
        w_ih_p = _pad_gate_cols(w_ih, hid_dim, hp)
        if li > 0:
            w_ih_p = _pad_rows(w_ih_p, hp)      # input of layer >0 is the padded hidden
        w_hh_p = _pad_rows(_pad_gate_cols(w_hh, hid_dim, hp), hp)
        b_p = _pad_gate_cols(b, hid_dim, hp)    # stays f32 (added after f32 accumulate)
        lstm.append((w_ih_p.astype(jnp.bfloat16), w_hh_p.astype(jnp.bfloat16), b_p))
    w_fc, b_fc = params["fc"]
    out_dim = w_fc.shape[1]
    op = _round_up(out_dim, 128)
    w_fc_p = jnp.zeros((hp, op), jnp.float32).at[:hid_dim, :out_dim].set(w_fc)
    b_fc_p = jnp.zeros((1, op), jnp.float32).at[:, :out_dim].set(b_fc)
    return {"lstm": lstm, "fc": (w_fc_p.astype(jnp.bfloat16), b_fc_p)}


# ----------------------------------------------------------------------------
# Forward
# ----------------------------------------------------------------------------
@jax.jit
def _forward_padded(x_btd, packed):
    """x_btd: (B, T, in_dim) batch_first. Returns padded (Bp, out_pad)."""
    B, T, _ = x_btd.shape
    n_layers = len(packed["lstm"])
    hp = packed["lstm"][0][1].shape[0]
    # bf16 inter-layer activations use a (16, 128) tile -> pad batch to 16 when
    # there is more than one layer; 8 (f32 sublane tile) otherwise.
    bp = _round_up(B, 16 if n_layers > 1 else 8)
    vmem_limit = _vmem_limit_bytes()
    b_shard = _pick_batch_shard(bp)              # split only on multi-TC chips (v7x)
    tc = _pick_time_chunk(T, b_shard, hp, vmem_limit)

    x = jnp.transpose(x_btd, (1, 0, 2)).astype(jnp.float32)            # time-major
    x = jnp.zeros((T, bp, x.shape[-1]), jnp.float32).at[:, :B].set(x)  # batch pad

    h_seq = x
    out = None
    for li, (w_ih, w_hh, b) in enumerate(packed["lstm"]):
        if li < n_layers - 1:
            h_seq = _lstm_layer(h_seq, w_ih, w_hh, b, tc, b_shard, vmem_limit)
        else:
            w_fc, b_fc = packed["fc"]
            out = _lstm_last_fc(h_seq, w_ih, w_hh, b, w_fc, b_fc,
                                tc, b_shard, vmem_limit)
    return out


def lstm_rv_forward(x_btd, packed, out_dim):
    """Equivalent of LSTM_RV.forward (inference)."""
    _probe_buffered()            # feature-detect Buffered(1) outside jit
    B = x_btd.shape[0]
    return _forward_padded(x_btd, packed)[:B, :out_dim]


# ----------------------------------------------------------------------------
# Pure-JAX reference (mirrors the bf16 matmul-input casts; unpadded)
# ----------------------------------------------------------------------------
def _ref_forward(x_btd, params):
    x = jnp.transpose(x_btd, (1, 0, 2)).astype(jnp.float32)  # (T, B, D)
    for (w_ih, w_hh, b) in params["lstm"]:
        T, B, D = x.shape
        H = w_hh.shape[0]
        w_ih_b = w_ih.astype(jnp.bfloat16)
        w_hh_b = w_hh.astype(jnp.bfloat16)
        g_seq = (
            jnp.dot(x.reshape(T * B, D).astype(jnp.bfloat16), w_ih_b,
                    preferred_element_type=jnp.float32) + b
        ).reshape(T, B, 4 * H)

        def step(carry, g_t):
            h, c = carry
            gates = g_t + jnp.dot(h.astype(jnp.bfloat16), w_hh_b,
                                  preferred_element_type=jnp.float32)
            i_g = jax.nn.sigmoid(gates[:, 0 * H:1 * H])
            f_g = jax.nn.sigmoid(gates[:, 1 * H:2 * H])
            g_g = jnp.tanh(gates[:, 2 * H:3 * H])
            o_g = jax.nn.sigmoid(gates[:, 3 * H:4 * H])
            c = f_g * c + i_g * g_g
            h = o_g * jnp.tanh(c)
            return (h, c), h

        init = (jnp.zeros((B, H), jnp.float32), jnp.zeros((B, H), jnp.float32))
        _, x = lax.scan(step, init, g_seq)
    w_fc, b_fc = params["fc"]
    return (jnp.dot(x[-1].astype(jnp.bfloat16), w_fc.astype(jnp.bfloat16),
                    preferred_element_type=jnp.float32) + b_fc)


# ----------------------------------------------------------------------------
if __name__ == "__main__":
    in_dim, hid_dim, n_layers, out_dim = 8, 32, 2, 1
    batch, seq = 4, 8

    key = jax.random.PRNGKey(0)
    key, pkey, xkey = jax.random.split(key, 3)
    params = init_params(pkey, in_dim, hid_dim, n_layers, out_dim)
    packed = pack_params(params)
    x = jax.random.normal(xkey, (batch, seq, in_dim), jnp.float32)

    out = lstm_rv_forward(x, packed, out_dim)
    out = jax.block_until_ready(out)

    ref = _ref_forward(x, params)
    assert out.shape == (batch, out_dim), out.shape
    assert jnp.allclose(out, ref, atol=5e-3, rtol=5e-3), (out, ref)

    print("KERNEL_OK")
</pallas_src>

<mosaic_0001>
module attributes {stable_mosaic.version = 11 : i64} {
  func.func @_copy(%arg0: i32, %arg1: memref<8x128xf32, #tpu.memory_space<vmem>>, %arg2: memref<8x128xf32, #tpu.memory_space<vmem>>) attributes {dimension_semantics = [#tpu.dimension_semantics<arbitrary>], iteration_bounds = array<i64: 1>, scalar_prefetch = 0 : i64, scratch_operands = 0 : i64, tpu.core_type = #tpu.core_type<tc>, window_params = [{pipeline_mode = #tpu.pipeline_mode<synchronous>, transform_indices = @transform_0, window_bounds = array<i64: 8, 128>}, {pipeline_mode = #tpu.pipeline_mode<synchronous>, transform_indices = @transform_1, window_bounds = array<i64: 8, 128>}]} {
    %c0 = arith.constant 0 : index
    %c0_0 = arith.constant 0 : index
    %0 = vector.load %arg1[%c0, %c0_0] : memref<8x128xf32, #tpu.memory_space<vmem>>, vector<8x128xf32>
    %c0_1 = arith.constant 0 : index
    %c0_2 = arith.constant 0 : index
    %1 = vector.load %arg2[%c0_1, %c0_2] : memref<8x128xf32, #tpu.memory_space<vmem>>, vector<8x128xf32>
    tpu.vector_store %arg2[%c0_1, %c0_2], %0 {strides = array<i32>} : memref<8x128xf32, #tpu.memory_space<vmem>>, vector<8x128xf32>,
    return
  }
  func.func @transform_0(%arg0: i32) -> (i32, i32) {
    %c0_i32 = arith.constant 0 : i32
    %c0_i32_0 = arith.constant 0 : i32
    %c0_i32_1 = arith.constant 0 : i32
    return %c0_i32, %c0_i32_0 : i32, i32
  }
  func.func @transform_1(%arg0: i32) -> (i32, i32) {
    %c0_i32 = arith.constant 0 : i32
    %c0_i32_0 = arith.constant 0 : i32
    %c0_i32_1 = arith.constant 0 : i32
    return %c0_i32, %c0_i32_0 : i32, i32
  }
}

module attributes {stable_mosaic.version = 11 : i64} {
  func.func @_lstm_last_fc_kernel(%arg0: i32, %arg1: i32, %arg2: memref<8x16x128xbf16, #tpu.memory_space<vmem>>, %arg3: memref<128x512xbf16, #tpu.memory_space<vmem>>, %arg4: memref<128x512xbf16, #tpu.memory_space<vmem>>, %arg5: memref<1x512xf32, #tpu.memory_space<vmem>>, %arg6: memref<128x128xbf16, #tpu.memory_space<vmem>>, %arg7: memref<1x128xf32, #tpu.memory_space<vmem>>, %arg8: memref<16x128xf32, #tpu.memory_space<vmem>>, %arg9: memref<16x128xf32, #tpu.memory_space<vmem>>, %arg10: memref<16x128xf32, #tpu.memory_space<vmem>>) attributes {dimension_semantics = [#tpu.dimension_semantics<parallel>, #tpu.dimension_semantics<arbitrary>], iteration_bounds = array<i64: 1, 1>, scalar_prefetch = 0 : i64, scratch_operands = 2 : i64, tpu.core_type = #tpu.core_type<tc>, window_params = [{transform_indices = @transform_0, window_bounds = array<i64: 8, 16, 128>}, {pipeline_mode = #tpu.pipeline_mode<synchronous>, transform_indices = @transform_1, window_bounds = array<i64: 128, 512>}, {pipeline_mode = #tpu.pipeline_mode<synchronous>, transform_indices = @transform_2, window_bounds = array<i64: 128, 512>}, {pipeline_mode = #tpu.pipeline_mode<synchronous>, transform_indices = @transform_3, window_bounds = array<i64: 1, 512>}, {pipeline_mode = #tpu.pipeline_mode<synchronous>, transform_indices = @transform_4, window_bounds = array<i64: 128, 128>}, {pipeline_mode = #tpu.pipeline_mode<synchronous>, transform_indices = @transform_5, window_bounds = array<i64: 1, 128>}, {transform_indices = @transform_6, window_bounds = array<i64: 16, 128>}]} {
    %c0_i32 = arith.constant 0 : i32
    %0 = arith.cmpi eq, %arg1, %c0_i32 : i32
    %1 = arith.extui %0 : i1 to i32
    %c0_i32_0 = arith.constant 0 : i32
    %2 = arith.cmpi ne, %1, %c0_i32_0 : i32
    scf.if %2 {
      %cst_72 = arith.constant 0.000000e+00 : f32
      %279 = vector.broadcast %cst_72 : f32 to vector<16x128xf32>
      %c0_73 = arith.constant 0 : index
      %c0_74 = arith.constant 0 : index
      %280 = vector.load %arg9[%c0_73, %c0_74] : memref<16x128xf32, #tpu.memory_space<vmem>>, vector<16x128xf32>
      tpu.vector_store %arg9[%c0_73, %c0_74], %279 {strides = array<i32>} : memref<16x128xf32, #tpu.memory_space<vmem>>, vector<16x128xf32>,
      %cst_75 = arith.constant 0.000000e+00 : f32
      %281 = vector.broadcast %cst_75 : f32 to vector<16x128xf32>
      %c0_76 = arith.constant 0 : index
      %c0_77 = arith.constant 0 : index
      %282 = vector.load %arg10[%c0_76, %c0_77] : memref<16x128xf32, #tpu.memory_space<vmem>>, vector<16x128xf32>
      tpu.vector_store %arg10[%c0_76, %c0_77], %281 {strides = array<i32>} : memref<16x128xf32, #tpu.memory_space<vmem>>, vector<16x128xf32>,
    } else {
    }
    %c0 = arith.constant 0 : index
    %c0_1 = arith.constant 0 : index
    %3 = vector.load %arg3[%c0, %c0_1] : memref<128x512xbf16, #tpu.memory_space<vmem>>, vector<128x512xbf16>
    %c0_2 = arith.constant 0 : index
    %c0_3 = arith.constant 0 : index
    %4 = vector.load %arg4[%c0_2, %c0_3] : memref<128x512xbf16, #tpu.memory_space<vmem>>, vector<128x512xbf16>
    %c0_4 = arith.constant 0 : index
    %c0_5 = arith.constant 0 : index
    %5 = vector.load %arg5[%c0_4, %c0_5] : memref<1x512xf32, #tpu.memory_space<vmem>>, vector<1x512xf32>
    %6 = vector.shape_cast %5 : vector<1x512xf32> to vector<1x512xf32>
    %7 = vector.broadcast %6 : vector<1x512xf32> to vector<16x512xf32>
    %c0_6 = arith.constant 0 : index
    %c0_7 = arith.constant 0 : index
    %8 = vector.load %arg9[%c0_6, %c0_7] : memref<16x128xf32, #tpu.memory_space<vmem>>, vector<16x128xf32>
    %c0_8 = arith.constant 0 : index
    %c0_9 = arith.constant 0 : index
    %9 = vector.load %arg10[%c0_8, %c0_9] : memref<16x128xf32, #tpu.memory_space<vmem>>, vector<16x128xf32>
    %c0_i32_10 = arith.constant 0 : i32
    %10 = arith.index_cast %c0_i32_10 : i32 to index
    %c0_11 = arith.constant 0 : index
    %c0_12 = arith.constant 0 : index
    %11 = vector.load %arg2[%10, %c0_11, %c0_12] : memref<8x16x128xbf16, #tpu.memory_space<vmem>>, vector<1x16x128xbf16>
    %12 = vector.shape_cast %11 : vector<1x16x128xbf16> to vector<16x128xbf16>
    %cst = arith.constant dense<0.000000e+00> : vector<16x512xf32>
    %13 = tpu.matmul %12, %3, %cst {dimension_numbers = #tpu.dot_dimension_numbers<[1], [0], [0], [1], [0, 0, 1, 1], [], []>} : vector<16x128xbf16>, vector<128x512xbf16>, vector<16x512xf32> -> vector<16x512xf32>
    %14 = arith.addf %13, %7 : vector<16x512xf32>
    %15 = arith.truncf %8 : vector<16x128xf32> to vector<16x128xbf16>
    %cst_13 = arith.constant dense<0.000000e+00> : vector<16x512xf32>
    %16 = tpu.matmul %15, %4, %cst_13 {dimension_numbers = #tpu.dot_dimension_numbers<[1], [0], [0], [1], [0, 0, 1, 1], [], []>} : vector<16x128xbf16>, vector<128x512xbf16>, vector<16x512xf32> -> vector<16x512xf32>
    %17 = arith.addf %14, %16 : vector<16x512xf32>
    %18 = vector.extract_strided_slice %17 {offsets = [0, 0], sizes = [16, 128], strides = [1, 1]} : vector<16x512xf32> to vector<16x128xf32>
    %19 = arith.negf %18 : vector<16x128xf32>
    %20 = math.exp %19 : vector<16x128xf32>
    %cst_14 = arith.constant 1.000000e+00 : f32
    %21 = vector.broadcast %cst_14 : f32 to vector<16x128xf32>
    %22 = arith.addf %21, %20 : vector<16x128xf32>
    %23 = arith.divf %21, %22 : vector<16x128xf32>
    %24 = vector.extract_strided_slice %17 {offsets = [0, 128], sizes = [16, 128], strides = [1, 1]} : vector<16x512xf32> to vector<16x128xf32>
    %25 = arith.negf %24 : vector<16x128xf32>
    %26 = math.exp %25 : vector<16x128xf32>
    %cst_15 = arith.constant 1.000000e+00 : f32
    %27 = vector.broadcast %cst_15 : f32 to vector<16x128xf32>
    %28 = arith.addf %27, %26 : vector<16x128xf32>
    %29 = arith.divf %27, %28 : vector<16x128xf32>
    %30 = vector.extract_strided_slice %17 {offsets = [0, 256], sizes = [16, 128], strides = [1, 1]} : vector<16x512xf32> to vector<16x128xf32>
    %31 = math.tanh %30 : vector<16x128xf32>
    %32 = vector.extract_strided_slice %17 {offsets = [0, 384], sizes = [16, 128], strides = [1, 1]} : vector<16x512xf32> to vector<16x128xf32>
    %33 = arith.negf %32 : vector<16x128xf32>
    %34 = math.exp %33 : vector<16x128xf32>
    %cst_16 = arith.constant 1.000000e+00 : f32
    %35 = vector.broadcast %cst_16 : f32 to vector<16x128xf32>
    %36 = arith.addf %35, %34 : vector<16x128xf32>
    %37 = arith.divf %35, %36 : vector<16x128xf32>
    %38 = arith.mulf %29, %9 : vector<16x128xf32>
    %39 = arith.mulf %23, %31 : vector<16x128xf32>
    %40 = arith.addf %38, %39 : vector<16x128xf32>
    %41 = math.tanh %40 : vector<16x128xf32>
    %42 = arith.mulf %37, %41 : vector<16x128xf32>
    %c1_i32 = arith.constant 1 : i32
    %43 = arith.index_cast %c1_i32 : i32 to index
    %c0_17 = arith.constant 0 : index
    %c0_18 = arith.constant 0 : index
    %44 = vector.load %arg2[%43, %c0_17, %c0_18] : memref<8x16x128xbf16, #tpu.memory_space<vmem>>, vector<1x16x128xbf16>
    %45 = vector.shape_cast %44 : vector<1x16x128xbf16> to vector<16x128xbf16>
    %cst_19 = arith.constant dense<0.000000e+00> : vector<16x512xf32>
    %46 = tpu.matmul %45, %3, %cst_19 {dimension_numbers = #tpu.dot_dimension_numbers<[1], [0], [0], [1], [0, 0, 1, 1], [], []>} : vector<16x128xbf16>, vector<128x512xbf16>, vector<16x512xf32> -> vector<16x512xf32>
    %47 = arith.addf %46, %7 : vector<16x512xf32>
    %48 = arith.truncf %42 : vector<16x128xf32> to vector<16x128xbf16>
    %cst_20 = arith.constant dense<0.000000e+00> : vector<16x512xf32>
    %49 = tpu.matmul %48, %4, %cst_20 {dimension_numbers = #tpu.dot_dimension_numbers<[1], [0], [0], [1], [0, 0, 1, 1], [], []>} : vector<16x128xbf16>, vector<128x512xbf16>, vector<16x512xf32> -> vector<16x512xf32>
    %50 = arith.addf %47, %49 : vector<16x512xf32>
    %51 = vector.extract_strided_slice %50 {offsets = [0, 0], sizes = [16, 128], strides = [1, 1]} : vector<16x512xf32> to vector<16x128xf32>
    %52 = arith.negf %51 : vector<16x128xf32>
    %53 = math.exp %52 : vector<16x128xf32>
    %cst_21 = arith.constant 1.000000e+00 : f32
    %54 = vector.broadcast %cst_21 : f32 to vector<16x128xf32>
    %55 = arith.addf %54, %53 : vector<16x128xf32>
    %56 = arith.divf %54, %55 : vector<16x128xf32>
    %57 = vector.extract_strided_slice %50 {offsets = [0, 128], sizes = [16, 128], strides = [1, 1]} : vector<16x512xf32> to vector<16x128xf32>
    %58 = arith.negf %57 : vector<16x128xf32>
    %59 = math.exp %58 : vector<16x128xf32>
    %cst_22 = arith.constant 1.000000e+00 : f32
    %60 = vector.broadcast %cst_22 : f32 to vector<16x128xf32>
    %61 = arith.addf %60, %59 : vector<16x128xf32>
    %62 = arith.divf %60, %61 : vector<16x128xf32>
    %63 = vector.extract_strided_slice %50 {offsets = [0, 256], sizes = [16, 128], strides = [1, 1]} : vector<16x512xf32> to vector<16x128xf32>
    %64 = math.tanh %63 : vector<16x128xf32>
    %65 = vector.extract_strided_slice %50 {offsets = [0, 384], sizes = [16, 128], strides = [1, 1]} : vector<16x512xf32> to vector<16x128xf32>
    %66 = arith.negf %65 : vector<16x128xf32>
    %67 = math.exp %66 : vector<16x128xf32>
    %cst_23 = arith.constant 1.000000e+00 : f32
    %68 = vector.broadcast %cst_23 : f32 to vector<16x128xf32>
    %69 = arith.addf %68, %67 : vector<16x128xf32>
    %70 = arith.divf %68, %69 : vector<16x128xf32>
    %71 = arith.mulf %62, %40 : vector<16x128xf32>
    %72 = arith.mulf %56, %64 : vector<16x128xf32>
    %73 = arith.addf %71, %72 : vector<16x128xf32>
    %74 = math.tanh %73 : vector<16x128xf32>
    %75 = arith.mulf %70, %74 : vector<16x128xf32>
    %c2_i32 = arith.constant 2 : i32
    %76 = arith.index_cast %c2_i32 : i32 to index
    %c0_24 = arith.constant 0 : index
    %c0_25 = arith.constant 0 : index
    %77 = vector.load %arg2[%76, %c0_24, %c0_25] : memref<8x16x128xbf16, #tpu.memory_space<vmem>>, vector<1x16x128xbf16>
    %78 = vector.shape_cast %77 : vector<1x16x128xbf16> to vector<16x128xbf16>
    %cst_26 = arith.constant dense<0.000000e+00> : vector<16x512xf32>
    %79 = tpu.matmul %78, %3, %cst_26 {dimension_numbers = #tpu.dot_dimension_numbers<[1], [0], [0], [1], [0, 0, 1, 1], [], []>} : vector<16x128xbf16>, vector<128x512xbf16>, vector<16x512xf32> -> vector<16x512xf32>
    %80 = arith.addf %79, %7 : vector<16x512xf32>
    %81 = arith.truncf %75 : vector<16x128xf32> to vector<16x128xbf16>
    %cst_27 = arith.constant dense<0.000000e+00> : vector<16x512xf32>
    %82 = tpu.matmul %81, %4, %cst_27 {dimension_numbers = #tpu.dot_dimension_numbers<[1], [0], [0], [1], [0, 0, 1, 1], [], []>} : vector<16x128xbf16>, vector<128x512xbf16>, vector<16x512xf32> -> vector<16x512xf32>
    %83 = arith.addf %80, %82 : vector<16x512xf32>
    %84 = vector.extract_strided_slice %83 {offsets = [0, 0], sizes = [16, 128], strides = [1, 1]} : vector<16x512xf32> to vector<16x128xf32>
    %85 = arith.negf %84 : vector<16x128xf32>
    %86 = math.exp %85 : vector<16x128xf32>
    %cst_28 = arith.constant 1.000000e+00 : f32
    %87 = vector.broadcast %cst_28 : f32 to vector<16x128xf32>
    %88 = arith.addf %87, %86 : vector<16x128xf32>
    %89 = arith.divf %87, %88 : vector<16x128xf32>
    %90 = vector.extract_strided_slice %83 {offsets = [0, 128], sizes = [16, 128], strides = [1, 1]} : vector<16x512xf32> to vector<16x128xf32>
    %91 = arith.negf %90 : vector<16x128xf32>
    %92 = math.exp %91 : vector<16x128xf32>
    %cst_29 = arith.constant 1.000000e+00 : f32
    %93 = vector.broadcast %cst_29 : f32 to vector<16x128xf32>
    %94 = arith.addf %93, %92 : vector<16x128xf32>
    %95 = arith.divf %93, %94 : vector<16x128xf32>
    %96 = vector.extract_strided_slice %83 {offsets = [0, 256], sizes = [16, 128], strides = [1, 1]} : vector<16x512xf32> to vector<16x128xf32>
    %97 = math.tanh %96 : vector<16x128xf32>
    %98 = vector.extract_strided_slice %83 {offsets = [0, 384], sizes = [16, 128], strides = [1, 1]} : vector<16x512xf32> to vector<16x128xf32>
    %99 = arith.negf %98 : vector<16x128xf32>
    %100 = math.exp %99 : vector<16x128xf32>
    %cst_30 = arith.constant 1.000000e+00 : f32
    %101 = vector.broadcast %cst_30 : f32 to vector<16x128xf32>
    %102 = arith.addf %101, %100 : vector<16x128xf32>
    %103 = arith.divf %101, %102 : vector<16x128xf32>
    %104 = arith.mulf %95, %73 : vector<16x128xf32>
    %105 = arith.mulf %89, %97 : vector<16x128xf32>
    %106 = arith.addf %104, %105 : vector<16x128xf32>
    %107 = math.tanh %106 : vector<16x128xf32>
    %108 = arith.mulf %103, %107 : vector<16x128xf32>
    %c3_i32 = arith.constant 3 : i32
    %109 = arith.index_cast %c3_i32 : i32 to index
    %c0_31 = arith.constant 0 : index
    %c0_32 = arith.constant 0 : index
    %110 = vector.load %arg2[%109, %c0_31, %c0_32] : memref<8x16x128xbf16, #tpu.memory_space<vmem>>, vector<1x16x128xbf16>
    %111 = vector.shape_cast %110 : vector<1x16x128xbf16> to vector<16x128xbf16>
    %cst_33 = arith.constant dense<0.000000e+00> : vector<16x512xf32>
    %112 = tpu.matmul %111, %3, %cst_33 {dimension_numbers = #tpu.dot_dimension_numbers<[1], [0], [0], [1], [0, 0, 1, 1], [], []>} : vector<16x128xbf16>, vector<128x512xbf16>, vector<16x512xf32> -> vector<16x512xf32>
    %113 = arith.addf %112, %7 : vector<16x512xf32>
    %114 = arith.truncf %108 : vector<16x128xf32> to vector<16x128xbf16>
    %cst_34 = arith.constant dense<0.000000e+00> : vector<16x512xf32>
    %115 = tpu.matmul %114, %4, %cst_34 {dimension_numbers = #tpu.dot_dimension_numbers<[1], [0], [0], [1], [0, 0, 1, 1], [], []>} : vector<16x128xbf16>, vector<128x512xbf16>, vector<16x512xf32> -> vector<16x512xf32>
    %116 = arith.addf %113, %115 : vector<16x512xf32>
    %117 = vector.extract_strided_slice %116 {offsets = [0, 0], sizes = [16, 128], strides = [1, 1]} : vector<16x512xf32> to vector<16x128xf32>
    %118 = arith.negf %117 : vector<16x128xf32>
    %119 = math.exp %118 : vector<16x128xf32>
    %cst_35 = arith.constant 1.000000e+00 : f32
    %120 = vector.broadcast %cst_35 : f32 to vector<16x128xf32>
    %121 = arith.addf %120, %119 : vector<16x128xf32>
    %122 = arith.divf %120, %121 : vector<16x128xf32>
    %123 = vector.extract_strided_slice %116 {offsets = [0, 128], sizes = [16, 128], strides = [1, 1]} : vector<16x512xf32> to vector<16x128xf32>
    %124 = arith.negf %123 : vector<16x128xf32>
    %125 = math.exp %124 : vector<16x128xf32>
    %cst_36 = arith.constant 1.000000e+00 : f32
    %126 = vector.broadcast %cst_36 : f32 to vector<16x128xf32>
    %127 = arith.addf %126, %125 : vector<16x128xf32>
    %128 = arith.divf %126, %127 : vector<16x128xf32>
    %129 = vector.extract_strided_slice %116 {offsets = [0, 256], sizes = [16, 128], strides = [1, 1]} : vector<16x512xf32> to vector<16x128xf32>
    %130 = math.tanh %129 : vector<16x128xf32>
    %131 = vector.extract_strided_slice %116 {offsets = [0, 384], sizes = [16, 128], strides = [1, 1]} : vector<16x512xf32> to vector<16x128xf32>
    %132 = arith.negf %131 : vector<16x128xf32>
    %133 = math.exp %132 : vector<16x128xf32>
    %cst_37 = arith.constant 1.000000e+00 : f32
    %134 = vector.broadcast %cst_37 : f32 to vector<16x128xf32>
    %135 = arith.addf %134, %133 : vector<16x128xf32>
    %136 = arith.divf %134, %135 : vector<16x128xf32>
    %137 = arith.mulf %128, %106 : vector<16x128xf32>
    %138 = arith.mulf %122, %130 : vector<16x128xf32>
    %139 = arith.addf %137, %138 : vector<16x128xf32>
    %140 = math.tanh %139 : vector<16x128xf32>
    %141 = arith.mulf %136, %140 : vector<16x128xf32>
    %c4_i32 = arith.constant 4 : i32
    %142 = arith.index_cast %c4_i32 : i32 to index
    %c0_38 = arith.constant 0 : index
    %c0_39 = arith.constant 0 : index
    %143 = vector.load %arg2[%142, %c0_38, %c0_39] : memref<8x16x128xbf16, #tpu.memory_space<vmem>>, vector<1x16x128xbf16>
    %144 = vector.shape_cast %143 : vector<1x16x128xbf16> to vector<16x128xbf16>
    %cst_40 = arith.constant dense<0.000000e+00> : vector<16x512xf32>
    %145 = tpu.matmul %144, %3, %cst_40 {dimension_numbers = #tpu.dot_dimension_numbers<[1], [0], [0], [1], [0, 0, 1, 1], [], []>} : vector<16x128xbf16>, vector<128x512xbf16>, vector<16x512xf32> -> vector<16x512xf32>
    %146 = arith.addf %145, %7 : vector<16x512xf32>
    %147 = arith.truncf %141 : vector<16x128xf32> to vector<16x128xbf16>
    %cst_41 = arith.constant dense<0.000000e+00> : vector<16x512xf32>
    %148 = tpu.matmul %147, %4, %cst_41 {dimension_numbers = #tpu.dot_dimension_numbers<[1], [0], [0], [1], [0, 0, 1, 1], [], []>} : vector<16x128xbf16>, vector<128x512xbf16>, vector<16x512xf32> -> vector<16x512xf32>
    %149 = arith.addf %146, %148 : vector<16x512xf32>
    %150 = vector.extract_strided_slice %149 {offsets = [0, 0], sizes = [16, 128], strides = [1, 1]} : vector<16x512xf32> to vector<16x128xf32>
    %151 = arith.negf %150 : vector<16x128xf32>
    %152 = math.exp %151 : vector<16x128xf32>
    %cst_42 = arith.constant 1.000000e+00 : f32
    %153 = vector.broadcast %cst_42 : f32 to vector<16x128xf32>
    %154 = arith.addf %153, %152 : vector<16x128xf32>
    %155 = arith.divf %153, %154 : vector<16x128xf32>
    %156 = vector.extract_strided_slice %149 {offsets = [0, 128], sizes = [16, 128], strides = [1, 1]} : vector<16x512xf32> to vector<16x128xf32>
    %157 = arith.negf %156 : vector<16x128xf32>
    %158 = math.exp %157 : vector<16x128xf32>
    %cst_43 = arith.constant 1.000000e+00 : f32
    %159 = vector.broadcast %cst_43 : f32 to vector<16x128xf32>
    %160 = arith.addf %159, %158 : vector<16x128xf32>
    %161 = arith.divf %159, %160 : vector<16x128xf32>
    %162 = vector.extract_strided_slice %149 {offsets = [0, 256], sizes = [16, 128], strides = [1, 1]} : vector<16x512xf32> to vector<16x128xf32>
    %163 = math.tanh %162 : vector<16x128xf32>
    %164 = vector.extract_strided_slice %149 {offsets = [0, 384], sizes = [16, 128], strides = [1, 1]} : vector<16x512xf32> to vector<16x128xf32>
    %165 = arith.negf %164 : vector<16x128xf32>
    %166 = math.exp %165 : vector<16x128xf32>
    %cst_44 = arith.constant 1.000000e+00 : f32
    %167 = vector.broadcast %cst_44 : f32 to vector<16x128xf32>
    %168 = arith.addf %167, %166 : vector<16x128xf32>
    %169 = arith.divf %167, %168 : vector<16x128xf32>
    %170 = arith.mulf %161, %139 : vector<16x128xf32>
    %171 = arith.mulf %155, %163 : vector<16x128xf32>
    %172 = arith.addf %170, %171 : vector<16x128xf32>
    %173 = math.tanh %172 : vector<16x128xf32>
    %174 = arith.mulf %169, %173 : vector<16x128xf32>
    %c5_i32 = arith.constant 5 : i32
    %175 = arith.index_cast %c5_i32 : i32 to index
    %c0_45 = arith.constant 0 : index
    %c0_46 = arith.constant 0 : index
    %176 = vector.load %arg2[%175, %c0_45, %c0_46] : memref<8x16x128xbf16, #tpu.memory_space<vmem>>, vector<1x16x128xbf16>
    %177 = vector.shape_cast %176 : vector<1x16x128xbf16> to vector<16x128xbf16>
    %cst_47 = arith.constant dense<0.000000e+00> : vector<16x512xf32>
    %178 = tpu.matmul %177, %3, %cst_47 {dimension_numbers = #tpu.dot_dimension_numbers<[1], [0], [0], [1], [0, 0, 1, 1], [], []>} : vector<16x128xbf16>, vector<128x512xbf16>, vector<16x512xf32> -> vector<16x512xf32>
    %179 = arith.addf %178, %7 : vector<16x512xf32>
    %180 = arith.truncf %174 : vector<16x128xf32> to vector<16x128xbf16>
    %cst_48 = arith.constant dense<0.000000e+00> : vector<16x512xf32>
    %181 = tpu.matmul %180, %4, %cst_48 {dimension_numbers = #tpu.dot_dimension_numbers<[1], [0], [0], [1], [0, 0, 1, 1], [], []>} : vector<16x128xbf16>, vector<128x512xbf16>, vector<16x512xf32> -> vector<16x512xf32>
    %182 = arith.addf %179, %181 : vector<16x512xf32>
    %183 = vector.extract_strided_slice %182 {offsets = [0, 0], sizes = [16, 128], strides = [1, 1]} : vector<16x512xf32> to vector<16x128xf32>
    %184 = arith.negf %183 : vector<16x128xf32>
    %185 = math.exp %184 : vector<16x128xf32>
    %cst_49 = arith.constant 1.000000e+00 : f32
    %186 = vector.broadcast %cst_49 : f32 to vector<16x128xf32>
    %187 = arith.addf %186, %185 : vector<16x128xf32>
    %188 = arith.divf %186, %187 : vector<16x128xf32>
    %189 = vector.extract_strided_slice %182 {offsets = [0, 128], sizes = [16, 128], strides = [1, 1]} : vector<16x512xf32> to vector<16x128xf32>
    %190 = arith.negf %189 : vector<16x128xf32>
    %191 = math.exp %190 : vector<16x128xf32>
    %cst_50 = arith.constant 1.000000e+00 : f32
    %192 = vector.broadcast %cst_50 : f32 to vector<16x128xf32>
    %193 = arith.addf %192, %191 : vector<16x128xf32>
    %194 = arith.divf %192, %193 : vector<16x128xf32>
    %195 = vector.extract_strided_slice %182 {offsets = [0, 256], sizes = [16, 128], strides = [1, 1]} : vector<16x512xf32> to vector<16x128xf32>
    %196 = math.tanh %195 : vector<16x128xf32>
    %197 = vector.extract_strided_slice %182 {offsets = [0, 384], sizes = [16, 128], strides = [1, 1]} : vector<16x512xf32> to vector<16x128xf32>
    %198 = arith.negf %197 : vector<16x128xf32>
    %199 = math.exp %198 : vector<16x128xf32>
    %cst_51 = arith.constant 1.000000e+00 : f32
    %200 = vector.broadcast %cst_51 : f32 to vector<16x128xf32>
    %201 = arith.addf %200, %199 : vector<16x128xf32>
    %202 = arith.divf %200, %201 : vector<16x128xf32>
    %203 = arith.mulf %194, %172 : vector<16x128xf32>
    %204 = arith.mulf %188, %196 : vector<16x128xf32>
    %205 = arith.addf %203, %204 : vector<16x128xf32>
    %206 = math.tanh %205 : vector<16x128xf32>
    %207 = arith.mulf %202, %206 : vector<16x128xf32>
    %c6_i32 = arith.constant 6 : i32
    %208 = arith.index_cast %c6_i32 : i32 to index
    %c0_52 = arith.constant 0 : index
    %c0_53 = arith.constant 0 : index
    %209 = vector.load %arg2[%208, %c0_52, %c0_53] : memref<8x16x128xbf16, #tpu.memory_space<vmem>>, vector<1x16x128xbf16>
    %210 = vector.shape_cast %209 : vector<1x16x128xbf16> to vector<16x128xbf16>
    %cst_54 = arith.constant dense<0.000000e+00> : vector<16x512xf32>
    %211 = tpu.matmul %210, %3, %cst_54 {dimension_numbers = #tpu.dot_dimension_numbers<[1], [0], [0], [1], [0, 0, 1, 1], [], []>} : vector<16x128xbf16>, vector<128x512xbf16>, vector<16x512xf32> -> vector<16x512xf32>
    %212 = arith.addf %211, %7 : vector<16x512xf32>
    %213 = arith.truncf %207 : vector<16x128xf32> to vector<16x128xbf16>
    %cst_55 = arith.constant dense<0.000000e+00> : vector<16x512xf32>
    %214 = tpu.matmul %213, %4, %cst_55 {dimension_numbers = #tpu.dot_dimension_numbers<[1], [0], [0], [1], [0, 0, 1, 1], [], []>} : vector<16x128xbf16>, vector<128x512xbf16>, vector<16x512xf32> -> vector<16x512xf32>
    %215 = arith.addf %212, %214 : vector<16x512xf32>
    %216 = vector.extract_strided_slice %215 {offsets = [0, 0], sizes = [16, 128], strides = [1, 1]} : vector<16x512xf32> to vector<16x128xf32>
    %217 = arith.negf %216 : vector<16x128xf32>
    %218 = math.exp %217 : vector<16x128xf32>
    %cst_56 = arith.constant 1.000000e+00 : f32
    %219 = vector.broadcast %cst_56 : f32 to vector<16x128xf32>
    %220 = arith.addf %219, %218 : vector<16x128xf32>
    %221 = arith.divf %219, %220 : vector<16x128xf32>
    %222 = vector.extract_strided_slice %215 {offsets = [0, 128], sizes = [16, 128], strides = [1, 1]} : vector<16x512xf32> to vector<16x128xf32>
    %223 = arith.negf %222 : vector<16x128xf32>
    %224 = math.exp %223 : vector<16x128xf32>
    %cst_57 = arith.constant 1.000000e+00 : f32
    %225 = vector.broadcast %cst_57 : f32 to vector<16x128xf32>
    %226 = arith.addf %225, %224 : vector<16x128xf32>
    %227 = arith.divf %225, %226 : vector<16x128xf32>
    %228 = vector.extract_strided_slice %215 {offsets = [0, 256], sizes = [16, 128], strides = [1, 1]} : vector<16x512xf32> to vector<16x128xf32>
    %229 = math.tanh %228 : vector<16x128xf32>
    %230 = vector.extract_strided_slice %215 {offsets = [0, 384], sizes = [16, 128], strides = [1, 1]} : vector<16x512xf32> to vector<16x128xf32>
    %231 = arith.negf %230 : vector<16x128xf32>
    %232 = math.exp %231 : vector<16x128xf32>
    %cst_58 = arith.constant 1.000000e+00 : f32
    %233 = vector.broadcast %cst_58 : f32 to vector<16x128xf32>
    %234 = arith.addf %233, %232 : vector<16x128xf32>
    %235 = arith.divf %233, %234 : vector<16x128xf32>
    %236 = arith.mulf %227, %205 : vector<16x128xf32>
    %237 = arith.mulf %221, %229 : vector<16x128xf32>
    %238 = arith.addf %236, %237 : vector<16x128xf32>
    %239 = math.tanh %238 : vector<16x128xf32>
    %240 = arith.mulf %235, %239 : vector<16x128xf32>
    %c7_i32 = arith.constant 7 : i32
    %241 = arith.index_cast %c7_i32 : i32 to index
    %c0_59 = arith.constant 0 : index
    %c0_60 = arith.constant 0 : index
    %242 = vector.load %arg2[%241, %c0_59, %c0_60] : memref<8x16x128xbf16, #tpu.memory_space<vmem>>, vector<1x16x128xbf16>
    %243 = vector.shape_cast %242 : vector<1x16x128xbf16> to vector<16x128xbf16>
    %cst_61 = arith.constant dense<0.000000e+00> : vector<16x512xf32>
    %244 = tpu.matmul %243, %3, %cst_61 {dimension_numbers = #tpu.dot_dimension_numbers<[1], [0], [0], [1], [0, 0, 1, 1], [], []>} : vector<16x128xbf16>, vector<128x512xbf16>, vector<16x512xf32> -> vector<16x512xf32>
    %245 = arith.addf %244, %7 : vector<16x512xf32>
    %246 = arith.truncf %240 : vector<16x128xf32> to vector<16x128xbf16>
    %cst_62 = arith.constant dense<0.000000e+00> : vector<16x512xf32>
    %247 = tpu.matmul %246, %4, %cst_62 {dimension_numbers = #tpu.dot_dimension_numbers<[1], [0], [0], [1], [0, 0, 1, 1], [], []>} : vector<16x128xbf16>, vector<128x512xbf16>, vector<16x512xf32> -> vector<16x512xf32>
    %248 = arith.addf %245, %247 : vector<16x512xf32>
    %249 = vector.extract_strided_slice %248 {offsets = [0, 0], sizes = [16, 128], strides = [1, 1]} : vector<16x512xf32> to vector<16x128xf32>
    %250 = arith.negf %249 : vector<16x128xf32>
    %251 = math.exp %250 : vector<16x128xf32>
    %cst_63 = arith.constant 1.000000e+00 : f32
    %252 = vector.broadcast %cst_63 : f32 to vector<16x128xf32>
    %253 = arith.addf %252, %251 : vector<16x128xf32>
    %254 = arith.divf %252, %253 : vector<16x128xf32>
    %255 = vector.extract_strided_slice %248 {offsets = [0, 128], sizes = [16, 128], strides = [1, 1]} : vector<16x512xf32> to vector<16x128xf32>
    %256 = arith.negf %255 : vector<16x128xf32>
    %257 = math.exp %256 : vector<16x128xf32>
    %cst_64 = arith.constant 1.000000e+00 : f32
    %258 = vector.broadcast %cst_64 : f32 to vector<16x128xf32>
    %259 = arith.addf %258, %257 : vector<16x128xf32>
    %260 = arith.divf %258, %259 : vector<16x128xf32>
    %261 = vector.extract_strided_slice %248 {offsets = [0, 256], sizes = [16, 128], strides = [1, 1]} : vector<16x512xf32> to vector<16x128xf32>
    %262 = math.tanh %261 : vector<16x128xf32>
    %263 = vector.extract_strided_slice %248 {offsets = [0, 384], sizes = [16, 128], strides = [1, 1]} : vector<16x512xf32> to vector<16x128xf32>
    %264 = arith.negf %263 : vector<16x128xf32>
    %265 = math.exp %264 : vector<16x128xf32>
    %cst_65 = arith.constant 1.000000e+00 : f32
    %266 = vector.broadcast %cst_65 : f32 to vector<16x128xf32>
    %267 = arith.addf %266, %265 : vector<16x128xf32>
    %268 = arith.divf %266, %267 : vector<16x128xf32>
    %269 = arith.mulf %260, %238 : vector<16x128xf32>
    %270 = arith.mulf %254, %262 : vector<16x128xf32>
    %271 = arith.addf %269, %270 : vector<16x128xf32>
    %272 = math.tanh %271 : vector<16x128xf32>
    %273 = arith.mulf %268, %272 : vector<16x128xf32>
    %c8_i32 = arith.constant 8 : i32
    %c0_66 = arith.constant 0 : index
    %c0_67 = arith.constant 0 : index
    %274 = vector.load %arg9[%c0_66, %c0_67] : memref<16x128xf32, #tpu.memory_space<vmem>>, vector<16x128xf32>
    tpu.vector_store %arg9[%c0_66, %c0_67], %273 {strides = array<i32>} : memref<16x128xf32, #tpu.memory_space<vmem>>, vector<16x128xf32>,
    %c0_68 = arith.constant 0 : index
    %c0_69 = arith.constant 0 : index
    %275 = vector.load %arg10[%c0_68, %c0_69] : memref<16x128xf32, #tpu.memory_space<vmem>>, vector<16x128xf32>
    tpu.vector_store %arg10[%c0_68, %c0_69], %271 {strides = array<i32>} : memref<16x128xf32, #tpu.memory_space<vmem>>, vector<16x128xf32>,
    %c0_i32_70 = arith.constant 0 : i32
    %276 = arith.cmpi eq, %arg1, %c0_i32_70 : i32
    %277 = arith.extui %276 : i1 to i32
    %c0_i32_71 = arith.constant 0 : i32
    %278 = arith.cmpi ne, %277, %c0_i32_71 : i32
    scf.if %278 {
      %279 = arith.truncf %273 : vector<16x128xf32> to vector<16x128xbf16>
      %c0_72 = arith.constant 0 : index
      %c0_73 = arith.constant 0 : index
      %280 = vector.load %arg6[%c0_72, %c0_73] : memref<128x128xbf16, #tpu.memory_space<vmem>>, vector<128x128xbf16>
      %cst_74 = arith.constant dense<0.000000e+00> : vector<16x128xf32>
      %281 = tpu.matmul %279, %280, %cst_74 {dimension_numbers = #tpu.dot_dimension_numbers<[1], [0], [0], [1], [0, 0, 1, 1], [], []>} : vector<16x128xbf16>, vector<128x128xbf16>, vector<16x128xf32> -> vector<16x128xf32>
      %c0_75 = arith.constant 0 : index
      %c0_76 = arith.constant 0 : index
      %282 = vector.load %arg7[%c0_75, %c0_76] : memref<1x128xf32, #tpu.memory_space<vmem>>, vector<1x128xf32>
      %283 = vector.broadcast %282 : vector<1x128xf32> to vector<16x128xf32>
      %284 = arith.addf %281, %283 : vector<16x128xf32>
      %c0_77 = arith.constant 0 : index
      %c0_78 = arith.constant 0 : index
      %285 = vector.load %arg8[%c0_77, %c0_78] : memref<16x128xf32, #tpu.memory_space<vmem>>, vector<16x128xf32>
      tpu.vector_store %arg8[%c0_77, %c0_78], %284 {strides = array<i32>} : memref<16x128xf32, #tpu.memory_space<vmem>>, vector<16x128xf32>,
    } else {
    }
    return
  }
  func.func @transform_0(%arg0: i32, %arg1: i32) -> (i32, i32, i32) {
    %c0_i32 = arith.constant 0 : i32
    %c0_i32_0 = arith.constant 0 : i32
    return %arg1, %arg0, %c0_i32 : i32, i32, i32
  }
  func.func @transform_1(%arg0: i32, %arg1: i32) -> (i32, i32) {
    %c0_i32 = arith.constant 0 : i32
    %c0_i32_0 = arith.constant 0 : i32
    %c0_i32_1 = arith.constant 0 : i32
    return %c0_i32, %c0_i32_0 : i32, i32
  }
  func.func @transform_2(%arg0: i32, %arg1: i32) -> (i32, i32) {
    %c0_i32 = arith.constant 0 : i32
    %c0_i32_0 = arith.constant 0 : i32
    %c0_i32_1 = arith.constant 0 : i32
    return %c0_i32, %c0_i32_0 : i32, i32
  }
  func.func @transform_3(%arg0: i32, %arg1: i32) -> (i32, i32) {
    %c0_i32 = arith.constant 0 : i32
    %c0_i32_0 = arith.constant 0 : i32
    %c0_i32_1 = arith.constant 0 : i32
    return %c0_i32, %c0_i32_0 : i32, i32
  }
  func.func @transform_4(%arg0: i32, %arg1: i32) -> (i32, i32) {
    %c0_i32 = arith.constant 0 : i32
    %c0_i32_0 = arith.constant 0 : i32
    %c0_i32_1 = arith.constant 0 : i32
    return %c0_i32, %c0_i32_0 : i32, i32
  }
  func.func @transform_5(%arg0: i32, %arg1: i32) -> (i32, i32) {
    %c0_i32 = arith.constant 0 : i32
    %c0_i32_0 = arith.constant 0 : i32
    %c0_i32_1 = arith.constant 0 : i32
    return %c0_i32, %c0_i32_0 : i32, i32
  }
  func.func @transform_6(%arg0: i32, %arg1: i32) -> (i32, i32) {
    %c0_i32 = arith.constant 0 : i32
    %c0_i32_0 = arith.constant 0 : i32
    return %arg0, %c0_i32 : i32, i32
  }
}

module attributes {stable_mosaic.version = 11 : i64} {
  func.func @_lstm_layer_kernel(%arg0: i32, %arg1: i32, %arg2: memref<8x16x8xf32, #tpu.memory_space<vmem>>, %arg3: memref<8x512xbf16, #tpu.memory_space<vmem>>, %arg4: memref<128x512xbf16, #tpu.memory_space<vmem>>, %arg5: memref<1x512xf32, #tpu.memory_space<vmem>>, %arg6: memref<8x16x128xbf16, #tpu.memory_space<vmem>>, %arg7: memref<16x128xf32, #tpu.memory_space<vmem>>, %arg8: memref<16x128xf32, #tpu.memory_space<vmem>>) attributes {dimension_semantics = [#tpu.dimension_semantics<parallel>, #tpu.dimension_semantics<arbitrary>], iteration_bounds = array<i64: 1, 1>, scalar_prefetch = 0 : i64, scratch_operands = 2 : i64, tpu.core_type = #tpu.core_type<tc>, window_params = [{transform_indices = @transform_0, window_bounds = array<i64: 8, 16, 8>}, {pipeline_mode = #tpu.pipeline_mode<synchronous>, transform_indices = @transform_1, window_bounds = array<i64: 8, 512>}, {pipeline_mode = #tpu.pipeline_mode<synchronous>, transform_indices = @transform_2, window_bounds = array<i64: 128, 512>}, {pipeline_mode = #tpu.pipeline_mode<synchronous>, transform_indices = @transform_3, window_bounds = array<i64: 1, 512>}, {transform_indices = @transform_4, window_bounds = array<i64: 8, 16, 128>}]} {
    %c0_i32 = arith.constant 0 : i32
    %0 = arith.cmpi eq, %arg1, %c0_i32 : i32
    %1 = arith.extui %0 : i1 to i32
    %c0_i32_0 = arith.constant 0 : i32
    %2 = arith.cmpi ne, %1, %c0_i32_0 : i32
    scf.if %2 {
      %cst_86 = arith.constant 0.000000e+00 : f32
      %324 = vector.broadcast %cst_86 : f32 to vector<16x128xf32>
      %c0_87 = arith.constant 0 : index
      %c0_88 = arith.constant 0 : index
      %325 = vector.load %arg7[%c0_87, %c0_88] : memref<16x128xf32, #tpu.memory_space<vmem>>, vector<16x128xf32>
      tpu.vector_store %arg7[%c0_87, %c0_88], %324 {strides = array<i32>} : memref<16x128xf32, #tpu.memory_space<vmem>>, vector<16x128xf32>,
      %cst_89 = arith.constant 0.000000e+00 : f32
      %326 = vector.broadcast %cst_89 : f32 to vector<16x128xf32>
      %c0_90 = arith.constant 0 : index
      %c0_91 = arith.constant 0 : index
      %327 = vector.load %arg8[%c0_90, %c0_91] : memref<16x128xf32, #tpu.memory_space<vmem>>, vector<16x128xf32>
      tpu.vector_store %arg8[%c0_90, %c0_91], %326 {strides = array<i32>} : memref<16x128xf32, #tpu.memory_space<vmem>>, vector<16x128xf32>,
    } else {
    }
    %c0 = arith.constant 0 : index
    %c0_1 = arith.constant 0 : index
    %3 = vector.load %arg3[%c0, %c0_1] : memref<8x512xbf16, #tpu.memory_space<vmem>>, vector<8x512xbf16>
    %c0_2 = arith.constant 0 : index
    %c0_3 = arith.constant 0 : index
    %4 = vector.load %arg4[%c0_2, %c0_3] : memref<128x512xbf16, #tpu.memory_space<vmem>>, vector<128x512xbf16>
    %c0_4 = arith.constant 0 : index
    %c0_5 = arith.constant 0 : index
    %5 = vector.load %arg5[%c0_4, %c0_5] : memref<1x512xf32, #tpu.memory_space<vmem>>, vector<1x512xf32>
    %6 = vector.shape_cast %5 : vector<1x512xf32> to vector<1x512xf32>
    %7 = vector.broadcast %6 : vector<1x512xf32> to vector<16x512xf32>
    %c0_6 = arith.constant 0 : index
    %c0_7 = arith.constant 0 : index
    %8 = vector.load %arg7[%c0_6, %c0_7] : memref<16x128xf32, #tpu.memory_space<vmem>>, vector<16x128xf32>
    %c0_8 = arith.constant 0 : index
    %c0_9 = arith.constant 0 : index
    %9 = vector.load %arg8[%c0_8, %c0_9] : memref<16x128xf32, #tpu.memory_space<vmem>>, vector<16x128xf32>
    %c0_i32_10 = arith.constant 0 : i32
    %10 = arith.index_cast %c0_i32_10 : i32 to index
    %c0_11 = arith.constant 0 : index
    %c0_12 = arith.constant 0 : index
    %11 = vector.load %arg2[%10, %c0_11, %c0_12] : memref<8x16x8xf32, #tpu.memory_space<vmem>>, vector<1x16x8xf32>
    %12 = vector.shape_cast %11 : vector<1x16x8xf32> to vector<16x8xf32>
    %13 = arith.truncf %12 : vector<16x8xf32> to vector<16x8xbf16>
    %cst = arith.constant dense<0.000000e+00> : vector<16x512xf32>
    %14 = tpu.matmul %13, %3, %cst {dimension_numbers = #tpu.dot_dimension_numbers<[1], [0], [0], [1], [0, 0, 1, 1], [], []>} : vector<16x8xbf16>, vector<8x512xbf16>, vector<16x512xf32> -> vector<16x512xf32>
    %15 = arith.addf %14, %7 : vector<16x512xf32>
    %16 = arith.truncf %8 : vector<16x128xf32> to vector<16x128xbf16>
    %cst_13 = arith.constant dense<0.000000e+00> : vector<16x512xf32>
    %17 = tpu.matmul %16, %4, %cst_13 {dimension_numbers = #tpu.dot_dimension_numbers<[1], [0], [0], [1], [0, 0, 1, 1], [], []>} : vector<16x128xbf16>, vector<128x512xbf16>, vector<16x512xf32> -> vector<16x512xf32>
    %18 = arith.addf %15, %17 : vector<16x512xf32>
    %19 = vector.extract_strided_slice %18 {offsets = [0, 0], sizes = [16, 128], strides = [1, 1]} : vector<16x512xf32> to vector<16x128xf32>
    %20 = arith.negf %19 : vector<16x128xf32>
    %21 = math.exp %20 : vector<16x128xf32>
    %cst_14 = arith.constant 1.000000e+00 : f32
    %22 = vector.broadcast %cst_14 : f32 to vector<16x128xf32>
    %23 = arith.addf %22, %21 : vector<16x128xf32>
    %24 = arith.divf %22, %23 : vector<16x128xf32>
    %25 = vector.extract_strided_slice %18 {offsets = [0, 128], sizes = [16, 128], strides = [1, 1]} : vector<16x512xf32> to vector<16x128xf32>
    %26 = arith.negf %25 : vector<16x128xf32>
    %27 = math.exp %26 : vector<16x128xf32>
    %cst_15 = arith.constant 1.000000e+00 : f32
    %28 = vector.broadcast %cst_15 : f32 to vector<16x128xf32>
    %29 = arith.addf %28, %27 : vector<16x128xf32>
    %30 = arith.divf %28, %29 : vector<16x128xf32>
    %31 = vector.extract_strided_slice %18 {offsets = [0, 256], sizes = [16, 128], strides = [1, 1]} : vector<16x512xf32> to vector<16x128xf32>
    %32 = math.tanh %31 : vector<16x128xf32>
    %33 = vector.extract_strided_slice %18 {offsets = [0, 384], sizes = [16, 128], strides = [1, 1]} : vector<16x512xf32> to vector<16x128xf32>
    %34 = arith.negf %33 : vector<16x128xf32>
    %35 = math.exp %34 : vector<16x128xf32>
    %cst_16 = arith.constant 1.000000e+00 : f32
    %36 = vector.broadcast %cst_16 : f32 to vector<16x128xf32>
    %37 = arith.addf %36, %35 : vector<16x128xf32>
    %38 = arith.divf %36, %37 : vector<16x128xf32>
    %39 = arith.mulf %30, %9 : vector<16x128xf32>
    %40 = arith.mulf %24, %32 : vector<16x128xf32>
    %41 = arith.addf %39, %40 : vector<16x128xf32>
    %42 = math.tanh %41 : vector<16x128xf32>
    %43 = arith.mulf %38, %42 : vector<16x128xf32>
    %44 = arith.truncf %43 : vector<16x128xf32> to vector<16x128xbf16>
    %45 = arith.index_cast %c0_i32_10 : i32 to index
    %c0_17 = arith.constant 0 : index
    %c0_18 = arith.constant 0 : index
    %46 = vector.load %arg6[%45, %c0_17, %c0_18] : memref<8x16x128xbf16, #tpu.memory_space<vmem>>, vector<1x16x128xbf16>
    %47 = vector.shape_cast %46 : vector<1x16x128xbf16> to vector<16x128xbf16>
    %48 = vector.shape_cast %44 : vector<16x128xbf16> to vector<1x16x128xbf16>
    tpu.vector_store %arg6[%45, %c0_17, %c0_18], %48 {strides = array<i32>} : memref<8x16x128xbf16, #tpu.memory_space<vmem>>, vector<1x16x128xbf16>,
    %c1_i32 = arith.constant 1 : i32
    %49 = arith.index_cast %c1_i32 : i32 to index
    %c0_19 = arith.constant 0 : index
    %c0_20 = arith.constant 0 : index
    %50 = vector.load %arg2[%49, %c0_19, %c0_20] : memref<8x16x8xf32, #tpu.memory_space<vmem>>, vector<1x16x8xf32>
    %51 = vector.shape_cast %50 : vector<1x16x8xf32> to vector<16x8xf32>
    %52 = arith.truncf %51 : vector<16x8xf32> to vector<16x8xbf16>
    %cst_21 = arith.constant dense<0.000000e+00> : vector<16x512xf32>
    %53 = tpu.matmul %52, %3, %cst_21 {dimension_numbers = #tpu.dot_dimension_numbers<[1], [0], [0], [1], [0, 0, 1, 1], [], []>} : vector<16x8xbf16>, vector<8x512xbf16>, vector<16x512xf32> -> vector<16x512xf32>
    %54 = arith.addf %53, %7 : vector<16x512xf32>
    %55 = arith.truncf %43 : vector<16x128xf32> to vector<16x128xbf16>
    %cst_22 = arith.constant dense<0.000000e+00> : vector<16x512xf32>
    %56 = tpu.matmul %55, %4, %cst_22 {dimension_numbers = #tpu.dot_dimension_numbers<[1], [0], [0], [1], [0, 0, 1, 1], [], []>} : vector<16x128xbf16>, vector<128x512xbf16>, vector<16x512xf32> -> vector<16x512xf32>
    %57 = arith.addf %54, %56 : vector<16x512xf32>
    %58 = vector.extract_strided_slice %57 {offsets = [0, 0], sizes = [16, 128], strides = [1, 1]} : vector<16x512xf32> to vector<16x128xf32>
    %59 = arith.negf %58 : vector<16x128xf32>
    %60 = math.exp %59 : vector<16x128xf32>
    %cst_23 = arith.constant 1.000000e+00 : f32
    %61 = vector.broadcast %cst_23 : f32 to vector<16x128xf32>
    %62 = arith.addf %61, %60 : vector<16x128xf32>
    %63 = arith.divf %61, %62 : vector<16x128xf32>
    %64 = vector.extract_strided_slice %57 {offsets = [0, 128], sizes = [16, 128], strides = [1, 1]} : vector<16x512xf32> to vector<16x128xf32>
    %65 = arith.negf %64 : vector<16x128xf32>
    %66 = math.exp %65 : vector<16x128xf32>
    %cst_24 = arith.constant 1.000000e+00 : f32
    %67 = vector.broadcast %cst_24 : f32 to vector<16x128xf32>
    %68 = arith.addf %67, %66 : vector<16x128xf32>
    %69 = arith.divf %67, %68 : vector<16x128xf32>
    %70 = vector.extract_strided_slice %57 {offsets = [0, 256], sizes = [16, 128], strides = [1, 1]} : vector<16x512xf32> to vector<16x128xf32>
    %71 = math.tanh %70 : vector<16x128xf32>
    %72 = vector.extract_strided_slice %57 {offsets = [0, 384], sizes = [16, 128], strides = [1, 1]} : vector<16x512xf32> to vector<16x128xf32>
    %73 = arith.negf %72 : vector<16x128xf32>
    %74 = math.exp %73 : vector<16x128xf32>
    %cst_25 = arith.constant 1.000000e+00 : f32
    %75 = vector.broadcast %cst_25 : f32 to vector<16x128xf32>
    %76 = arith.addf %75, %74 : vector<16x128xf32>
    %77 = arith.divf %75, %76 : vector<16x128xf32>
    %78 = arith.mulf %69, %41 : vector<16x128xf32>
    %79 = arith.mulf %63, %71 : vector<16x128xf32>
    %80 = arith.addf %78, %79 : vector<16x128xf32>
    %81 = math.tanh %80 : vector<16x128xf32>
    %82 = arith.mulf %77, %81 : vector<16x128xf32>
    %83 = arith.truncf %82 : vector<16x128xf32> to vector<16x128xbf16>
    %84 = arith.index_cast %c1_i32 : i32 to index
    %c0_26 = arith.constant 0 : index
    %c0_27 = arith.constant 0 : index
    %85 = vector.load %arg6[%84, %c0_26, %c0_27] : memref<8x16x128xbf16, #tpu.memory_space<vmem>>, vector<1x16x128xbf16>
    %86 = vector.shape_cast %85 : vector<1x16x128xbf16> to vector<16x128xbf16>
    %87 = vector.shape_cast %83 : vector<16x128xbf16> to vector<1x16x128xbf16>
    tpu.vector_store %arg6[%84, %c0_26, %c0_27], %87 {strides = array<i32>} : memref<8x16x128xbf16, #tpu.memory_space<vmem>>, vector<1x16x128xbf16>,
    %c2_i32 = arith.constant 2 : i32
    %88 = arith.index_cast %c2_i32 : i32 to index
    %c0_28 = arith.constant 0 : index
    %c0_29 = arith.constant 0 : index
    %89 = vector.load %arg2[%88, %c0_28, %c0_29] : memref<8x16x8xf32, #tpu.memory_space<vmem>>, vector<1x16x8xf32>
    %90 = vector.shape_cast %89 : vector<1x16x8xf32> to vector<16x8xf32>
    %91 = arith.truncf %90 : vector<16x8xf32> to vector<16x8xbf16>
    %cst_30 = arith.constant dense<0.000000e+00> : vector<16x512xf32>
    %92 = tpu.matmul %91, %3, %cst_30 {dimension_numbers = #tpu.dot_dimension_numbers<[1], [0], [0], [1], [0, 0, 1, 1], [], []>} : vector<16x8xbf16>, vector<8x512xbf16>, vector<16x512xf32> -> vector<16x512xf32>
    %93 = arith.addf %92, %7 : vector<16x512xf32>
    %94 = arith.truncf %82 : vector<16x128xf32> to vector<16x128xbf16>
    %cst_31 = arith.constant dense<0.000000e+00> : vector<16x512xf32>
    %95 = tpu.matmul %94, %4, %cst_31 {dimension_numbers = #tpu.dot_dimension_numbers<[1], [0], [0], [1], [0, 0, 1, 1], [], []>} : vector<16x128xbf16>, vector<128x512xbf16>, vector<16x512xf32> -> vector<16x512xf32>
    %96 = arith.addf %93, %95 : vector<16x512xf32>
    %97 = vector.extract_strided_slice %96 {offsets = [0, 0], sizes = [16, 128], strides = [1, 1]} : vector<16x512xf32> to vector<16x128xf32>
    %98 = arith.negf %97 : vector<16x128xf32>
    %99 = math.exp %98 : vector<16x128xf32>
    %cst_32 = arith.constant 1.000000e+00 : f32
    %100 = vector.broadcast %cst_32 : f32 to vector<16x128xf32>
    %101 = arith.addf %100, %99 : vector<16x128xf32>
    %102 = arith.divf %100, %101 : vector<16x128xf32>
    %103 = vector.extract_strided_slice %96 {offsets = [0, 128], sizes = [16, 128], strides = [1, 1]} : vector<16x512xf32> to vector<16x128xf32>
    %104 = arith.negf %103 : vector<16x128xf32>
    %105 = math.exp %104 : vector<16x128xf32>
    %cst_33 = arith.constant 1.000000e+00 : f32
    %106 = vector.broadcast %cst_33 : f32 to vector<16x128xf32>
    %107 = arith.addf %106, %105 : vector<16x128xf32>
    %108 = arith.divf %106, %107 : vector<16x128xf32>
    %109 = vector.extract_strided_slice %96 {offsets = [0, 256], sizes = [16, 128], strides = [1, 1]} : vector<16x512xf32> to vector<16x128xf32>
    %110 = math.tanh %109 : vector<16x128xf32>
    %111 = vector.extract_strided_slice %96 {offsets = [0, 384], sizes = [16, 128], strides = [1, 1]} : vector<16x512xf32> to vector<16x128xf32>
    %112 = arith.negf %111 : vector<16x128xf32>
    %113 = math.exp %112 : vector<16x128xf32>
    %cst_34 = arith.constant 1.000000e+00 : f32
    %114 = vector.broadcast %cst_34 : f32 to vector<16x128xf32>
    %115 = arith.addf %114, %113 : vector<16x128xf32>
    %116 = arith.divf %114, %115 : vector<16x128xf32>
    %117 = arith.mulf %108, %80 : vector<16x128xf32>
    %118 = arith.mulf %102, %110 : vector<16x128xf32>
    %119 = arith.addf %117, %118 : vector<16x128xf32>
    %120 = math.tanh %119 : vector<16x128xf32>
    %121 = arith.mulf %116, %120 : vector<16x128xf32>
    %122 = arith.truncf %121 : vector<16x128xf32> to vector<16x128xbf16>
    %123 = arith.index_cast %c2_i32 : i32 to index
    %c0_35 = arith.constant 0 : index
    %c0_36 = arith.constant 0 : index
    %124 = vector.load %arg6[%123, %c0_35, %c0_36] : memref<8x16x128xbf16, #tpu.memory_space<vmem>>, vector<1x16x128xbf16>
    %125 = vector.shape_cast %124 : vector<1x16x128xbf16> to vector<16x128xbf16>
    %126 = vector.shape_cast %122 : vector<16x128xbf16> to vector<1x16x128xbf16>
    tpu.vector_store %arg6[%123, %c0_35, %c0_36], %126 {strides = array<i32>} : memref<8x16x128xbf16, #tpu.memory_space<vmem>>, vector<1x16x128xbf16>,
    %c3_i32 = arith.constant 3 : i32
    %127 = arith.index_cast %c3_i32 : i32 to index
    %c0_37 = arith.constant 0 : index
    %c0_38 = arith.constant 0 : index
    %128 = vector.load %arg2[%127, %c0_37, %c0_38] : memref<8x16x8xf32, #tpu.memory_space<vmem>>, vector<1x16x8xf32>
    %129 = vector.shape_cast %128 : vector<1x16x8xf32> to vector<16x8xf32>
    %130 = arith.truncf %129 : vector<16x8xf32> to vector<16x8xbf16>
    %cst_39 = arith.constant dense<0.000000e+00> : vector<16x512xf32>
    %131 = tpu.matmul %130, %3, %cst_39 {dimension_numbers = #tpu.dot_dimension_numbers<[1], [0], [0], [1], [0, 0, 1, 1], [], []>} : vector<16x8xbf16>, vector<8x512xbf16>, vector<16x512xf32> -> vector<16x512xf32>
    %132 = arith.addf %131, %7 : vector<16x512xf32>
    %133 = arith.truncf %121 : vector<16x128xf32> to vector<16x128xbf16>
    %cst_40 = arith.constant dense<0.000000e+00> : vector<16x512xf32>
    %134 = tpu.matmul %133, %4, %cst_40 {dimension_numbers = #tpu.dot_dimension_numbers<[1], [0], [0], [1], [0, 0, 1, 1], [], []>} : vector<16x128xbf16>, vector<128x512xbf16>, vector<16x512xf32> -> vector<16x512xf32>
    %135 = arith.addf %132, %134 : vector<16x512xf32>
    %136 = vector.extract_strided_slice %135 {offsets = [0, 0], sizes = [16, 128], strides = [1, 1]} : vector<16x512xf32> to vector<16x128xf32>
    %137 = arith.negf %136 : vector<16x128xf32>
    %138 = math.exp %137 : vector<16x128xf32>
    %cst_41 = arith.constant 1.000000e+00 : f32
    %139 = vector.broadcast %cst_41 : f32 to vector<16x128xf32>
    %140 = arith.addf %139, %138 : vector<16x128xf32>
    %141 = arith.divf %139, %140 : vector<16x128xf32>
    %142 = vector.extract_strided_slice %135 {offsets = [0, 128], sizes = [16, 128], strides = [1, 1]} : vector<16x512xf32> to vector<16x128xf32>
    %143 = arith.negf %142 : vector<16x128xf32>
    %144 = math.exp %143 : vector<16x128xf32>
    %cst_42 = arith.constant 1.000000e+00 : f32
    %145 = vector.broadcast %cst_42 : f32 to vector<16x128xf32>
    %146 = arith.addf %145, %144 : vector<16x128xf32>
    %147 = arith.divf %145, %146 : vector<16x128xf32>
    %148 = vector.extract_strided_slice %135 {offsets = [0, 256], sizes = [16, 128], strides = [1, 1]} : vector<16x512xf32> to vector<16x128xf32>
    %149 = math.tanh %148 : vector<16x128xf32>
    %150 = vector.extract_strided_slice %135 {offsets = [0, 384], sizes = [16, 128], strides = [1, 1]} : vector<16x512xf32> to vector<16x128xf32>
    %151 = arith.negf %150 : vector<16x128xf32>
    %152 = math.exp %151 : vector<16x128xf32>
    %cst_43 = arith.constant 1.000000e+00 : f32
    %153 = vector.broadcast %cst_43 : f32 to vector<16x128xf32>
    %154 = arith.addf %153, %152 : vector<16x128xf32>
    %155 = arith.divf %153, %154 : vector<16x128xf32>
    %156 = arith.mulf %147, %119 : vector<16x128xf32>
    %157 = arith.mulf %141, %149 : vector<16x128xf32>
    %158 = arith.addf %156, %157 : vector<16x128xf32>
    %159 = math.tanh %158 : vector<16x128xf32>
    %160 = arith.mulf %155, %159 : vector<16x128xf32>
    %161 = arith.truncf %160 : vector<16x128xf32> to vector<16x128xbf16>
    %162 = arith.index_cast %c3_i32 : i32 to index
    %c0_44 = arith.constant 0 : index
    %c0_45 = arith.constant 0 : index
    %163 = vector.load %arg6[%162, %c0_44, %c0_45] : memref<8x16x128xbf16, #tpu.memory_space<vmem>>, vector<1x16x128xbf16>
    %164 = vector.shape_cast %163 : vector<1x16x128xbf16> to vector<16x128xbf16>
    %165 = vector.shape_cast %161 : vector<16x128xbf16> to vector<1x16x128xbf16>
    tpu.vector_store %arg6[%162, %c0_44, %c0_45], %165 {strides = array<i32>} : memref<8x16x128xbf16, #tpu.memory_space<vmem>>, vector<1x16x128xbf16>,
    %c4_i32 = arith.constant 4 : i32
    %166 = arith.index_cast %c4_i32 : i32 to index
    %c0_46 = arith.constant 0 : index
    %c0_47 = arith.constant 0 : index
    %167 = vector.load %arg2[%166, %c0_46, %c0_47] : memref<8x16x8xf32, #tpu.memory_space<vmem>>, vector<1x16x8xf32>
    %168 = vector.shape_cast %167 : vector<1x16x8xf32> to vector<16x8xf32>
    %169 = arith.truncf %168 : vector<16x8xf32> to vector<16x8xbf16>
    %cst_48 = arith.constant dense<0.000000e+00> : vector<16x512xf32>
    %170 = tpu.matmul %169, %3, %cst_48 {dimension_numbers = #tpu.dot_dimension_numbers<[1], [0], [0], [1], [0, 0, 1, 1], [], []>} : vector<16x8xbf16>, vector<8x512xbf16>, vector<16x512xf32> -> vector<16x512xf32>
    %171 = arith.addf %170, %7 : vector<16x512xf32>
    %172 = arith.truncf %160 : vector<16x128xf32> to vector<16x128xbf16>
    %cst_49 = arith.constant dense<0.000000e+00> : vector<16x512xf32>
    %173 = tpu.matmul %172, %4, %cst_49 {dimension_numbers = #tpu.dot_dimension_numbers<[1], [0], [0], [1], [0, 0, 1, 1], [], []>} : vector<16x128xbf16>, vector<128x512xbf16>, vector<16x512xf32> -> vector<16x512xf32>
    %174 = arith.addf %171, %173 : vector<16x512xf32>
    %175 = vector.extract_strided_slice %174 {offsets = [0, 0], sizes = [16, 128], strides = [1, 1]} : vector<16x512xf32> to vector<16x128xf32>
    %176 = arith.negf %175 : vector<16x128xf32>
    %177 = math.exp %176 : vector<16x128xf32>
    %cst_50 = arith.constant 1.000000e+00 : f32
    %178 = vector.broadcast %cst_50 : f32 to vector<16x128xf32>
    %179 = arith.addf %178, %177 : vector<16x128xf32>
    %180 = arith.divf %178, %179 : vector<16x128xf32>
    %181 = vector.extract_strided_slice %174 {offsets = [0, 128], sizes = [16, 128], strides = [1, 1]} : vector<16x512xf32> to vector<16x128xf32>
    %182 = arith.negf %181 : vector<16x128xf32>
    %183 = math.exp %182 : vector<16x128xf32>
    %cst_51 = arith.constant 1.000000e+00 : f32
    %184 = vector.broadcast %cst_51 : f32 to vector<16x128xf32>
    %185 = arith.addf %184, %183 : vector<16x128xf32>
    %186 = arith.divf %184, %185 : vector<16x128xf32>
    %187 = vector.extract_strided_slice %174 {offsets = [0, 256], sizes = [16, 128], strides = [1, 1]} : vector<16x512xf32> to vector<16x128xf32>
    %188 = math.tanh %187 : vector<16x128xf32>
    %189 = vector.extract_strided_slice %174 {offsets = [0, 384], sizes = [16, 128], strides = [1, 1]} : vector<16x512xf32> to vector<16x128xf32>
    %190 = arith.negf %189 : vector<16x128xf32>
    %191 = math.exp %190 : vector<16x128xf32>
    %cst_52 = arith.constant 1.000000e+00 : f32
    %192 = vector.broadcast %cst_52 : f32 to vector<16x128xf32>
    %193 = arith.addf %192, %191 : vector<16x128xf32>
    %194 = arith.divf %192, %193 : vector<16x128xf32>
    %195 = arith.mulf %186, %158 : vector<16x128xf32>
    %196 = arith.mulf %180, %188 : vector<16x128xf32>
    %197 = arith.addf %195, %196 : vector<16x128xf32>
    %198 = math.tanh %197 : vector<16x128xf32>
    %199 = arith.mulf %194, %198 : vector<16x128xf32>
    %200 = arith.truncf %199 : vector<16x128xf32> to vector<16x128xbf16>
    %201 = arith.index_cast %c4_i32 : i32 to index
    %c0_53 = arith.constant 0 : index
    %c0_54 = arith.constant 0 : index
    %202 = vector.load %arg6[%201, %c0_53, %c0_54] : memref<8x16x128xbf16, #tpu.memory_space<vmem>>, vector<1x16x128xbf16>
    %203 = vector.shape_cast %202 : vector<1x16x128xbf16> to vector<16x128xbf16>
    %204 = vector.shape_cast %200 : vector<16x128xbf16> to vector<1x16x128xbf16>
    tpu.vector_store %arg6[%201, %c0_53, %c0_54], %204 {strides = array<i32>} : memref<8x16x128xbf16, #tpu.memory_space<vmem>>, vector<1x16x128xbf16>,
    %c5_i32 = arith.constant 5 : i32
    %205 = arith.index_cast %c5_i32 : i32 to index
    %c0_55 = arith.constant 0 : index
    %c0_56 = arith.constant 0 : index
    %206 = vector.load %arg2[%205, %c0_55, %c0_56] : memref<8x16x8xf32, #tpu.memory_space<vmem>>, vector<1x16x8xf32>
    %207 = vector.shape_cast %206 : vector<1x16x8xf32> to vector<16x8xf32>
    %208 = arith.truncf %207 : vector<16x8xf32> to vector<16x8xbf16>
    %cst_57 = arith.constant dense<0.000000e+00> : vector<16x512xf32>
    %209 = tpu.matmul %208, %3, %cst_57 {dimension_numbers = #tpu.dot_dimension_numbers<[1], [0], [0], [1], [0, 0, 1, 1], [], []>} : vector<16x8xbf16>, vector<8x512xbf16>, vector<16x512xf32> -> vector<16x512xf32>
    %210 = arith.addf %209, %7 : vector<16x512xf32>
    %211 = arith.truncf %199 : vector<16x128xf32> to vector<16x128xbf16>
    %cst_58 = arith.constant dense<0.000000e+00> : vector<16x512xf32>
    %212 = tpu.matmul %211, %4, %cst_58 {dimension_numbers = #tpu.dot_dimension_numbers<[1], [0], [0], [1], [0, 0, 1, 1], [], []>} : vector<16x128xbf16>, vector<128x512xbf16>, vector<16x512xf32> -> vector<16x512xf32>
    %213 = arith.addf %210, %212 : vector<16x512xf32>
    %214 = vector.extract_strided_slice %213 {offsets = [0, 0], sizes = [16, 128], strides = [1, 1]} : vector<16x512xf32> to vector<16x128xf32>
    %215 = arith.negf %214 : vector<16x128xf32>
    %216 = math.exp %215 : vector<16x128xf32>
    %cst_59 = arith.constant 1.000000e+00 : f32
    %217 = vector.broadcast %cst_59 : f32 to vector<16x128xf32>
    %218 = arith.addf %217, %216 : vector<16x128xf32>
    %219 = arith.divf %217, %218 : vector<16x128xf32>
    %220 = vector.extract_strided_slice %213 {offsets = [0, 128], sizes = [16, 128], strides = [1, 1]} : vector<16x512xf32> to vector<16x128xf32>
    %221 = arith.negf %220 : vector<16x128xf32>
    %222 = math.exp %221 : vector<16x128xf32>
    %cst_60 = arith.constant 1.000000e+00 : f32
    %223 = vector.broadcast %cst_60 : f32 to vector<16x128xf32>
    %224 = arith.addf %223, %222 : vector<16x128xf32>
    %225 = arith.divf %223, %224 : vector<16x128xf32>
    %226 = vector.extract_strided_slice %213 {offsets = [0, 256], sizes = [16, 128], strides = [1, 1]} : vector<16x512xf32> to vector<16x128xf32>
    %227 = math.tanh %226 : vector<16x128xf32>
    %228 = vector.extract_strided_slice %213 {offsets = [0, 384], sizes = [16, 128], strides = [1, 1]} : vector<16x512xf32> to vector<16x128xf32>
    %229 = arith.negf %228 : vector<16x128xf32>
    %230 = math.exp %229 : vector<16x128xf32>
    %cst_61 = arith.constant 1.000000e+00 : f32
    %231 = vector.broadcast %cst_61 : f32 to vector<16x128xf32>
    %232 = arith.addf %231, %230 : vector<16x128xf32>
    %233 = arith.divf %231, %232 : vector<16x128xf32>
    %234 = arith.mulf %225, %197 : vector<16x128xf32>
    %235 = arith.mulf %219, %227 : vector<16x128xf32>
    %236 = arith.addf %234, %235 : vector<16x128xf32>
    %237 = math.tanh %236 : vector<16x128xf32>
    %238 = arith.mulf %233, %237 : vector<16x128xf32>
    %239 = arith.truncf %238 : vector<16x128xf32> to vector<16x128xbf16>
    %240 = arith.index_cast %c5_i32 : i32 to index
    %c0_62 = arith.constant 0 : index
    %c0_63 = arith.constant 0 : index
    %241 = vector.load %arg6[%240, %c0_62, %c0_63] : memref<8x16x128xbf16, #tpu.memory_space<vmem>>, vector<1x16x128xbf16>
    %242 = vector.shape_cast %241 : vector<1x16x128xbf16> to vector<16x128xbf16>
    %243 = vector.shape_cast %239 : vector<16x128xbf16> to vector<1x16x128xbf16>
    tpu.vector_store %arg6[%240, %c0_62, %c0_63], %243 {strides = array<i32>} : memref<8x16x128xbf16, #tpu.memory_space<vmem>>, vector<1x16x128xbf16>,
    %c6_i32 = arith.constant 6 : i32
    %244 = arith.index_cast %c6_i32 : i32 to index
    %c0_64 = arith.constant 0 : index
    %c0_65 = arith.constant 0 : index
    %245 = vector.load %arg2[%244, %c0_64, %c0_65] : memref<8x16x8xf32, #tpu.memory_space<vmem>>, vector<1x16x8xf32>
    %246 = vector.shape_cast %245 : vector<1x16x8xf32> to vector<16x8xf32>
    %247 = arith.truncf %246 : vector<16x8xf32> to vector<16x8xbf16>
    %cst_66 = arith.constant dense<0.000000e+00> : vector<16x512xf32>
    %248 = tpu.matmul %247, %3, %cst_66 {dimension_numbers = #tpu.dot_dimension_numbers<[1], [0], [0], [1], [0, 0, 1, 1], [], []>} : vector<16x8xbf16>, vector<8x512xbf16>, vector<16x512xf32> -> vector<16x512xf32>
    %249 = arith.addf %248, %7 : vector<16x512xf32>
    %250 = arith.truncf %238 : vector<16x128xf32> to vector<16x128xbf16>
    %cst_67 = arith.constant dense<0.000000e+00> : vector<16x512xf32>
    %251 = tpu.matmul %250, %4, %cst_67 {dimension_numbers = #tpu.dot_dimension_numbers<[1], [0], [0], [1], [0, 0, 1, 1], [], []>} : vector<16x128xbf16>, vector<128x512xbf16>, vector<16x512xf32> -> vector<16x512xf32>
    %252 = arith.addf %249, %251 : vector<16x512xf32>
    %253 = vector.extract_strided_slice %252 {offsets = [0, 0], sizes = [16, 128], strides = [1, 1]} : vector<16x512xf32> to vector<16x128xf32>
    %254 = arith.negf %253 : vector<16x128xf32>
    %255 = math.exp %254 : vector<16x128xf32>
    %cst_68 = arith.constant 1.000000e+00 : f32
    %256 = vector.broadcast %cst_68 : f32 to vector<16x128xf32>
    %257 = arith.addf %256, %255 : vector<16x128xf32>
    %258 = arith.divf %256, %257 : vector<16x128xf32>
    %259 = vector.extract_strided_slice %252 {offsets = [0, 128], sizes = [16, 128], strides = [1, 1]} : vector<16x512xf32> to vector<16x128xf32>
    %260 = arith.negf %259 : vector<16x128xf32>
    %261 = math.exp %260 : vector<16x128xf32>
    %cst_69 = arith.constant 1.000000e+00 : f32
    %262 = vector.broadcast %cst_69 : f32 to vector<16x128xf32>
    %263 = arith.addf %262, %261 : vector<16x128xf32>
    %264 = arith.divf %262, %263 : vector<16x128xf32>
    %265 = vector.extract_strided_slice %252 {offsets = [0, 256], sizes = [16, 128], strides = [1, 1]} : vector<16x512xf32> to vector<16x128xf32>
    %266 = math.tanh %265 : vector<16x128xf32>
    %267 = vector.extract_strided_slice %252 {offsets = [0, 384], sizes = [16, 128], strides = [1, 1]} : vector<16x512xf32> to vector<16x128xf32>
    %268 = arith.negf %267 : vector<16x128xf32>
    %269 = math.exp %268 : vector<16x128xf32>
    %cst_70 = arith.constant 1.000000e+00 : f32
    %270 = vector.broadcast %cst_70 : f32 to vector<16x128xf32>
    %271 = arith.addf %270, %269 : vector<16x128xf32>
    %272 = arith.divf %270, %271 : vector<16x128xf32>
    %273 = arith.mulf %264, %236 : vector<16x128xf32>
    %274 = arith.mulf %258, %266 : vector<16x128xf32>
    %275 = arith.addf %273, %274 : vector<16x128xf32>
    %276 = math.tanh %275 : vector<16x128xf32>
    %277 = arith.mulf %272, %276 : vector<16x128xf32>
    %278 = arith.truncf %277 : vector<16x128xf32> to vector<16x128xbf16>
    %279 = arith.index_cast %c6_i32 : i32 to index
    %c0_71 = arith.constant 0 : index
    %c0_72 = arith.constant 0 : index
    %280 = vector.load %arg6[%279, %c0_71, %c0_72] : memref<8x16x128xbf16, #tpu.memory_space<vmem>>, vector<1x16x128xbf16>
    %281 = vector.shape_cast %280 : vector<1x16x128xbf16> to vector<16x128xbf16>
    %282 = vector.shape_cast %278 : vector<16x128xbf16> to vector<1x16x128xbf16>
    tpu.vector_store %arg6[%279, %c0_71, %c0_72], %282 {strides = array<i32>} : memref<8x16x128xbf16, #tpu.memory_space<vmem>>, vector<1x16x128xbf16>,
    %c7_i32 = arith.constant 7 : i32
    %283 = arith.index_cast %c7_i32 : i32 to index
    %c0_73 = arith.constant 0 : index
    %c0_74 = arith.constant 0 : index
    %284 = vector.load %arg2[%283, %c0_73, %c0_74] : memref<8x16x8xf32, #tpu.memory_space<vmem>>, vector<1x16x8xf32>
    %285 = vector.shape_cast %284 : vector<1x16x8xf32> to vector<16x8xf32>
    %286 = arith.truncf %285 : vector<16x8xf32> to vector<16x8xbf16>
    %cst_75 = arith.constant dense<0.000000e+00> : vector<16x512xf32>
    %287 = tpu.matmul %286, %3, %cst_75 {dimension_numbers = #tpu.dot_dimension_numbers<[1], [0], [0], [1], [0, 0, 1, 1], [], []>} : vector<16x8xbf16>, vector<8x512xbf16>, vector<16x512xf32> -> vector<16x512xf32>
    %288 = arith.addf %287, %7 : vector<16x512xf32>
    %289 = arith.truncf %277 : vector<16x128xf32> to vector<16x128xbf16>
    %cst_76 = arith.constant dense<0.000000e+00> : vector<16x512xf32>
    %290 = tpu.matmul %289, %4, %cst_76 {dimension_numbers = #tpu.dot_dimension_numbers<[1], [0], [0], [1], [0, 0, 1, 1], [], []>} : vector<16x128xbf16>, vector<128x512xbf16>, vector<16x512xf32> -> vector<16x512xf32>
    %291 = arith.addf %288, %290 : vector<16x512xf32>
    %292 = vector.extract_strided_slice %291 {offsets = [0, 0], sizes = [16, 128], strides = [1, 1]} : vector<16x512xf32> to vector<16x128xf32>
    %293 = arith.negf %292 : vector<16x128xf32>
    %294 = math.exp %293 : vector<16x128xf32>
    %cst_77 = arith.constant 1.000000e+00 : f32
    %295 = vector.broadcast %cst_77 : f32 to vector<16x128xf32>
    %296 = arith.addf %295, %294 : vector<16x128xf32>
    %297 = arith.divf %295, %296 : vector<16x128xf32>
    %298 = vector.extract_strided_slice %291 {offsets = [0, 128], sizes = [16, 128], strides = [1, 1]} : vector<16x512xf32> to vector<16x128xf32>
    %299 = arith.negf %298 : vector<16x128xf32>
    %300 = math.exp %299 : vector<16x128xf32>
    %cst_78 = arith.constant 1.000000e+00 : f32
    %301 = vector.broadcast %cst_78 : f32 to vector<16x128xf32>
    %302 = arith.addf %301, %300 : vector<16x128xf32>
    %303 = arith.divf %301, %302 : vector<16x128xf32>
    %304 = vector.extract_strided_slice %291 {offsets = [0, 256], sizes = [16, 128], strides = [1, 1]} : vector<16x512xf32> to vector<16x128xf32>
    %305 = math.tanh %304 : vector<16x128xf32>
    %306 = vector.extract_strided_slice %291 {offsets = [0, 384], sizes = [16, 128], strides = [1, 1]} : vector<16x512xf32> to vector<16x128xf32>
    %307 = arith.negf %306 : vector<16x128xf32>
    %308 = math.exp %307 : vector<16x128xf32>
    %cst_79 = arith.constant 1.000000e+00 : f32
    %309 = vector.broadcast %cst_79 : f32 to vector<16x128xf32>
    %310 = arith.addf %309, %308 : vector<16x128xf32>
    %311 = arith.divf %309, %310 : vector<16x128xf32>
    %312 = arith.mulf %303, %275 : vector<16x128xf32>
    %313 = arith.mulf %297, %305 : vector<16x128xf32>
    %314 = arith.addf %312, %313 : vector<16x128xf32>
    %315 = math.tanh %314 : vector<16x128xf32>
    %316 = arith.mulf %311, %315 : vector<16x128xf32>
    %317 = arith.truncf %316 : vector<16x128xf32> to vector<16x128xbf16>
    %318 = arith.index_cast %c7_i32 : i32 to index
    %c0_80 = arith.constant 0 : index
    %c0_81 = arith.constant 0 : index
    %319 = vector.load %arg6[%318, %c0_80, %c0_81] : memref<8x16x128xbf16, #tpu.memory_space<vmem>>, vector<1x16x128xbf16>
    %320 = vector.shape_cast %319 : vector<1x16x128xbf16> to vector<16x128xbf16>
    %321 = vector.shape_cast %317 : vector<16x128xbf16> to vector<1x16x128xbf16>
    tpu.vector_store %arg6[%318, %c0_80, %c0_81], %321 {strides = array<i32>} : memref<8x16x128xbf16, #tpu.memory_space<vmem>>, vector<1x16x128xbf16>,
    %c8_i32 = arith.constant 8 : i32
    %c0_82 = arith.constant 0 : index
    %c0_83 = arith.constant 0 : index
    %322 = vector.load %arg7[%c0_82, %c0_83] : memref<16x128xf32, #tpu.memory_space<vmem>>, vector<16x128xf32>
    tpu.vector_store %arg7[%c0_82, %c0_83], %316 {strides = array<i32>} : memref<16x128xf32, #tpu.memory_space<vmem>>, vector<16x128xf32>,
    %c0_84 = arith.constant 0 : index
    %c0_85 = arith.constant 0 : index
    %323 = vector.load %arg8[%c0_84, %c0_85] : memref<16x128xf32, #tpu.memory_space<vmem>>, vector<16x128xf32>
    tpu.vector_store %arg8[%c0_84, %c0_85], %314 {strides = array<i32>} : memref<16x128xf32, #tpu.memory_space<vmem>>, vector<16x128xf32>,
    return
  }
  func.func @transform_0(%arg0: i32, %arg1: i32) -> (i32, i32, i32) {
    %c0_i32 = arith.constant 0 : i32
    %c0_i32_0 = arith.constant 0 : i32
    return %arg1, %arg0, %c0_i32 : i32, i32, i32
  }
  func.func @transform_1(%arg0: i32, %arg1: i32) -> (i32, i32) {
    %c0_i32 = arith.constant 0 : i32
    %c0_i32_0 = arith.constant 0 : i32
    %c0_i32_1 = arith.constant 0 : i32
    return %c0_i32, %c0_i32_0 : i32, i32
  }
  func.func @transform_2(%arg0: i32, %arg1: i32) -> (i32, i32) {
    %c0_i32 = arith.constant 0 : i32
    %c0_i32_0 = arith.constant 0 : i32
    %c0_i32_1 = arith.constant 0 : i32
    return %c0_i32, %c0_i32_0 : i32, i32
  }
  func.func @transform_3(%arg0: i32, %arg1: i32) -> (i32, i32) {
    %c0_i32 = arith.constant 0 : i32
    %c0_i32_0 = arith.constant 0 : i32
    %c0_i32_1 = arith.constant 0 : i32
    return %c0_i32, %c0_i32_0 : i32, i32
  }
  func.func @transform_4(%arg0: i32, %arg1: i32) -> (i32, i32, i32) {
    %c0_i32 = arith.constant 0 : i32
    %c0_i32_0 = arith.constant 0 : i32
    return %arg1, %arg0, %c0_i32 : i32, i32, i32
  }
}

</mosaic_0001>

<bundles_post_ra>
// kernel: tpu_custom_call.1
= control target key start
LH: loop header
LB: loop body
LE: loop exit
PB: predicated region body
PF: predicated region fallthrough
CT: control target
= control target key end

     0   :  { %6 = vsyncpa [#allocation3], 0  ;;  %s102_s0 = inlined_call_operand.hbm [shape: f32[8,128], index: 0, kind: input, shape index: {}]   ;;  %s103_s1 = inlined_call_operand.hbm [shape: f32[8,128], index: 1, kind: output, shape index: {}]  }
   0x1   :  { %7 = vsyncpa [#allocation4], 0  ;;  %s84_s6 = smov [#allocation2]  }
   0x2   :  { %s14_s7 = sshll.u32 %s84_s6, 4  ;;  %s15_s7 = int_to_ptr.vmem [resolvable:$true] %s14_s7 }
   0x3   :  { %s48_s8 = scalar_lea.vmem %s15_s7, 128  ;;  %p53_p1 = scmp.lt.s32.totalorder %s15_s7, %s15_s7 }
   0x4   :  { %p49_p0 = scmp.ne.s32.totalorder %s15_s7, %s48_s8  ;;  %p54_p2 = scmp.lt.s32.totalorder %s48_s8, %s48_s8 }
   0x6   :  { %p55_p3 = por %p54_p2, %p53_p1 }
   0x8   :  { %p56_p4 = pnand %p55_p3, %p49_p0 }
   0xa   :  { %59 = shalt.err (!%p56_p4)
}
   0xb   :  { %17 = dma.hbm_to_vmem [thread:$0]  %s102_s0, 128, %s15_s7, [#allocation3]  }
   0xc   :  { %80 = dma.done.wait [#allocation3], 128  }
   0xd   :  { %81 = vsyncadd [#allocation3], 4294967168  ;;  %s85_s11 = smov [#allocation5]   ;;  %v21_v0 = vld [vmem:[#allocation2] sm:$0xff] }
   0xe   :  { %s29_s12 = sshll.u32 %s85_s11, 4  ;;  %22 = vst [vmem:[#allocation5] sm:$0xff] %v21_v0  ;;  %s30_s12 = int_to_ptr.vmem [resolvable:$true] %s29_s12 }
   0xf   :  { %s60_s13 = scalar_lea.vmem %s30_s12, 128  ;;  %p65_p6 = scmp.lt.s32.totalorder %s30_s12, %s30_s12 }
  0x10   :  { %p61_p5 = scmp.ne.s32.totalorder %s30_s12, %s60_s13  ;;  %p66_p7 = scmp.lt.s32.totalorder %s60_s13, %s60_s13 }
  0x12   :  { %p67_p8 = por %p66_p7, %p65_p6 }
  0x14   :  { %p68_p9 = pnand %p67_p8, %p61_p5 }
  0x16   :  { %71 = shalt.err (!%p68_p9)
}
  0x17   :  { %32 = dma.vmem_to_hbm [thread:$0]  %s30_s12, 128, %s103_s1, [#allocation4]  }
  0x18   :  { %82 = dma.done.wait [#allocation4], 128  }
  0x19   :  { %83 = vsyncadd [#allocation4], 4294967168 }
  0x1a   :  { %36 = vsyncpa [#allocation3], 1 }
  0x1b   :  { %37 = vsyncpa [#allocation4], 1 }

// kernel: _forward_padded.3
= control target key start
LH: loop header
LB: loop body
LE: loop exit
PB: predicated region body
PF: predicated region fallthrough
CT: control target
= control target key end

     0   :  { %v4598_v2 = vmov 0   ;;  %s4591_s0 = inlined_call_operand.vmem [shape: bf16[8,16,128], index: 0, kind: input, shape index: {}]   ;;  %s4592_s1 = inlined_call_operand.vmem [shape: bf16[128,512], index: 1, kind: input, shape index: {}]   ;;  %s4593_s2 = inlined_call_operand.vmem [shape: bf16[128,512], index: 2, kind: input, shape index: {}]   ;;  %s4594_s3 = inlined_call_operand.vmem [shape: f32[1,512], index: 3, kind: input, shape index: {}]   ;;  %s4595_s4 = inlined_call_operand.vmem [shape: bf16[128,128], index: 4, kind: input, shape index: {}]   ;;  %s4596_s5 = inlined_call_operand.vmem [shape: f32[1,128], index: 5, kind: input, shape index: {}]   ;;  %s4597_s6 = inlined_call_operand.hbm [shape: f32[16,128], index: 6, kind: output, shape index: {}]  }
   0x1   :  { %v3183_v0 = vld [vmem:[%s4592_s1 + $0xe4] ss:$16 sps:$4 sm:$0xff]   ;;  %v3188_v1 = vld [vmem:[%s4592_s1 + $0xec] ss:$16 sps:$4 sm:$0xff]   ;;  %323 = vmatprep.mubr.bf16.mxu0 %v4598_v2  ;;  %366 = vmatprep.mubr.bf16.mxu1 %v4598_v2  ;;  %v3196_v3 = vld [vmem:[%s4592_s1 + $0xe0] ss:$16 sps:$4 sm:$0xff]  }
   0x2   :  { %4720 = vst [vmem:[#allocation7_spill] sm:$0xff] %v3183_v0  ;;  %4721 = vst [vmem:[#allocation8_spill] sm:$0xff] %v3188_v1  ;;  %291 = vmatprep.subr.bf16.mxu0 %v3183_v0  ;;  %v3201_v4 = vld [vmem:[%s4592_s1 + $0xe8] ss:$16 sps:$4 sm:$0xff]   ;;  %334 = vmatprep.subr.bf16.mxu1 %v3188_v1  ;;  %v3207_v5 = vld [vmem:[%s4592_s1 + $0xc4] ss:$16 sps:$4 sm:$0xff]  }
   0x3   :  { %292 = vmatpush1.bf16.msra.mxu0 %v3196_v3  ;;  %335 = vmatpush1.bf16.msra.mxu1 %v3201_v4  ;;  %v3214_v6 = vld [vmem:[%s4592_s1 + $0xcc] ss:$16 sps:$4 sm:$0xff]   ;;  %v3219_v7 = vld [vmem:[%s4592_s1 + $0xc0] ss:$16 sps:$4 sm:$0xff]   ;;  %v3225_v8 = vld [vmem:[%s4592_s1 + $0xc8] ss:$16 sps:$4 sm:$0xff]  }
   0x4   :  { %293 = vmatprep.subr.bf16.mxu0 %v3207_v5  ;;  %336 = vmatprep.subr.bf16.mxu1 %v3214_v6  ;;  %v3231_v9 = vld [vmem:[%s4592_s1 + $0xa4] ss:$16 sps:$4 sm:$0xff]   ;;  %v3236_v10 = vld [vmem:[%s4592_s1 + $0xac] ss:$16 sps:$4 sm:$0xff]   ;;  %v3241_v11 = vld [vmem:[%s4592_s1 + $0xa0] ss:$16 sps:$4 sm:$0xff]  }
   0x5   :  { %v3246_v12 = vld [vmem:[%s4592_s1 + $0xa8] ss:$16 sps:$4 sm:$0xff]   ;;  %v3253_v13 = vld [vmem:[%s4592_s1 + $0x84] ss:$16 sps:$4 sm:$0xff]   ;;  %v3260_v14 = vld [vmem:[%s4592_s1 + $0x8c] ss:$16 sps:$4 sm:$0xff]  }
   0x6   :  { %v3265_v15 = vld [vmem:[%s4592_s1 + $0x80] ss:$16 sps:$4 sm:$0xff]   ;;  %v3272_v16 = vld [vmem:[%s4592_s1 + $0x88] ss:$16 sps:$4 sm:$0xff]   ;;  %v3277_v17 = vld [vmem:[%s4592_s1 + $0x64] ss:$16 sps:$4 sm:$0xff]  }
   0x7   :  { %294 = vmatpush1.bf16.msra.mxu0 %v3219_v7  ;;  %337 = vmatpush1.bf16.msra.mxu1 %v3225_v8  ;;  %v3284_v18 = vld [vmem:[%s4592_s1 + $0x6c] ss:$16 sps:$4 sm:$0xff]   ;;  %v3289_v19 = vld [vmem:[%s4592_s1 + $0x60] ss:$16 sps:$4 sm:$0xff]   ;;  %v3294_v20 = vld [vmem:[%s4592_s1 + $0x68] ss:$16 sps:$4 sm:$0xff]  }
   0x8   :  { %295 = vmatprep.subr.bf16.mxu0 %v3231_v9  ;;  %338 = vmatprep.subr.bf16.mxu1 %v3236_v10  ;;  %v3301_v21 = vld [vmem:[%s4592_s1 + $0x44] ss:$16 sps:$4 sm:$0xff]   ;;  %v3308_v22 = vld [vmem:[%s4592_s1 + $0x4c] ss:$16 sps:$4 sm:$0xff]   ;;  %v3313_v23 = vld [vmem:[%s4592_s1 + $0x40] ss:$16 sps:$4 sm:$0xff]  }
   0x9   :  { %v3320_v24 = vld [vmem:[%s4592_s1 + $0x48] ss:$16 sps:$4 sm:$0xff]   ;;  %v3325_v25 = vld [vmem:[%s4592_s1 + $0x24] ss:$16 sps:$4 sm:$0xff]   ;;  %v3332_v26 = vld [vmem:[%s4592_s1 + $0x2c] ss:$16 sps:$4 sm:$0xff]  }
   0xa   :  { %v3339_v27 = vld [vmem:[%s4592_s1 + $0x20] ss:$16 sps:$4 sm:$0xff]   ;;  %v3344_v28 = vld [vmem:[%s4592_s1 + $0x28] ss:$16 sps:$4 sm:$0xff]   ;;  %v3349_v29 = vld [vmem:[%s4592_s1 + $0x4] ss:$16 sps:$4 sm:$0xff]  }
   0xb   :  { %296 = vmatpush1.bf16.msra.mxu0 %v3241_v11  ;;  %339 = vmatpush1.bf16.msra.mxu1 %v3246_v12  ;;  %v3356_v30 = vld [vmem:[%s4592_s1 + $0xc] ss:$16 sps:$4 sm:$0xff]   ;;  %v3361_v31 = vld [vmem:[%s4592_s1] ss:$16 sps:$4 sm:$0xff]   ;;  %v3368_v32 = vld [vmem:[%s4592_s1 + $0x8] ss:$16 sps:$4 sm:$0xff]  }
   0xc   :  { %297 = vmatprep.subr.bf16.mxu0 %v3253_v13  ;;  %340 = vmatprep.subr.bf16.mxu1 %v3260_v14  ;;  %v3375_v33 = vld [vmem:[%s4593_s2 + $0xe4] ss:$16 sps:$4 sm:$0xff]   ;;  %v3380_v34 = vld [vmem:[%s4593_s2 + $0xec] ss:$16 sps:$4 sm:$0xff]   ;;  %v3390_v36 = vld [vmem:[%s4593_s2 + $0xe0] ss:$16 sps:$4 sm:$0xff]  }
   0xd   :  { %v2711_v35 = vld [vmem:[%s4591_s0] sm:$0xff]   ;;  %v3395_v37 = vld [vmem:[%s4593_s2 + $0xe8] ss:$16 sps:$4 sm:$0xff]   ;;  %v3407_v39 = vld [vmem:[%s4593_s2 + $0xcc] ss:$16 sps:$4 sm:$0xff]  }
   0xe   :  { %v3400_v38 = vld [vmem:[%s4593_s2 + $0xc4] ss:$16 sps:$4 sm:$0xff]   ;;  %4723 = vst [vmem:[#allocation10_spill] sm:$0xff] %v3407_v39  ;;  %v3412_v40 = vld [vmem:[%s4593_s2 + $0xc0] ss:$16 sps:$4 sm:$0xff]  }
   0xf   :  { %298 = vmatpush1.bf16.msra.mxu0 %v3265_v15  ;;  %341 = vmatpush1.bf16.msra.mxu1 %v3272_v16  ;;  %4722 = vst [vmem:[#allocation9_spill] sm:$0xff] %v3400_v38  ;;  %4724 = vst [vmem:[#allocation11_spill] sm:$0xff] %v3412_v40  ;;  %v3419_v41 = vld [vmem:[%s4593_s2 + $0xc8] ss:$16 sps:$4 sm:$0xff]   ;;  %v3426_v42 = vld [vmem:[%s4593_s2 + $0xa4] ss:$16 sps:$4 sm:$0xff]  }
  0x10   :  { %299 = vmatprep.subr.bf16.mxu0 %v3277_v17  ;;  %342 = vmatprep.subr.bf16.mxu1 %v3284_v18  ;;  %4725 = vst [vmem:[#allocation12_spill] sm:$0xff] %v3419_v41  ;;  %4726 = vst [vmem:[#allocation13_spill] sm:$0xff] %v3426_v42  ;;  %v3431_v43 = vld [vmem:[%s4593_s2 + $0xac] ss:$16 sps:$4 sm:$0xff]   ;;  %v3440_v44 = vld [vmem:[%s4593_s2 + $0xa0] ss:$16 sps:$4 sm:$0xff]  }
  0x11   :  { %4727 = vst [vmem:[#allocation14_spill] sm:$0xff] %v3431_v43  ;;  %4728 = vst [vmem:[#allocation15_spill] sm:$0xff] %v3440_v44  ;;  %v3445_v45 = vld [vmem:[%s4593_s2 + $0xa8] ss:$16 sps:$4 sm:$0xff]   ;;  %v3450_v46 = vld [vmem:[%s4593_s2 + $0x84] ss:$16 sps:$4 sm:$0xff]  }
  0x12   :  { %4729 = vst [vmem:[#allocation16_spill] sm:$0xff] %v3445_v45  ;;  %4730 = vst [vmem:[#allocation17_spill] sm:$0xff] %v3450_v46  ;;  %v3457_v47 = vld [vmem:[%s4593_s2 + $0x8c] ss:$16 sps:$4 sm:$0xff]   ;;  %v3462_v48 = vld [vmem:[%s4593_s2 + $0x80] ss:$16 sps:$4 sm:$0xff]  }
  0x13   :  { %300 = vmatpush1.bf16.msra.mxu0 %v3289_v19  ;;  %343 = vmatpush1.bf16.msra.mxu1 %v3294_v20  ;;  %4731 = vst [vmem:[#allocation18_spill] sm:$0xff] %v3457_v47  ;;  %4732 = vst [vmem:[#allocation19_spill] sm:$0xff] %v3462_v48  ;;  %v3467_v49 = vld [vmem:[%s4593_s2 + $0x88] ss:$16 sps:$4 sm:$0xff]   ;;  %v3472_v50 = vld [vmem:[%s4593_s2 + $0x64] ss:$16 sps:$4 sm:$0xff]  }
  0x14   :  { %301 = vmatprep.subr.bf16.mxu0 %v3301_v21  ;;  %344 = vmatprep.subr.bf16.mxu1 %v3308_v22  ;;  %4733 = vst [vmem:[#allocation20_spill] sm:$0xff] %v3467_v49  ;;  %4734 = vst [vmem:[#allocation21_spill] sm:$0xff] %v3472_v50  ;;  %v3477_v51 = vld [vmem:[%s4593_s2 + $0x6c] ss:$16 sps:$4 sm:$0xff]   ;;  %v3486_v52 = vld [vmem:[%s4593_s2 + $0x60] ss:$16 sps:$4 sm:$0xff]  }
  0x15   :  { %4735 = vst [vmem:[#allocation22_spill] sm:$0xff] %v3477_v51  ;;  %4736 = vst [vmem:[#allocation23_spill] sm:$0xff] %v3486_v52  ;;  %v3491_v53 = vld [vmem:[%s4593_s2 + $0x68] ss:$16 sps:$4 sm:$0xff]   ;;  %v3496_v54 = vld [vmem:[%s4593_s2 + $0x44] ss:$16 sps:$4 sm:$0xff]  }
  0x16   :  { %4737 = vst [vmem:[#allocation24_spill] sm:$0xff] %v3491_v53  ;;  %4738 = vst [vmem:[#allocation25_spill] sm:$0xff] %v3496_v54  ;;  %v3501_v55 = vld [vmem:[%s4593_s2 + $0x4c] ss:$16 sps:$4 sm:$0xff]   ;;  %v3510_v56 = vld [vmem:[%s4593_s2 + $0x40] ss:$16 sps:$4 sm:$0xff]  }
  0x17   :  { %302 = vmatpush1.bf16.msra.mxu0 %v3313_v23  ;;  %345 = vmatpush1.bf16.msra.mxu1 %v3320_v24  ;;  %4739 = vst [vmem:[#allocation26_spill] sm:$0xff] %v3501_v55  ;;  %4740 = vst [vmem:[#allocation27_spill] sm:$0xff] %v3510_v56  ;;  %v3515_v57 = vld [vmem:[%s4593_s2 + $0x48] ss:$16 sps:$4 sm:$0xff]   ;;  %v3520_v58 = vld [vmem:[%s4593_s2 + $0x24] ss:$16 sps:$4 sm:$0xff]  }
  0x18   :  { %303 = vmatprep.subr.bf16.mxu0 %v3325_v25  ;;  %346 = vmatprep.subr.bf16.mxu1 %v3332_v26  ;;  %4741 = vst [vmem:[#allocation28_spill] sm:$0xff] %v3515_v57  ;;  %4742 = vst [vmem:[#allocation29_spill] sm:$0xff] %v3520_v58  ;;  %v3525_v59 = vld [vmem:[%s4593_s2 + $0x2c] ss:$16 sps:$4 sm:$0xff]  }
  0x19   :  { %4743 = vst [vmem:[#allocation30_spill] sm:$0xff] %v3525_v59 }
  0x1b   :  { %304 = vmatpush1.bf16.msra.mxu0 %v3339_v27  ;;  %347 = vmatpush1.bf16.msra.mxu1 %v3344_v28 }
  0x1c   :  { %305 = vmatprep.subr.bf16.mxu0 %v3349_v29  ;;  %348 = vmatprep.subr.bf16.mxu1 %v3356_v30 }
  0x1f   :  { %306 = vmatpush1.bf16.msra.mxu0 %v3361_v31  ;;  %349 = vmatpush1.bf16.msra.mxu1 %v3368_v32 }
  0x20   :  { %538 = vmatprep.subr.bf16.mxu0 %v3375_v33  ;;  %581 = vmatprep.subr.bf16.mxu1 %v3380_v34 }
  0x22   :  { %324 = vmatmul.mubr.bf16.vlgmr.msra.gmra.mxu0 %v2711_v35  ;;  %367 = vmatmul.mubr.bf16.vlgmr.msra.gmra.mxu1 %v2711_v35 }
  0x23   :  { %539 = vmatpush1.bf16.msra.mxu0 %v3390_v36  ;;  %582 = vmatpush1.bf16.msra.mxu1 %v3395_v37 }
  0x24   :  { %540 = vmatprep.subr.bf16.mxu0 %v3400_v38  ;;  %583 = vmatprep.subr.bf16.mxu1 %v3407_v39 }
  0x25   :  { %570 = vmatprep.mubr.bf16.mxu0 %v4598_v2  ;;  %613 = vmatprep.mubr.bf16.mxu1 %v4598_v2 }
  0x27   :  { %541 = vmatpush1.bf16.msra.mxu0 %v3412_v40  ;;  %584 = vmatpush1.bf16.msra.mxu1 %v3419_v41 }
  0x28   :  { %542 = vmatprep.subr.bf16.mxu0 %v3426_v42  ;;  %585 = vmatprep.subr.bf16.mxu1 %v3431_v43 }
  0x2b   :  { %543 = vmatpush1.bf16.msra.mxu0 %v3440_v44  ;;  %586 = vmatpush1.bf16.msra.mxu1 %v3445_v45 }
  0x2c   :  { %544 = vmatprep.subr.bf16.mxu0 %v3450_v46  ;;  %587 = vmatprep.subr.bf16.mxu1 %v3457_v47 }
  0x2f   :  { %545 = vmatpush1.bf16.msra.mxu0 %v3462_v48  ;;  %588 = vmatpush1.bf16.msra.mxu1 %v3467_v49 }
  0x30   :  { %546 = vmatprep.subr.bf16.mxu0 %v3472_v50  ;;  %589 = vmatprep.subr.bf16.mxu1 %v3477_v51 }
  0x33   :  { %547 = vmatpush1.bf16.msra.mxu0 %v3486_v52  ;;  %590 = vmatpush1.bf16.msra.mxu1 %v3491_v53 }
  0x34   :  { %548 = vmatprep.subr.bf16.mxu0 %v3496_v54  ;;  %591 = vmatprep.subr.bf16.mxu1 %v3501_v55 }
  0x35   :  { %11 = vsyncpa [#allocation5], 0  ;;  %v3536_v60 = vld [vmem:[%s4593_s2 + $0x20] ss:$16 sps:$4 sm:$0xff]   ;;  %v3541_v61 = vld [vmem:[%s4593_s2 + $0x28] ss:$16 sps:$4 sm:$0xff]  }
  0x36   :  { %4744 = vst [vmem:[#allocation31_spill] sm:$0xff] %v3536_v60  ;;  %4745 = vst [vmem:[#allocation32_spill] sm:$0xff] %v3541_v61  ;;  %v3548_v62 = vld [vmem:[%s4593_s2 + $0x4] ss:$16 sps:$4 sm:$0xff]   ;;  %v3553_v63 = vld [vmem:[%s4593_s2 + $0xc] ss:$16 sps:$4 sm:$0xff]  }
  0x37   :  { %549 = vmatpush1.bf16.msra.mxu0 %v3510_v56  ;;  %592 = vmatpush1.bf16.msra.mxu1 %v3515_v57  ;;  %4746 = vst [vmem:[#allocation33_spill] sm:$0xff] %v3548_v62  ;;  %4747 = vst [vmem:[#allocation34_spill] sm:$0xff] %v3553_v63  ;;  %v3560_v35 = vld [vmem:[%s4593_s2] ss:$16 sps:$4 sm:$0xff]   ;;  %v3565_v2 = vld [vmem:[%s4593_s2 + $0x8] ss:$16 sps:$4 sm:$0xff]  }
  0x38   :  { %550 = vmatprep.subr.bf16.mxu0 %v3520_v58  ;;  %593 = vmatprep.subr.bf16.mxu1 %v3525_v59  ;;  %4748 = vst [vmem:[#allocation35_spill] sm:$0xff] %v3560_v35  ;;  %4749 = vst [vmem:[#allocation36_spill] sm:$0xff] %v3565_v2  ;;  %vm3141_vm0 = vmmov 0   ;;  %s3142_s29 = smov [#allocation4]  }
  0x39   :  { %s2473_s30 = sshll.u32 %s3142_s29, 4  ;;  %s2474_s30 = int_to_ptr.vmem [resolvable:$true] %s2473_s30 }
  0x3a   :  { %s3116_s7 = scalar_lea.vmem %s2474_s30, 256  ;;  %p3121_p1 = scmp.lt.s32.totalorder %s2474_s30, %s2474_s30 }
  0x3b   :  { %551 = vmatpush1.bf16.msra.mxu0 %v3536_v60  ;;  %594 = vmatpush1.bf16.msra.mxu1 %v3541_v61  ;;  %v3139_v61 = vmov 0.0|0.0   ;;  %p3117_p0 = scmp.ne.s32.totalorder %s2474_s30, %s3116_s7  ;;  %p3122_p2 = scmp.lt.s32.totalorder %s3116_s7, %s3116_s7 }
  0x3c   :  { %552 = vmatprep.subr.bf16.mxu0 %v3548_v62  ;;  %595 = vmatprep.subr.bf16.mxu1 %v3553_v63  ;;  %v4750_v63 = vmov 0  }
  0x3d   :  { %p3123_p3 = por %p3122_p2, %p3121_p1 }
  0x3f   :  { %553 = vmatpush1.bf16.msra.mxu0 %v3560_v35  ;;  %596 = vmatpush1.bf16.msra.mxu1 %v3565_v2  ;;  %p3124_p4 = pnand %p3123_p3, %p3117_p0 }
  0x40   :  { %689 = vmatprep.subr.bf16.mxu0 %v3183_v0  ;;  %732 = vmatprep.subr.bf16.mxu1 %v3188_v1 }
  0x42   :  { %571 = vmatmul.mubr.bf16.vlgmr.msra.gmra.mxu0 %v3139_v61  ;;  %614 = vmatmul.mubr.bf16.vlgmr.msra.gmra.mxu1 %v3139_v61  ;;  %v2760_v61 = vld [vmem:[%s4591_s0 + $0x8] sm:$0xff]  }
  0x43   :  { %690 = vmatpush1.bf16.msra.mxu0 %v3196_v3  ;;  %733 = vmatpush1.bf16.msra.mxu1 %v3201_v4 }
  0x44   :  { %691 = vmatprep.subr.bf16.mxu0 %v3207_v5  ;;  %734 = vmatprep.subr.bf16.mxu1 %v3214_v6 }
  0x45   :  { %721 = vmatprep.mubr.bf16.mxu0 %v4750_v63  ;;  %764 = vmatprep.mubr.bf16.mxu1 %v4750_v63 }
  0x47   :  { %692 = vmatpush1.bf16.msra.mxu0 %v3219_v7  ;;  %735 = vmatpush1.bf16.msra.mxu1 %v3225_v8 }
  0x48   :  { %693 = vmatprep.subr.bf16.mxu0 %v3231_v9  ;;  %736 = vmatprep.subr.bf16.mxu1 %v3236_v10 }
  0x4b   :  { %694 = vmatpush1.bf16.msra.mxu0 %v3241_v11  ;;  %737 = vmatpush1.bf16.msra.mxu1 %v3246_v12 }
  0x4c   :  { %695 = vmatprep.subr.bf16.mxu0 %v3253_v13  ;;  %738 = vmatprep.subr.bf16.mxu1 %v3260_v14 }
  0x4f   :  { %696 = vmatpush1.bf16.msra.mxu0 %v3265_v15  ;;  %739 = vmatpush1.bf16.msra.mxu1 %v3272_v16 }
  0x50   :  { %697 = vmatprep.subr.bf16.mxu0 %v3277_v17  ;;  %740 = vmatprep.subr.bf16.mxu1 %v3284_v18 }
  0x53   :  { %698 = vmatpush1.bf16.msra.mxu0 %v3289_v19  ;;  %741 = vmatpush1.bf16.msra.mxu1 %v3294_v20 }
  0x54   :  { %699 = vmatprep.subr.bf16.mxu0 %v3301_v21  ;;  %742 = vmatprep.subr.bf16.mxu1 %v3308_v22 }
  0x57   :  { %700 = vmatpush1.bf16.msra.mxu0 %v3313_v23  ;;  %743 = vmatpush1.bf16.msra.mxu1 %v3320_v24 }
  0x58   :  { %701 = vmatprep.subr.bf16.mxu0 %v3325_v25  ;;  %744 = vmatprep.subr.bf16.mxu1 %v3332_v26 }
  0x5b   :  { %702 = vmatpush1.bf16.msra.mxu0 %v3339_v27  ;;  %745 = vmatpush1.bf16.msra.mxu1 %v3344_v28 }
  0x5c   :  { %703 = vmatprep.subr.bf16.mxu0 %v3349_v29  ;;  %746 = vmatprep.subr.bf16.mxu1 %v3356_v30 }
  0x5f   :  { %704 = vmatpush1.bf16.msra.mxu0 %v3361_v31  ;;  %747 = vmatpush1.bf16.msra.mxu1 %v3368_v32 }
  0x60   :  { %776 = vmatprep.subr.bf16.mxu0 %v3375_v33  ;;  %819 = vmatprep.subr.bf16.mxu1 %v3380_v34 }
  0x62   :  { %722 = vmatmul.mubr.bf16.vlgmr.msra.gmra.mxu0 %v2760_v61  ;;  %765 = vmatmul.mubr.bf16.vlgmr.msra.gmra.mxu1 %v2760_v61  ;;  %v4751_v61 = vld [vmem:[#allocation32_spill] sm:$0xff] }
  0x63   :  { %777 = vmatpush1.bf16.msra.mxu0 %v3390_v36  ;;  %820 = vmatpush1.bf16.msra.mxu1 %v3395_v37 }
  0x64   :  { %778 = vmatprep.subr.bf16.mxu0 %v3400_v38  ;;  %821 = vmatprep.subr.bf16.mxu1 %v3407_v39 }
  0x65   :  { %808 = vmatprep.mubr.bf16.mxu0 %v4750_v63  ;;  %851 = vmatprep.mubr.bf16.mxu1 %v4750_v63 }
  0x67   :  { %779 = vmatpush1.bf16.msra.mxu0 %v3412_v40  ;;  %822 = vmatpush1.bf16.msra.mxu1 %v3419_v41 }
  0x68   :  { %780 = vmatprep.subr.bf16.mxu0 %v3426_v42  ;;  %823 = vmatprep.subr.bf16.mxu1 %v3431_v43 }
  0x6b   :  { %781 = vmatpush1.bf16.msra.mxu0 %v3440_v44  ;;  %824 = vmatpush1.bf16.msra.mxu1 %v3445_v45 }
  0x6c   :  { %782 = vmatprep.subr.bf16.mxu0 %v3450_v46  ;;  %825 = vmatprep.subr.bf16.mxu1 %v3457_v47 }
  0x6f   :  { %783 = vmatpush1.bf16.msra.mxu0 %v3462_v48  ;;  %826 = vmatpush1.bf16.msra.mxu1 %v3467_v49 }
  0x70   :  { %784 = vmatprep.subr.bf16.mxu0 %v3472_v50  ;;  %827 = vmatprep.subr.bf16.mxu1 %v3477_v51 }
  0x73   :  { %785 = vmatpush1.bf16.msra.mxu0 %v3486_v52  ;;  %828 = vmatpush1.bf16.msra.mxu1 %v3491_v53  ;;  %v4752_v52 = vld [vmem:[#allocation34_spill] sm:$0xff] }
  0x74   :  { %786 = vmatprep.subr.bf16.mxu0 %v3496_v54  ;;  %829 = vmatprep.subr.bf16.mxu1 %v3501_v55 }
  0x77   :  { %787 = vmatpush1.bf16.msra.mxu0 %v3510_v56  ;;  %830 = vmatpush1.bf16.msra.mxu1 %v3515_v57  ;;  %v99_v57 = vlaneseq }
  0x78   :  { %788 = vmatprep.subr.bf16.mxu0 %v3520_v58  ;;  %831 = vmatprep.subr.bf16.mxu1 %v3525_v59 }
  0x79   :  { %v100_v56 = vshrl.u32 %v99_v57, 7 }
  0x7b   :  { %789 = vmatpush1.bf16.msra.mxu0 %v3536_v60  ;;  %832 = vmatpush1.bf16.msra.mxu1 %v4751_v61  ;;  %v101_v60 = vsub.s32 0, %v100_v56  ;;  %v113_v43 = vsub.s32 3, %v100_v56 }
  0x7c   :  { %790 = vmatprep.subr.bf16.mxu0 %v3548_v62  ;;  %833 = vmatprep.subr.bf16.mxu1 %v4752_v52  ;;  %v97_v62 = vld [vmem:[%s4594_s3] sm:$0xf]  ;;  %v105_v52 = vsub.s32 1, %v100_v56 }
  0x7e   :  { %v3649_v53 = vrot.slane %v97_v62, %v105_v52 }
  0x7f   :  { %791 = vmatpush1.bf16.msra.mxu0 %v3560_v35  ;;  %834 = vmatpush1.bf16.msra.mxu1 %v3565_v2  ;;  %v3647_v35 = vrot.slane %v97_v62, %v101_v60 }
  0x80   :  { %927 = vmatprep.subr.bf16.mxu0 %v3183_v0  ;;  %970 = vmatprep.subr.bf16.mxu1 %v3188_v1 }
  0xe2   :  { %v325_v58 = vpop.f32.mrf.mxu0  ;;  %v368_v59 = vpop.f32.mrf.mxu1 }
  0xe3   :  { %v326_v1 = vadd.f32 %v325_v58, %v3647_v35  ;;  %v109_v58 = vsub.s32 2, %v100_v56 }
  0xe4   :  { %v327_v55 = vpop.f32.mrf.mxu0  ;;  %v370_v54 = vpop.f32.mrf.mxu1 }
  0xe5   :  { %v328_v50 = vadd.f32 %v327_v55, %v3649_v53 }
  0xe6   :  { %v329_v61 = vpop.f32.mrf.mxu0  ;;  %v372_v2 = vpop.f32.mrf.mxu1 }
  0xe7   :  { %v330_v46 = vadd.f32 %v329_v61, %v3647_v35 }
  0xe8   :  { %v331_v0 = vpop.f32.mrf.mxu0  ;;  %v374_v51 = vpop.f32.mrf.mxu1 }
  0xe9   :  { %v332_v42 = vadd.f32 %v331_v0, %v3649_v53 }
 0x102   :  { %v572_v57 = vpop.f32.mrf.mxu0  ;;  %v615_v48 = vpop.f32.mrf.mxu1 }
 0x103   :  { %v624_v49 = vadd.f32 %v572_v57, %v326_v1  ;;  %v3655_v1 = vrot.slane %v97_v62, %v113_v43 }
 0x104   :  { %v574_v47 = vpop.f32.mrf.mxu0  ;;  %v617_v41 = vpop.f32.mrf.mxu1 }
 0x105   :  { %v2549_v45 = vmul.f32 -1.442695, %v624_v49  ;;  %v625_v44 = vadd.f32 %v574_v47, %v328_v50  ;;  %v3657_v49 = vrot.slane %v97_v62, %v109_v58  ;;  %v371_v47 = vadd.f32 %v370_v54, %v3655_v1 }
 0x106   :  { %v576_v60 = vpop.f32.mrf.mxu0  ;;  %v619_v57 = vpop.f32.mrf.mxu1 }
 0x107   :  { %2775 = vpow2.f32 %v2549_v45  ;;  %v2551_v52 = vmul.f32 -1.442695, %v625_v44  ;;  %v628_v40 = vadd.f32 %v576_v60, %v330_v46  ;;  %v369_v44 = vadd.f32 %v368_v59, %v3657_v49 }
 0x108   :  { %v578_v39 = vpop.f32.mrf.mxu0  ;;  %v621_v0 = vpop.f32.mrf.mxu1  ;;  %v375_v45 = vadd.f32 %v374_v51, %v3655_v1  ;;  %v627_v46 = vadd.f32 %v617_v41, %v371_v47 }
 0x109   :  { %2777 = vpow2.f32 %v2551_v52  ;;  %v2550_v38 = vmul.f32 -1.442695, %v628_v40  ;;  %v629_v55 = vadd.f32 %v578_v39, %v332_v42  ;;  %v626_v50 = vadd.f32 %v615_v48, %v369_v44 }
 0x10a   :  { %v631_v56 = vadd.f32 %v621_v0, %v375_v45  ;;  %v2553_v39 = vmul.f32 -1.442695, %v627_v46 }
 0x10b   :  { %2779 = vpow2.f32 %v2550_v38  ;;  %v2552_v61 = vmul.f32 -1.442695, %v629_v55  ;;  %v373_v38 = vadd.f32 %v372_v2, %v3657_v49 }
 0x10c   :  { %v2554_v62 = vmul.f32 -1.442695, %v631_v56 }
 0x10d   :  { %2781 = vpow2.f32 %v2552_v61  ;;  %v630_v54 = vadd.f32 %v619_v57, %v373_v38 }
 0x10e   :  { %2783 = vtanh.f32 %v626_v50 }
 0x114   :  { %v2776_v40 = vpop.eup %2775 }
 0x115   :  { %v638_v42 = vadd.f32 1.0, %v2776_v40 }
 0x116   :  { %v2778_v43 = vpop.eup %2777 }
 0x117   :  { %2785 = vrcp.f32 %v638_v42  ;;  %v650_v60 = vadd.f32 1.0, %v2778_v43 }
 0x118   :  { %v2780_v52 = vpop.eup %2779  ;;  %2787 = vpow2.f32 %v2553_v39 }
 0x119   :  { %2789 = vrcp.f32 %v650_v60  ;;  %v639_v59 = vadd.f32 1.0, %v2780_v52 }
 0x11a   :  { %v2782_v58 = vpop.eup %2781  ;;  %2791 = vpow2.f32 %v2554_v62 }
 0x11b   :  { %2793 = vrcp.f32 %v639_v59  ;;  %v651_v41 = vadd.f32 1.0, %v2782_v58  ;;  %v2784_v48 = vpop.eup %2783  ;;  %v4773_v58 = vld [vmem:[#allocation29_spill] sm:$0xff] }
 0x11c   :  { %2795 = vtanh.f32 %v630_v54 }
 0x11d   :  { %2797 = vrcp.f32 %v651_v41  ;;  %v4774_v41 = vld [vmem:[#allocation30_spill] sm:$0xff] }
 0x124   :  { %v2786_v51 = vpop.eup %2785 }
 0x125   :  { %v2788_v55 = vpop.eup %2787  ;;  %v672_v0 = vmul.f32 %v2786_v51, %v2784_v48  ;;  %v4775_v48 = vld [vmem:[#allocation31_spill] sm:$0xff]  ;;  %v4776_v51 = vld [vmem:[#allocation32_spill] sm:$0xff] }
 0x126   :  { %v2790_v61 = vpop.eup %2789  ;;  %v664_v45 = vadd.f32 1.0, %v2788_v55  ;;  %v4777_v55 = vld [vmem:[#allocation33_spill] sm:$0xff] }
 0x127   :  { %v2792_v2 = vpop.eup %2791  ;;  %v670_v47 = vmul.f32 0.0, %v2790_v61  ;;  %v4778_v61 = vld [vmem:[#allocation34_spill] sm:$0xff] }
 0x128   :  { %v2794_v44 = vpop.eup %2793  ;;  %v665_v56 = vadd.f32 1.0, %v2792_v2  ;;  %2799 = vrcp.f32 %v664_v45  ;;  %v4779_v2 = vld [vmem:[#allocation35_spill] sm:$0xff]  ;;  %v723_v45 = vpop.f32.mrf.mxu0 }
 0x129   :  { %v2796_v46 = vpop.eup %2795  ;;  %v3663_v50 = vadd.f32 %v672_v0, %v670_v47  ;;  %v4780_v47 = vld [vmem:[#allocation36_spill] sm:$0xff]  ;;  %v4781_v0 = vld [vmem:[#allocation7_spill] sm:$0xff] }
 0x12a   :  { %v2798_v57 = vpop.eup %2797  ;;  %v673_v39 = vmul.f32 %v2796_v46, %v2794_v44  ;;  %v4782_v44 = vld [vmem:[#allocation8_spill] sm:$0xff]  ;;  %v766_v46 = vpop.f32.mrf.mxu1 }
 0x12b   :  { %v671_v40 = vmul.f32 0.0, %v2798_v57  ;;  %2801 = vtanh.f32 %v3663_v50  ;;  %v725_v57 = vpop.f32.mrf.mxu0 }
 0x12c   :  { %2803 = vrcp.f32 %v665_v56  ;;  %v768_v56 = vpop.f32.mrf.mxu1 }
 0x12d   :  { %v3666_v42 = vadd.f32 %v673_v39, %v671_v40  ;;  %v727_v40 = vpop.f32.mrf.mxu0 }
 0x12e   :  { %v770_v39 = vpop.f32.mrf.mxu1 }
 0x12f   :  { %2805 = vtanh.f32 %v3666_v42 }
 0x135   :  { %v2800_v43 = vpop.eup %2799 }
 0x138   :  { %v2802_v38 = vpop.eup %2801 }
 0x139   :  { %v2804_v62 = vpop.eup %2803  ;;  %v678_v52 = vmul.f32 %v2802_v38, %v2800_v43  ;;  %v729_v43 = vpop.f32.mrf.mxu0  ;;  %v724_v38 = vadd.f32 %v723_v45, %v3647_v35 }
 0x13c   :  { %v2806_v60 = vpop.eup %2805 }
 0x13d   :  { %v679_v54 = vmul.f32 %v2806_v60, %v2804_v62  ;;  %v772_v62 = vpop.f32.mrf.mxu1 }
 0x13f   :  { %v775_v59 = vpack.c.bf16 %v679_v54, %v678_v52  ;;  %v726_v52 = vadd.f32 %v725_v57, %v3649_v53 }
 0x141   :  { %809 = vmatmul.mubr.bf16.vlgmr.msra.gmra.mxu0 %v775_v59  ;;  %852 = vmatmul.mubr.bf16.vlgmr.msra.gmra.mxu1 %v775_v59 }
 0x142   :  { %928 = vmatpush1.bf16.msra.mxu0 %v3196_v3  ;;  %971 = vmatpush1.bf16.msra.mxu1 %v3201_v4  ;;  %v2761_v3 = vld [vmem:[%s4591_s0 + $0x10] sm:$0xff]   ;;  %v4753_v4 = vld [vmem:[#allocation9_spill] sm:$0xff] }
 0x143   :  { %929 = vmatprep.subr.bf16.mxu0 %v3207_v5  ;;  %972 = vmatprep.subr.bf16.mxu1 %v3214_v6  ;;  %v4754_v5 = vld [vmem:[#allocation10_spill] sm:$0xff]  ;;  %v4755_v6 = vld [vmem:[#allocation11_spill] sm:$0xff] }
 0x144   :  { %959 = vmatprep.mubr.bf16.mxu0 %v4750_v63  ;;  %1002 = vmatprep.mubr.bf16.mxu1 %v4750_v63 }
 0x146   :  { %930 = vmatpush1.bf16.msra.mxu0 %v3219_v7  ;;  %973 = vmatpush1.bf16.msra.mxu1 %v3225_v8  ;;  %v4756_v7 = vld [vmem:[#allocation12_spill] sm:$0xff]  ;;  %v4757_v8 = vld [vmem:[#allocation13_spill] sm:$0xff] }
 0x147   :  { %931 = vmatprep.subr.bf16.mxu0 %v3231_v9  ;;  %974 = vmatprep.subr.bf16.mxu1 %v3236_v10  ;;  %v4758_v9 = vld [vmem:[#allocation14_spill] sm:$0xff]  ;;  %v4759_v10 = vld [vmem:[#allocation15_spill] sm:$0xff] }
 0x14a   :  { %932 = vmatpush1.bf16.msra.mxu0 %v3241_v11  ;;  %975 = vmatpush1.bf16.msra.mxu1 %v3246_v12  ;;  %v4760_v11 = vld [vmem:[#allocation16_spill] sm:$0xff]  ;;  %v4761_v12 = vld [vmem:[#allocation17_spill] sm:$0xff] }
 0x14b   :  { %933 = vmatprep.subr.bf16.mxu0 %v3253_v13  ;;  %976 = vmatprep.subr.bf16.mxu1 %v3260_v14  ;;  %v4762_v13 = vld [vmem:[#allocation18_spill] sm:$0xff]  ;;  %v4763_v14 = vld [vmem:[#allocation19_spill] sm:$0xff] }
 0x14e   :  { %934 = vmatpush1.bf16.msra.mxu0 %v3265_v15  ;;  %977 = vmatpush1.bf16.msra.mxu1 %v3272_v16  ;;  %v4764_v15 = vld [vmem:[#allocation20_spill] sm:$0xff]  ;;  %v4765_v16 = vld [vmem:[#allocation21_spill] sm:$0xff] }
 0x14f   :  { %935 = vmatprep.subr.bf16.mxu0 %v3277_v17  ;;  %978 = vmatprep.subr.bf16.mxu1 %v3284_v18  ;;  %v4766_v17 = vld [vmem:[#allocation22_spill] sm:$0xff]  ;;  %v4767_v18 = vld [vmem:[#allocation23_spill] sm:$0xff] }
 0x152   :  { %936 = vmatpush1.bf16.msra.mxu0 %v3289_v19  ;;  %979 = vmatpush1.bf16.msra.mxu1 %v3294_v20  ;;  %v4768_v19 = vld [vmem:[#allocation24_spill] sm:$0xff]  ;;  %v4769_v20 = vld [vmem:[#allocation25_spill] sm:$0xff] }
 0x153   :  { %937 = vmatprep.subr.bf16.mxu0 %v3301_v21  ;;  %980 = vmatprep.subr.bf16.mxu1 %v3308_v22  ;;  %v4770_v21 = vld [vmem:[#allocation26_spill] sm:$0xff]  ;;  %v4771_v22 = vld [vmem:[#allocation27_spill] sm:$0xff] }
 0x156   :  { %938 = vmatpush1.bf16.msra.mxu0 %v3313_v23  ;;  %981 = vmatpush1.bf16.msra.mxu1 %v3320_v24  ;;  %v4772_v23 = vld [vmem:[#allocation28_spill] sm:$0xff] }
 0x157   :  { %939 = vmatprep.subr.bf16.mxu0 %v3325_v25  ;;  %982 = vmatprep.subr.bf16.mxu1 %v3332_v26 }
 0x15a   :  { %940 = vmatpush1.bf16.msra.mxu0 %v3339_v27  ;;  %983 = vmatpush1.bf16.msra.mxu1 %v3344_v28 }
 0x15b   :  { %941 = vmatprep.subr.bf16.mxu0 %v3349_v29  ;;  %984 = vmatprep.subr.bf16.mxu1 %v3356_v30 }
 0x15e   :  { %942 = vmatpush1.bf16.msra.mxu0 %v3361_v31  ;;  %985 = vmatpush1.bf16.msra.mxu1 %v3368_v32 }
 0x15f   :  { %1014 = vmatprep.subr.bf16.mxu0 %v3375_v33  ;;  %1057 = vmatprep.subr.bf16.mxu1 %v3380_v34 }
 0x161   :  { %960 = vmatmul.mubr.bf16.vlgmr.msra.gmra.mxu0 %v2761_v3  ;;  %1003 = vmatmul.mubr.bf16.vlgmr.msra.gmra.mxu1 %v2761_v3 }
 0x162   :  { %1015 = vmatpush1.bf16.msra.mxu0 %v3390_v36  ;;  %1058 = vmatpush1.bf16.msra.mxu1 %v3395_v37 }
 0x163   :  { %1016 = vmatprep.subr.bf16.mxu0 %v4753_v4  ;;  %1059 = vmatprep.subr.bf16.mxu1 %v4754_v5 }
 0x164   :  { %1046 = vmatprep.mubr.bf16.mxu0 %v4750_v63  ;;  %1089 = vmatprep.mubr.bf16.mxu1 %v4750_v63 }
 0x166   :  { %1017 = vmatpush1.bf16.msra.mxu0 %v4755_v6  ;;  %1060 = vmatpush1.bf16.msra.mxu1 %v4756_v7 }
 0x167   :  { %1018 = vmatprep.subr.bf16.mxu0 %v4757_v8  ;;  %1061 = vmatprep.subr.bf16.mxu1 %v4758_v9 }
 0x16a   :  { %1019 = vmatpush1.bf16.msra.mxu0 %v4759_v10  ;;  %1062 = vmatpush1.bf16.msra.mxu1 %v4760_v11 }
 0x16b   :  { %1020 = vmatprep.subr.bf16.mxu0 %v4761_v12  ;;  %1063 = vmatprep.subr.bf16.mxu1 %v4762_v13 }
 0x16e   :  { %1021 = vmatpush1.bf16.msra.mxu0 %v4763_v14  ;;  %1064 = vmatpush1.bf16.msra.mxu1 %v4764_v15 }
 0x16f   :  { %1022 = vmatprep.subr.bf16.mxu0 %v4765_v16  ;;  %1065 = vmatprep.subr.bf16.mxu1 %v4766_v17 }
 0x172   :  { %1023 = vmatpush1.bf16.msra.mxu0 %v4767_v18  ;;  %1066 = vmatpush1.bf16.msra.mxu1 %v4768_v19 }
 0x173   :  { %1024 = vmatprep.subr.bf16.mxu0 %v4769_v20  ;;  %1067 = vmatprep.subr.bf16.mxu1 %v4770_v21 }
 0x176   :  { %1025 = vmatpush1.bf16.msra.mxu0 %v4771_v22  ;;  %1068 = vmatpush1.bf16.msra.mxu1 %v4772_v23 }
 0x177   :  { %1026 = vmatprep.subr.bf16.mxu0 %v4773_v58  ;;  %1069 = vmatprep.subr.bf16.mxu1 %v4774_v41 }
 0x17a   :  { %1027 = vmatpush1.bf16.msra.mxu0 %v4775_v48  ;;  %1070 = vmatpush1.bf16.msra.mxu1 %v4776_v51 }
 0x17b   :  { %1028 = vmatprep.subr.bf16.mxu0 %v4777_v55  ;;  %1071 = vmatprep.subr.bf16.mxu1 %v4778_v61  ;;  %v730_v61 = vadd.f32 %v729_v43, %v3649_v53 }
 0x17e   :  { %1029 = vmatpush1.bf16.msra.mxu0 %v4779_v2  ;;  %1072 = vmatpush1.bf16.msra.mxu1 %v4780_v47 }
 0x17f   :  { %1165 = vmatprep.subr.bf16.mxu0 %v4781_v0  ;;  %1208 = vmatprep.subr.bf16.mxu1 %v4782_v44  ;;  %v728_v0 = vadd.f32 %v727_v40, %v3647_v35 }
 0x201   :  { %v810_v60 = vpop.f32.mrf.mxu0  ;;  %v853_v59 = vpop.f32.mrf.mxu1 }
 0x202   :  { %v862_v54 = vadd.f32 %v810_v60, %v724_v38  ;;  %v769_v60 = vadd.f32 %v768_v56, %v3655_v1 }
 0x203   :  { %v812_v3 = vpop.f32.mrf.mxu0  ;;  %v855_v51 = vpop.f32.mrf.mxu1 }
 0x204   :  { %v2558_v47 = vmul.f32 -1.442695, %v862_v54  ;;  %v863_v44 = vadd.f32 %v812_v3, %v726_v52  ;;  %v767_v52 = vadd.f32 %v766_v46, %v3657_v49  ;;  %v773_v54 = vadd.f32 %v772_v62, %v3655_v1 }
 0x205   :  { %v814_v2 = vpop.f32.mrf.mxu0  ;;  %v857_v57 = vpop.f32.mrf.mxu1  ;;  %v865_v43 = vadd.f32 %v855_v51, %v769_v60 }
 0x206   :  { %2807 = vpow2.f32 %v2558_v47  ;;  %v2560_v55 = vmul.f32 -1.442695, %v863_v44  ;;  %v866_v48 = vadd.f32 %v814_v2, %v728_v0  ;;  %v864_v47 = vadd.f32 %v853_v59, %v767_v52 }
 0x207   :  { %v816_v41 = vpop.f32.mrf.mxu0  ;;  %v859_v40 = vpop.f32.mrf.mxu1  ;;  %v2562_v2 = vmul.f32 -1.442695, %v865_v43 }
 0x208   :  { %2809 = vpow2.f32 %v2560_v55  ;;  %v2559_v45 = vmul.f32 -1.442695, %v866_v48  ;;  %v867_v58 = vadd.f32 %v816_v41, %v730_v61  ;;  %v869_v3 = vadd.f32 %v859_v40, %v773_v54 }
 0x209   :  { %v771_v41 = vadd.f32 %v770_v39, %v3657_v49 }
 0x20a   :  { %2811 = vpow2.f32 %v2559_v45  ;;  %v2561_v38 = vmul.f32 -1.442695, %v867_v58  ;;  %v2563_v48 = vmul.f32 -1.442695, %v869_v3 }
 0x20b   :  { %v868_v56 = vadd.f32 %v857_v57, %v771_v41 }
 0x20c   :  { %2813 = vpow2.f32 %v2561_v38 }
 0x20d   :  { %2815 = vtanh.f32 %v864_v47 }
 0x213   :  { %v2808_v44 = vpop.eup %2807 }
 0x214   :  { %v876_v0 = vadd.f32 1.0, %v2808_v44 }
 0x215   :  { %v2810_v55 = vpop.eup %2809 }
 0x216   :  { %2817 = vrcp.f32 %v876_v0  ;;  %v888_v58 = vadd.f32 1.0, %v2810_v55 }
 0x217   :  { %v2812_v61 = vpop.eup %2811  ;;  %2819 = vpow2.f32 %v2562_v2 }
 0x218   :  { %2821 = vrcp.f32 %v888_v58  ;;  %v877_v46 = vadd.f32 1.0, %v2812_v61 }
 0x219   :  { %v2814_v45 = vpop.eup %2813  ;;  %2823 = vpow2.f32 %v2563_v48 }
 0x21a   :  { %2825 = vrcp.f32 %v877_v46  ;;  %v889_v51 = vadd.f32 1.0, %v2814_v45  ;;  %v2816_v62 = vpop.eup %2815  ;;  %v3765_v45 = vld [vmem:[%s4592_s1 + $0xe8] ss:$16 sps:$4 sm:$0xff]  }
 0x21b   :  { %2827 = vtanh.f32 %v868_v56 }
 0x21c   :  { %2829 = vrcp.f32 %v889_v51  ;;  %v3771_v51 = vld [vmem:[%s4592_s1 + $0xc4] ss:$16 sps:$4 sm:$0xff]  }
 0x223   :  { %v2818_v59 = vpop.eup %2817 }
 0x224   :  { %v2820_v38 = vpop.eup %2819  ;;  %v910_v40 = vmul.f32 %v2818_v59, %v2816_v62  ;;  %v3777_v62 = vld [vmem:[%s4592_s1 + $0xcc] ss:$16 sps:$4 sm:$0xff]   ;;  %v3785_v59 = vld [vmem:[%s4592_s1 + $0xc0] ss:$16 sps:$4 sm:$0xff]  }
 0x225   :  { %v2822_v60 = vpop.eup %2821  ;;  %v902_v43 = vadd.f32 1.0, %v2820_v38  ;;  %v3791_v38 = vld [vmem:[%s4592_s1 + $0xc8] ss:$16 sps:$4 sm:$0xff]  }
 0x226   :  { %v2824_v39 = vpop.eup %2823  ;;  %v908_v52 = vmul.f32 %v2822_v60, %v3663_v50  ;;  %v3797_v60 = vld [vmem:[%s4592_s1 + $0xa4] ss:$16 sps:$4 sm:$0xff]  }
 0x227   :  { %v2826_v54 = vpop.eup %2825  ;;  %v903_v44 = vadd.f32 1.0, %v2824_v39  ;;  %2831 = vrcp.f32 %v902_v43  ;;  %v3803_v39 = vld [vmem:[%s4592_s1 + $0xac] ss:$16 sps:$4 sm:$0xff]  }
 0x228   :  { %v2828_v47 = vpop.eup %2827  ;;  %v3749_v57 = vadd.f32 %v910_v40, %v908_v52  ;;  %v3809_v40 = vld [vmem:[%s4592_s1 + $0xa0] ss:$16 sps:$4 sm:$0xff]   ;;  %v3815_v52 = vld [vmem:[%s4592_s1 + $0xa8] ss:$16 sps:$4 sm:$0xff]   ;;  %v3827_v43 = vld [vmem:[%s4592_s1 + $0x8c] ss:$16 sps:$4 sm:$0xff]  }
 0x229   :  { %v2830_v3 = vpop.eup %2829  ;;  %v911_v2 = vmul.f32 %v2828_v47, %v2826_v54  ;;  %v3821_v54 = vld [vmem:[%s4592_s1 + $0x84] ss:$16 sps:$4 sm:$0xff]   ;;  %v3833_v47 = vld [vmem:[%s4592_s1 + $0x80] ss:$16 sps:$4 sm:$0xff]  }
 0x22a   :  { %v909_v0 = vmul.f32 %v2830_v3, %v3666_v42  ;;  %2833 = vtanh.f32 %v3749_v57  ;;  %v3759_v42 = vld [vmem:[%s4592_s1 + $0xe0] ss:$16 sps:$4 sm:$0xff]   ;;  %v3839_v3 = vld [vmem:[%s4592_s1 + $0x88] ss:$16 sps:$4 sm:$0xff]  }
 0x22b   :  { %2835 = vrcp.f32 %v903_v44  ;;  %v3845_v44 = vld [vmem:[%s4592_s1 + $0x64] ss:$16 sps:$4 sm:$0xff]  }
 0x22c   :  { %v3752_v55 = vadd.f32 %v911_v2, %v909_v0  ;;  %v3851_v2 = vld [vmem:[%s4592_s1 + $0x6c] ss:$16 sps:$4 sm:$0xff]   ;;  %v3857_v0 = vld [vmem:[%s4592_s1 + $0x60] ss:$16 sps:$4 sm:$0xff]  }
 0x22e   :  { %2837 = vtanh.f32 %v3752_v55 }
 0x234   :  { %v2832_v41 = vpop.eup %2831 }
 0x237   :  { %v2834_v50 = vpop.eup %2833 }
 0x238   :  { %v2836_v48 = vpop.eup %2835  ;;  %v916_v61 = vmul.f32 %v2834_v50, %v2832_v41  ;;  %v3863_v41 = vld [vmem:[%s4592_s1 + $0x68] ss:$16 sps:$4 sm:$0xff]   ;;  %v3869_v50 = vld [vmem:[%s4592_s1 + $0x44] ss:$16 sps:$4 sm:$0xff]  }
 0x23b   :  { %v2838_v58 = vpop.eup %2837 }
 0x23c   :  { %v917_v56 = vmul.f32 %v2838_v58, %v2836_v48  ;;  %v3875_v48 = vld [vmem:[%s4592_s1 + $0x4c] ss:$16 sps:$4 sm:$0xff]   ;;  %v3881_v58 = vld [vmem:[%s4592_s1 + $0x40] ss:$16 sps:$4 sm:$0xff]  }
 0x23e   :  { %v1013_v46 = vpack.c.bf16 %v917_v56, %v916_v61 }
 0x240   :  { %1047 = vmatmul.mubr.bf16.vlgmr.msra.gmra.mxu0 %v1013_v46  ;;  %1090 = vmatmul.mubr.bf16.vlgmr.msra.gmra.mxu1 %v1013_v46 }
 0x241   :  { %1166 = vmatpush1.bf16.msra.mxu0 %v3759_v42  ;;  %1209 = vmatpush1.bf16.msra.mxu1 %v3765_v45 }
 0x242   :  { %1167 = vmatprep.subr.bf16.mxu0 %v3771_v51  ;;  %1210 = vmatprep.subr.bf16.mxu1 %v3777_v62 }
 0x243   :  { %1197 = vmatprep.mubr.bf16.mxu0 %v4750_v63  ;;  %1240 = vmatprep.mubr.bf16.mxu1 %v4750_v63 }
 0x245   :  { %1168 = vmatpush1.bf16.msra.mxu0 %v3785_v59  ;;  %1211 = vmatpush1.bf16.msra.mxu1 %v3791_v38 }
 0x246   :  { %1169 = vmatprep.subr.bf16.mxu0 %v3797_v60  ;;  %1212 = vmatprep.subr.bf16.mxu1 %v3803_v39 }
 0x249   :  { %1170 = vmatpush1.bf16.msra.mxu0 %v3809_v40  ;;  %1213 = vmatpush1.bf16.msra.mxu1 %v3815_v52 }
 0x24a   :  { %1171 = vmatprep.subr.bf16.mxu0 %v3821_v54  ;;  %1214 = vmatprep.subr.bf16.mxu1 %v3827_v43 }
 0x24d   :  { %1172 = vmatpush1.bf16.msra.mxu0 %v3833_v47  ;;  %1215 = vmatpush1.bf16.msra.mxu1 %v3839_v3 }
 0x24e   :  { %1173 = vmatprep.subr.bf16.mxu0 %v3845_v44  ;;  %1216 = vmatprep.subr.bf16.mxu1 %v3851_v2 }
 0x251   :  { %1174 = vmatpush1.bf16.msra.mxu0 %v3857_v0  ;;  %1217 = vmatpush1.bf16.msra.mxu1 %v3863_v41 }
 0x252   :  { %1175 = vmatprep.subr.bf16.mxu0 %v3869_v50  ;;  %1218 = vmatprep.subr.bf16.mxu1 %v3875_v48 }
 0x255   :  { %1176 = vmatpush1.bf16.msra.mxu0 %v3881_v58  ;;  %1219 = vmatpush1.bf16.msra.mxu1 %v3320_v24  ;;  %v2762_v24 = vld [vmem:[%s4591_s0 + $0x18] sm:$0xff]  }
 0x256   :  { %1177 = vmatprep.subr.bf16.mxu0 %v3325_v25  ;;  %1220 = vmatprep.subr.bf16.mxu1 %v3332_v26  ;;  %v4783_v25 = vld [vmem:[#allocation29_spill] sm:$0xff]  ;;  %v4784_v26 = vld [vmem:[#allocation30_spill] sm:$0xff] }
 0x259   :  { %1178 = vmatpush1.bf16.msra.mxu0 %v3339_v27  ;;  %1221 = vmatpush1.bf16.msra.mxu1 %v3344_v28  ;;  %v4785_v27 = vld [vmem:[#allocation31_spill] sm:$0xff]  ;;  %v4786_v28 = vld [vmem:[#allocation32_spill] sm:$0xff] }
 0x25a   :  { %1179 = vmatprep.subr.bf16.mxu0 %v3349_v29  ;;  %1222 = vmatprep.subr.bf16.mxu1 %v3356_v30  ;;  %v4787_v29 = vld [vmem:[#allocation33_spill] sm:$0xff]  ;;  %v4788_v30 = vld [vmem:[#allocation34_spill] sm:$0xff] }
 0x25d   :  { %1180 = vmatpush1.bf16.msra.mxu0 %v3361_v31  ;;  %1223 = vmatpush1.bf16.msra.mxu1 %v3368_v32  ;;  %v4789_v31 = vld [vmem:[#allocation35_spill] sm:$0xff]  ;;  %v4790_v32 = vld [vmem:[#allocation36_spill] sm:$0xff] }
 0x25e   :  { %1252 = vmatprep.subr.bf16.mxu0 %v3375_v33  ;;  %1295 = vmatprep.subr.bf16.mxu1 %v3380_v34  ;;  %v3933_v33 = vld [vmem:[%s4592_s1 + $0xe4] ss:$16 sps:$4 sm:$0xff]   ;;  %v3939_v34 = vld [vmem:[%s4592_s1 + $0xec] ss:$16 sps:$4 sm:$0xff]  }
 0x25f   :  { %4791 = vst [vmem:[#allocation9_spill] sm:$0xff] %v3933_v33  ;;  %4792 = vst [vmem:[#allocation10_spill] sm:$0xff] %v3939_v34 }
 0x260   :  { %1198 = vmatmul.mubr.bf16.vlgmr.msra.gmra.mxu0 %v2762_v24  ;;  %1241 = vmatmul.mubr.bf16.vlgmr.msra.gmra.mxu1 %v2762_v24 }
 0x261   :  { %1253 = vmatpush1.bf16.msra.mxu0 %v3390_v36  ;;  %1296 = vmatpush1.bf16.msra.mxu1 %v3395_v37  ;;  %v961_v36 = vpop.f32.mrf.mxu0  ;;  %v1004_v37 = vpop.f32.mrf.mxu1 }
 0x262   :  { %1254 = vmatprep.subr.bf16.mxu0 %v4753_v4  ;;  %1297 = vmatprep.subr.bf16.mxu1 %v4754_v5 }
 0x263   :  { %1284 = vmatprep.mubr.bf16.mxu0 %v4750_v63  ;;  %1327 = vmatprep.mubr.bf16.mxu1 %v4750_v63  ;;  %v963_v4 = vpop.f32.mrf.mxu0  ;;  %v1006_v5 = vpop.f32.mrf.mxu1 }
 0x265   :  { %1255 = vmatpush1.bf16.msra.mxu0 %v4755_v6  ;;  %1298 = vmatpush1.bf16.msra.mxu1 %v4756_v7  ;;  %v965_v6 = vpop.f32.mrf.mxu0  ;;  %v1008_v7 = vpop.f32.mrf.mxu1 }
 0x266   :  { %1256 = vmatprep.subr.bf16.mxu0 %v4757_v8  ;;  %1299 = vmatprep.subr.bf16.mxu1 %v4758_v9  ;;  %v962_v9 = vadd.f32 %v961_v36, %v3647_v35 }
 0x267   :  { %v967_v8 = vpop.f32.mrf.mxu0 }
 0x269   :  { %1257 = vmatpush1.bf16.msra.mxu0 %v4759_v10  ;;  %1300 = vmatpush1.bf16.msra.mxu1 %v4760_v11  ;;  %v1010_v10 = vpop.f32.mrf.mxu1 }
 0x26a   :  { %1258 = vmatprep.subr.bf16.mxu0 %v4761_v12  ;;  %1301 = vmatprep.subr.bf16.mxu1 %v4762_v13  ;;  %v964_v12 = vadd.f32 %v963_v4, %v3649_v53 }
 0x26d   :  { %1259 = vmatpush1.bf16.msra.mxu0 %v4763_v14  ;;  %1302 = vmatpush1.bf16.msra.mxu1 %v4764_v15 }
 0x26e   :  { %1260 = vmatprep.subr.bf16.mxu0 %v4765_v16  ;;  %1303 = vmatprep.subr.bf16.mxu1 %v4766_v17  ;;  %v966_v16 = vadd.f32 %v965_v6, %v3647_v35 }
 0x271   :  { %1261 = vmatpush1.bf16.msra.mxu0 %v4767_v18  ;;  %1304 = vmatpush1.bf16.msra.mxu1 %v4768_v19 }
 0x272   :  { %1262 = vmatprep.subr.bf16.mxu0 %v4769_v20  ;;  %1305 = vmatprep.subr.bf16.mxu1 %v4770_v21  ;;  %v968_v20 = vadd.f32 %v967_v8, %v3649_v53 }
 0x275   :  { %1263 = vmatpush1.bf16.msra.mxu0 %v4771_v22  ;;  %1306 = vmatpush1.bf16.msra.mxu1 %v4772_v23 }
 0x276   :  { %1264 = vmatprep.subr.bf16.mxu0 %v4783_v25  ;;  %1307 = vmatprep.subr.bf16.mxu1 %v4784_v26  ;;  %v1007_v26 = vadd.f32 %v1006_v5, %v3655_v1 }
 0x279   :  { %1265 = vmatpush1.bf16.msra.mxu0 %v4785_v27  ;;  %1308 = vmatpush1.bf16.msra.mxu1 %v4786_v28  ;;  %v1005_v28 = vadd.f32 %v1004_v37, %v3657_v49 }
 0x27a   :  { %1266 = vmatprep.subr.bf16.mxu0 %v4787_v29  ;;  %1309 = vmatprep.subr.bf16.mxu1 %v4788_v30  ;;  %v1011_v29 = vadd.f32 %v1010_v10, %v3655_v1 }
 0x27d   :  { %1267 = vmatpush1.bf16.msra.mxu0 %v4789_v31  ;;  %1310 = vmatpush1.bf16.msra.mxu1 %v4790_v32 }
 0x27e   :  { %1403 = vmatprep.subr.bf16.mxu0 %v3933_v33  ;;  %1446 = vmatprep.subr.bf16.mxu1 %v3939_v34 }
 0x300   :  { %v1048_v11 = vpop.f32.mrf.mxu0  ;;  %v1091_v14 = vpop.f32.mrf.mxu1 }
 0x301   :  { %v1100_v13 = vadd.f32 %v1048_v11, %v962_v9  ;;  %v1102_v31 = vadd.f32 %v1091_v14, %v1005_v28  ;;  %v1009_v9 = vadd.f32 %v1008_v7, %v3657_v49 }
 0x302   :  { %v1050_v15 = vpop.f32.mrf.mxu0  ;;  %v1093_v22 = vpop.f32.mrf.mxu1 }
 0x303   :  { %v2567_v17 = vmul.f32 -1.442695, %v1100_v13  ;;  %v1101_v18 = vadd.f32 %v1050_v15, %v964_v12  ;;  %v1103_v30 = vadd.f32 %v1093_v22, %v1007_v26 }
 0x304   :  { %v1052_v19 = vpop.f32.mrf.mxu0  ;;  %v1095_v24 = vpop.f32.mrf.mxu1 }
 0x305   :  { %2839 = vpow2.f32 %v2567_v17  ;;  %v2569_v21 = vmul.f32 -1.442695, %v1101_v18  ;;  %v1104_v23 = vadd.f32 %v1052_v19, %v966_v16  ;;  %v2571_v4 = vmul.f32 -1.442695, %v1103_v30 }
 0x306   :  { %v1054_v61 = vpop.f32.mrf.mxu0  ;;  %v1097_v27 = vpop.f32.mrf.mxu1  ;;  %v1106_v5 = vadd.f32 %v1095_v24, %v1009_v9  ;;  %v4014_v9 = vld [vmem:[%s4592_s1 + $0x4] ss:$16 sps:$4 sm:$0xff]  }
 0x307   :  { %2841 = vpow2.f32 %v2569_v21  ;;  %v2568_v56 = vmul.f32 -1.442695, %v1104_v23  ;;  %v1105_v46 = vadd.f32 %v1054_v61, %v968_v20  ;;  %v1107_v32 = vadd.f32 %v1097_v27, %v1011_v29 }
 0x309   :  { %2843 = vpow2.f32 %v2568_v56  ;;  %v2570_v25 = vmul.f32 -1.442695, %v1105_v46  ;;  %v2572_v11 = vmul.f32 -1.442695, %v1107_v32 }
 0x30b   :  { %2845 = vpow2.f32 %v2570_v25 }
 0x30c   :  { %2847 = vtanh.f32 %v1102_v31 }
 0x312   :  { %v2840_v36 = vpop.eup %2839 }
 0x313   :  { %v1114_v6 = vadd.f32 1.0, %v2840_v36  ;;  %v3990_v36 = vld [vmem:[%s4592_s1 + $0x24] ss:$16 sps:$4 sm:$0xff]  }
 0x314   :  { %v2842_v8 = vpop.eup %2841 }
 0x315   :  { %2849 = vrcp.f32 %v1114_v6  ;;  %v1126_v12 = vadd.f32 1.0, %v2842_v8  ;;  %v4002_v6 = vld [vmem:[%s4592_s1 + $0x20] ss:$16 sps:$4 sm:$0xff]   ;;  %v4008_v8 = vld [vmem:[%s4592_s1 + $0x28] ss:$16 sps:$4 sm:$0xff]  }
 0x316   :  { %v2844_v13 = vpop.eup %2843  ;;  %2851 = vpow2.f32 %v2571_v4  ;;  %v3996_v4 = vld [vmem:[%s4592_s1 + $0x2c] ss:$16 sps:$4 sm:$0xff]  }
 0x317   :  { %2853 = vrcp.f32 %v1126_v12  ;;  %v1115_v37 = vadd.f32 1.0, %v2844_v13  ;;  %v4026_v12 = vld [vmem:[%s4592_s1] ss:$16 sps:$4 sm:$0xff]   ;;  %v4032_v13 = vld [vmem:[%s4592_s1 + $0x8] ss:$16 sps:$4 sm:$0xff]  }
 0x318   :  { %v2846_v15 = vpop.eup %2845  ;;  %2855 = vpow2.f32 %v2572_v11  ;;  %v4020_v11 = vld [vmem:[%s4592_s1 + $0xc] ss:$16 sps:$4 sm:$0xff]  }
 0x319   :  { %2857 = vrcp.f32 %v1115_v37  ;;  %v1127_v10 = vadd.f32 1.0, %v2846_v15  ;;  %v2848_v14 = vpop.eup %2847  ;;  %v4044_v37 = vld [vmem:[%s4593_s2 + $0xec] ss:$16 sps:$4 sm:$0xff]   ;;  %v2763_v15 = vld [vmem:[%s4591_s0 + $0x20] sm:$0xff]  }
 0x31a   :  { %2859 = vtanh.f32 %v1106_v5  ;;  %v4038_v5 = vld [vmem:[%s4593_s2 + $0xe4] ss:$16 sps:$4 sm:$0xff]  }
 0x31b   :  { %2861 = vrcp.f32 %v1127_v10  ;;  %v4053_v10 = vld [vmem:[%s4593_s2 + $0xe0] ss:$16 sps:$4 sm:$0xff]  }
 0x322   :  { %v2850_v16 = vpop.eup %2849 }
 0x323   :  { %v2852_v17 = vpop.eup %2851  ;;  %v1148_v19 = vmul.f32 %v2850_v16, %v2848_v14  ;;  %v4059_v14 = vld [vmem:[%s4593_s2 + $0xe8] ss:$16 sps:$4 sm:$0xff]   ;;  %v4065_v16 = vld [vmem:[%s4593_s2 + $0xc4] ss:$16 sps:$4 sm:$0xff]  }
 0x324   :  { %v2854_v18 = vpop.eup %2853  ;;  %v1140_v22 = vadd.f32 1.0, %v2852_v17  ;;  %4793 = vst [vmem:[#allocation11_spill] sm:$0xff] %v4059_v14  ;;  %4794 = vst [vmem:[#allocation12_spill] sm:$0xff] %v4065_v16  ;;  %v4071_v17 = vld [vmem:[%s4593_s2 + $0xcc] ss:$16 sps:$4 sm:$0xff]  }
 0x325   :  { %v2856_v7 = vpop.eup %2855  ;;  %v1146_v20 = vmul.f32 %v2854_v18, %v3749_v57  ;;  %4795 = vst [vmem:[#allocation13_spill] sm:$0xff] %v4071_v17  ;;  %v4079_v18 = vld [vmem:[%s4593_s2 + $0xc0] ss:$16 sps:$4 sm:$0xff]  }
 0x326   :  { %v2858_v21 = vpop.eup %2857  ;;  %v1141_v46 = vadd.f32 1.0, %v2856_v7  ;;  %2863 = vrcp.f32 %v1140_v22  ;;  %4796 = vst [vmem:[#allocation14_spill] sm:$0xff] %v4079_v18  ;;  %v4085_v7 = vld [vmem:[%s4593_s2 + $0xc8] ss:$16 sps:$4 sm:$0xff]  }
 0x327   :  { %v2860_v23 = vpop.eup %2859  ;;  %v3951_v61 = vadd.f32 %v1148_v19, %v1146_v20  ;;  %4797 = vst [vmem:[#allocation15_spill] sm:$0xff] %v4085_v7  ;;  %v4091_v19 = vld [vmem:[%s4593_s2 + $0xa4] ss:$16 sps:$4 sm:$0xff]   ;;  %v4097_v20 = vld [vmem:[%s4593_s2 + $0xac] ss:$16 sps:$4 sm:$0xff]  }
 0x328   :  { %v2862_v56 = vpop.eup %2861  ;;  %v1149_v24 = vmul.f32 %v2860_v23, %v2858_v21  ;;  %4798 = vst [vmem:[#allocation16_spill] sm:$0xff] %v4091_v19  ;;  %4799 = vst [vmem:[#allocation17_spill] sm:$0xff] %v4097_v20  ;;  %v4103_v21 = vld [vmem:[%s4593_s2 + $0xa0] ss:$16 sps:$4 sm:$0xff]   ;;  %v4109_v22 = vld [vmem:[%s4593_s2 + $0xa8] ss:$16 sps:$4 sm:$0xff]  }
 0x329   :  { %v1147_v25 = vmul.f32 %v2862_v56, %v3752_v55  ;;  %2865 = vtanh.f32 %v3951_v61  ;;  %v3984_v55 = vld [vmem:[%s4592_s1 + $0x48] ss:$16 sps:$4 sm:$0xff]   ;;  %4800 = vst [vmem:[#allocation18_spill] sm:$0xff] %v4103_v21  ;;  %4801 = vst [vmem:[#allocation19_spill] sm:$0xff] %v4109_v22  ;;  %v4115_v23 = vld [vmem:[%s4593_s2 + $0x84] ss:$16 sps:$4 sm:$0xff]  }
 0x32a   :  { %2867 = vrcp.f32 %v1141_v46  ;;  %4802 = vst [vmem:[#allocation20_spill] sm:$0xff] %v4115_v23  ;;  %v4121_v56 = vld [vmem:[%s4593_s2 + $0x8c] ss:$16 sps:$4 sm:$0xff]   ;;  %v4127_v46 = vld [vmem:[%s4593_s2 + $0x80] ss:$16 sps:$4 sm:$0xff]  }
 0x32b   :  { %v3954_v26 = vadd.f32 %v1149_v24, %v1147_v25  ;;  %4803 = vst [vmem:[#allocation21_spill] sm:$0xff] %v4121_v56  ;;  %4804 = vst [vmem:[#allocation22_spill] sm:$0xff] %v4127_v46  ;;  %v4133_v24 = vld [vmem:[%s4593_s2 + $0x88] ss:$16 sps:$4 sm:$0xff]   ;;  %v4139_v25 = vld [vmem:[%s4593_s2 + $0x64] ss:$16 sps:$4 sm:$0xff]  }
 0x32c   :  { %4805 = vst [vmem:[#allocation23_spill] sm:$0xff] %v4133_v24  ;;  %4806 = vst [vmem:[#allocation24_spill] sm:$0xff] %v4139_v25 }
 0x32d   :  { %2869 = vtanh.f32 %v3954_v26 }
 0x333   :  { %v2864_v27 = vpop.eup %2863 }
 0x336   :  { %v2866_v57 = vpop.eup %2865 }
 0x337   :  { %v2868_v28 = vpop.eup %2867  ;;  %v1154_v30 = vmul.f32 %v2866_v57, %v2864_v27  ;;  %v4145_v27 = vld [vmem:[%s4593_s2 + $0x6c] ss:$16 sps:$4 sm:$0xff]   ;;  %v4151_v57 = vld [vmem:[%s4593_s2 + $0x60] ss:$16 sps:$4 sm:$0xff]  }
 0x338   :  { %4807 = vst [vmem:[#allocation25_spill] sm:$0xff] %v4145_v27  ;;  %4808 = vst [vmem:[#allocation26_spill] sm:$0xff] %v4151_v57 }
 0x33a   :  { %v2870_v29 = vpop.eup %2869 }
 0x33b   :  { %v1155_v31 = vmul.f32 %v2870_v29, %v2868_v28  ;;  %v4157_v28 = vld [vmem:[%s4593_s2 + $0x68] ss:$16 sps:$4 sm:$0xff]   ;;  %v4163_v29 = vld [vmem:[%s4593_s2 + $0x44] ss:$16 sps:$4 sm:$0xff]  }
 0x33c   :  { %4809 = vst [vmem:[#allocation27_spill] sm:$0xff] %v4157_v28  ;;  %4810 = vst [vmem:[#allocation28_spill] sm:$0xff] %v4163_v29 }
 0x33d   :  { %v1251_v32 = vpack.c.bf16 %v1155_v31, %v1154_v30  ;;  %v4169_v30 = vld [vmem:[%s4593_s2 + $0x4c] ss:$16 sps:$4 sm:$0xff]   ;;  %v4175_v31 = vld [vmem:[%s4593_s2 + $0x40] ss:$16 sps:$4 sm:$0xff]  }
 0x33e   :  { %4811 = vst [vmem:[#allocation7_spill] sm:$0xff] %v4169_v30  ;;  %4812 = vst [vmem:[#allocation8_spill] sm:$0xff] %v4175_v31 }
 0x33f   :  { %1285 = vmatmul.mubr.bf16.vlgmr.msra.gmra.mxu0 %v1251_v32  ;;  %1328 = vmatmul.mubr.bf16.vlgmr.msra.gmra.mxu1 %v1251_v32  ;;  %v4181_v32 = vld [vmem:[%s4593_s2 + $0x48] ss:$16 sps:$4 sm:$0xff]  }
 0x340   :  { %1404 = vmatpush1.bf16.msra.mxu0 %v3759_v42  ;;  %1447 = vmatpush1.bf16.msra.mxu1 %v3765_v45  ;;  %4813 = vst [vmem:[#allocation29_spill] sm:$0xff] %v4181_v32 }
 0x341   :  { %1405 = vmatprep.subr.bf16.mxu0 %v3771_v51  ;;  %1448 = vmatprep.subr.bf16.mxu1 %v3777_v62 }
 0x342   :  { %1435 = vmatprep.mubr.bf16.mxu0 %v4750_v63  ;;  %1478 = vmatprep.mubr.bf16.mxu1 %v4750_v63 }
 0x344   :  { %1406 = vmatpush1.bf16.msra.mxu0 %v3785_v59  ;;  %1449 = vmatpush1.bf16.msra.mxu1 %v3791_v38 }
 0x345   :  { %1407 = vmatprep.subr.bf16.mxu0 %v3797_v60  ;;  %1450 = vmatprep.subr.bf16.mxu1 %v3803_v39 }
 0x348   :  { %1408 = vmatpush1.bf16.msra.mxu0 %v3809_v40  ;;  %1451 = vmatpush1.bf16.msra.mxu1 %v3815_v52 }
 0x349   :  { %1409 = vmatprep.subr.bf16.mxu0 %v3821_v54  ;;  %1452 = vmatprep.subr.bf16.mxu1 %v3827_v43 }
 0x34c   :  { %1410 = vmatpush1.bf16.msra.mxu0 %v3833_v47  ;;  %1453 = vmatpush1.bf16.msra.mxu1 %v3839_v3 }
 0x34d   :  { %1411 = vmatprep.subr.bf16.mxu0 %v3845_v44  ;;  %1454 = vmatprep.subr.bf16.mxu1 %v3851_v2 }
 0x350   :  { %1412 = vmatpush1.bf16.msra.mxu0 %v3857_v0  ;;  %1455 = vmatpush1.bf16.msra.mxu1 %v3863_v41 }
 0x351   :  { %1413 = vmatprep.subr.bf16.mxu0 %v3869_v50  ;;  %1456 = vmatprep.subr.bf16.mxu1 %v3875_v48 }
 0x354   :  { %1414 = vmatpush1.bf16.msra.mxu0 %v3881_v58  ;;  %1457 = vmatpush1.bf16.msra.mxu1 %v3984_v55 }
 0x355   :  { %1415 = vmatprep.subr.bf16.mxu0 %v3990_v36  ;;  %1458 = vmatprep.subr.bf16.mxu1 %v3996_v4 }
 0x358   :  { %1416 = vmatpush1.bf16.msra.mxu0 %v4002_v6  ;;  %1459 = vmatpush1.bf16.msra.mxu1 %v4008_v8 }
 0x359   :  { %1417 = vmatprep.subr.bf16.mxu0 %v4014_v9  ;;  %1460 = vmatprep.subr.bf16.mxu1 %v4020_v11 }
 0x35c   :  { %1418 = vmatpush1.bf16.msra.mxu0 %v4026_v12  ;;  %1461 = vmatpush1.bf16.msra.mxu1 %v4032_v13 }
 0x35d   :  { %1490 = vmatprep.subr.bf16.mxu0 %v4038_v5  ;;  %1533 = vmatprep.subr.bf16.mxu1 %v4044_v37 }
 0x35f   :  { %1436 = vmatmul.mubr.bf16.vlgmr.msra.gmra.mxu0 %v2763_v15  ;;  %1479 = vmatmul.mubr.bf16.vlgmr.msra.gmra.mxu1 %v2763_v15  ;;  %v4187_v15 = vld [vmem:[%s4593_s2 + $0x24] ss:$16 sps:$4 sm:$0xff]  }
 0x360   :  { %1491 = vmatpush1.bf16.msra.mxu0 %v4053_v10  ;;  %1534 = vmatpush1.bf16.msra.mxu1 %v4059_v14  ;;  %4814 = vst [vmem:[#allocation30_spill] sm:$0xff] %v4187_v15 }
 0x361   :  { %1492 = vmatprep.subr.bf16.mxu0 %v4065_v16  ;;  %1535 = vmatprep.subr.bf16.mxu1 %v4071_v17 }
 0x362   :  { %1522 = vmatprep.mubr.bf16.mxu0 %v4750_v63  ;;  %1565 = vmatprep.mubr.bf16.mxu1 %v4750_v63 }
 0x364   :  { %1493 = vmatpush1.bf16.msra.mxu0 %v4079_v18  ;;  %1536 = vmatpush1.bf16.msra.mxu1 %v4085_v7 }
 0x365   :  { %1494 = vmatprep.subr.bf16.mxu0 %v4091_v19  ;;  %1537 = vmatprep.subr.bf16.mxu1 %v4097_v20 }
 0x368   :  { %1495 = vmatpush1.bf16.msra.mxu0 %v4103_v21  ;;  %1538 = vmatpush1.bf16.msra.mxu1 %v4109_v22 }
 0x369   :  { %1496 = vmatprep.subr.bf16.mxu0 %v4115_v23  ;;  %1539 = vmatprep.subr.bf16.mxu1 %v4121_v56 }
 0x36c   :  { %1497 = vmatpush1.bf16.msra.mxu0 %v4127_v46  ;;  %1540 = vmatpush1.bf16.msra.mxu1 %v4133_v24 }
 0x36d   :  { %1498 = vmatprep.subr.bf16.mxu0 %v4139_v25  ;;  %1541 = vmatprep.subr.bf16.mxu1 %v4145_v27 }
 0x370   :  { %1499 = vmatpush1.bf16.msra.mxu0 %v4151_v57  ;;  %1542 = vmatpush1.bf16.msra.mxu1 %v4157_v28 }
 0x371   :  { %1500 = vmatprep.subr.bf16.mxu0 %v4163_v29  ;;  %1543 = vmatprep.subr.bf16.mxu1 %v4169_v30  ;;  %v4193_v30 = vld [vmem:[%s4593_s2 + $0x2c] ss:$16 sps:$4 sm:$0xff]  }
 0x372   :  { %4815 = vst [vmem:[#allocation31_spill] sm:$0xff] %v4193_v30 }
 0x374   :  { %1501 = vmatpush1.bf16.msra.mxu0 %v4175_v31  ;;  %1544 = vmatpush1.bf16.msra.mxu1 %v4181_v32  ;;  %v4199_v31 = vld [vmem:[%s4593_s2 + $0x20] ss:$16 sps:$4 sm:$0xff]   ;;  %v4205_v32 = vld [vmem:[%s4593_s2 + $0x28] ss:$16 sps:$4 sm:$0xff]  }
 0x375   :  { %1502 = vmatprep.subr.bf16.mxu0 %v4187_v15  ;;  %1545 = vmatprep.subr.bf16.mxu1 %v4193_v30  ;;  %4816 = vst [vmem:[#allocation32_spill] sm:$0xff] %v4199_v31  ;;  %4817 = vst [vmem:[#allocation33_spill] sm:$0xff] %v4205_v32  ;;  %v4211_v15 = vld [vmem:[%s4593_s2 + $0x4] ss:$16 sps:$4 sm:$0xff]   ;;  %v4217_v30 = vld [vmem:[%s4593_s2 + $0xc] ss:$16 sps:$4 sm:$0xff]  }
 0x376   :  { %4818 = vst [vmem:[#allocation34_spill] sm:$0xff] %v4211_v15  ;;  %4819 = vst [vmem:[#allocation35_spill] sm:$0xff] %v4217_v30 }
 0x378   :  { %1503 = vmatpush1.bf16.msra.mxu0 %v4199_v31  ;;  %1546 = vmatpush1.bf16.msra.mxu1 %v4205_v32  ;;  %v4223_v31 = vld [vmem:[%s4593_s2] ss:$16 sps:$4 sm:$0xff]   ;;  %v4229_v32 = vld [vmem:[%s4593_s2 + $0x8] ss:$16 sps:$4 sm:$0xff]  }
 0x379   :  { %1504 = vmatprep.subr.bf16.mxu0 %v4211_v15  ;;  %1547 = vmatprep.subr.bf16.mxu1 %v4217_v30  ;;  %4820 = vst [vmem:[#allocation36_spill] sm:$0xff] %v4223_v31  ;;  %4821 = vst [vmem:[#allocation37_spill] sm:$0xff] %v4229_v32  ;;  %v1199_v15 = vpop.f32.mrf.mxu0  ;;  %v1242_v30 = vpop.f32.mrf.mxu1 }
 0x37b   :  { %v1201_v29 = vpop.f32.mrf.mxu0  ;;  %v1244_v28 = vpop.f32.mrf.mxu1 }
 0x37c   :  { %1505 = vmatpush1.bf16.msra.mxu0 %v4223_v31  ;;  %1548 = vmatpush1.bf16.msra.mxu1 %v4229_v32  ;;  %v1200_v31 = vadd.f32 %v1199_v15, %v3647_v35  ;;  %v1202_v56 = vadd.f32 %v1201_v29, %v3649_v53 }
 0x37d   :  { %1641 = vmatprep.subr.bf16.mxu0 %v3933_v33  ;;  %1684 = vmatprep.subr.bf16.mxu1 %v3939_v34  ;;  %v1203_v57 = vpop.f32.mrf.mxu0  ;;  %v1246_v27 = vpop.f32.mrf.mxu1 }
 0x37e   :  { %v1204_v33 = vadd.f32 %v1203_v57, %v3647_v35 }
 0x37f   :  { %v1205_v25 = vpop.f32.mrf.mxu0  ;;  %v1248_v24 = vpop.f32.mrf.mxu1 }
 0x380   :  { %v1206_v19 = vadd.f32 %v1205_v25, %v3649_v53 }
 0x3ff   :  { %v1286_v46 = vpop.f32.mrf.mxu0  ;;  %v1329_v22 = vpop.f32.mrf.mxu1 }
 0x400   :  { %v1338_v23 = vadd.f32 %v1286_v46, %v1200_v31  ;;  %v1245_v31 = vadd.f32 %v1244_v28, %v3655_v1 }
 0x401   :  { %v1288_v32 = vpop.f32.mrf.mxu0  ;;  %v1331_v18 = vpop.f32.mrf.mxu1 }
 0x402   :  { %v2576_v21 = vmul.f32 -1.442695, %v1338_v23  ;;  %v1339_v34 = vadd.f32 %v1288_v32, %v1202_v56  ;;  %v1243_v23 = vadd.f32 %v1242_v30, %v3657_v49  ;;  %v1249_v56 = vadd.f32 %v1248_v24, %v3655_v1 }
 0x403   :  { %v1290_v20 = vpop.f32.mrf.mxu0  ;;  %v1333_v29 = vpop.f32.mrf.mxu1  ;;  %v1341_v25 = vadd.f32 %v1331_v18, %v1245_v31 }
 0x404   :  { %2871 = vpow2.f32 %v2576_v21  ;;  %v2578_v7 = vmul.f32 -1.442695, %v1339_v34  ;;  %v1342_v17 = vadd.f32 %v1290_v20, %v1204_v33  ;;  %v1340_v21 = vadd.f32 %v1329_v22, %v1243_v23 }
 0x405   :  { %v1292_v16 = vpop.f32.mrf.mxu0  ;;  %v1335_v57 = vpop.f32.mrf.mxu1  ;;  %v2580_v33 = vmul.f32 -1.442695, %v1341_v25 }
 0x406   :  { %2873 = vpow2.f32 %v2578_v7  ;;  %v2577_v15 = vmul.f32 -1.442695, %v1342_v17  ;;  %v1343_v14 = vadd.f32 %v1292_v16, %v1206_v19  ;;  %v1345_v34 = vadd.f32 %v1335_v57, %v1249_v56 }
 0x407   :  { %v1247_v16 = vadd.f32 %v1246_v27, %v3657_v49 }
 0x408   :  { %2875 = vpow2.f32 %v2577_v15  ;;  %v2579_v46 = vmul.f32 -1.442695, %v1343_v14  ;;  %v2581_v17 = vmul.f32 -1.442695, %v1345_v34 }
 0x409   :  { %v1344_v28 = vadd.f32 %v1333_v29, %v1247_v16 }
 0x40a   :  { %2877 = vpow2.f32 %v2579_v46 }
 0x40b   :  { %2879 = vtanh.f32 %v1340_v21 }
 0x411   :  { %v2872_v32 = vpop.eup %2871 }
 0x412   :  { %v1352_v20 = vadd.f32 1.0, %v2872_v32 }
 0x413   :  { %v2874_v7 = vpop.eup %2873 }
 0x414   :  { %2881 = vrcp.f32 %v1352_v20  ;;  %v1364_v14 = vadd.f32 1.0, %v2874_v7 }
 0x415   :  { %v2876_v19 = vpop.eup %2875  ;;  %2883 = vpow2.f32 %v2580_v33 }
 0x416   :  { %2885 = vrcp.f32 %v1364_v14  ;;  %v1353_v30 = vadd.f32 1.0, %v2876_v19 }
 0x417   :  { %v2878_v15 = vpop.eup %2877  ;;  %2887 = vpow2.f32 %v2581_v17 }
 0x418   :  { %2889 = vrcp.f32 %v1353_v30  ;;  %v1365_v18 = vadd.f32 1.0, %v2878_v15  ;;  %v2880_v22 = vpop.eup %2879  ;;  %v4822_v15 = vld [vmem:[#allocation11_spill] sm:$0xff] }
 0x419   :  { %2891 = vtanh.f32 %v1344_v28 }
 0x41a   :  { %2893 = vrcp.f32 %v1365_v18  ;;  %v4823_v18 = vld [vmem:[#allocation12_spill] sm:$0xff] }
 0x421   :  { %v2882_v24 = vpop.eup %2881 }
 0x422   :  { %v2884_v46 = vpop.eup %2883  ;;  %v1386_v57 = vmul.f32 %v2882_v24, %v2880_v22  ;;  %v4824_v22 = vld [vmem:[#allocation13_spill] sm:$0xff]  ;;  %v4825_v24 = vld [vmem:[#allocation14_spill] sm:$0xff] }
 0x423   :  { %v2886_v31 = vpop.eup %2885  ;;  %v1378_v25 = vadd.f32 1.0, %v2884_v46  ;;  %v4826_v46 = vld [vmem:[#allocation15_spill] sm:$0xff] }
 0x424   :  { %v2888_v27 = vpop.eup %2887  ;;  %v1384_v23 = vmul.f32 %v2886_v31, %v3951_v61  ;;  %v4827_v31 = vld [vmem:[#allocation16_spill] sm:$0xff] }
 0x425   :  { %v2890_v56 = vpop.eup %2889  ;;  %v1379_v32 = vadd.f32 1.0, %v2888_v27  ;;  %2895 = vrcp.f32 %v1378_v25  ;;  %v4828_v27 = vld [vmem:[#allocation17_spill] sm:$0xff] }
 0x426   :  { %v2892_v21 = vpop.eup %2891  ;;  %v4243_v29 = vadd.f32 %v1386_v57, %v1384_v23  ;;  %v4829_v57 = vld [vmem:[#allocation18_spill] sm:$0xff]  ;;  %v4830_v23 = vld [vmem:[#allocation19_spill] sm:$0xff]  ;;  %v4832_v25 = vld [vmem:[#allocation21_spill] sm:$0xff] }
 0x427   :  { %v2894_v34 = vpop.eup %2893  ;;  %v1387_v33 = vmul.f32 %v2892_v21, %v2890_v56  ;;  %v4831_v56 = vld [vmem:[#allocation20_spill] sm:$0xff]  ;;  %v4833_v21 = vld [vmem:[#allocation22_spill] sm:$0xff] }
 0x428   :  { %v1385_v20 = vmul.f32 %v2894_v34, %v3954_v26  ;;  %2897 = vtanh.f32 %v4243_v29  ;;  %v2764_v26 = vld [vmem:[%s4591_s0 + $0x28] sm:$0xff]   ;;  %v4834_v34 = vld [vmem:[#allocation23_spill] sm:$0xff] }
 0x429   :  { %2899 = vrcp.f32 %v1379_v32  ;;  %v4835_v32 = vld [vmem:[#allocation24_spill] sm:$0xff] }
 0x42a   :  { %v4246_v7 = vadd.f32 %v1387_v33, %v1385_v20  ;;  %v4836_v33 = vld [vmem:[#allocation25_spill] sm:$0xff]  ;;  %v4837_v20 = vld [vmem:[#allocation26_spill] sm:$0xff] }
 0x42c   :  { %2901 = vtanh.f32 %v4246_v7 }
 0x432   :  { %v2896_v16 = vpop.eup %2895 }
 0x435   :  { %v2898_v61 = vpop.eup %2897 }
 0x436   :  { %v2900_v17 = vpop.eup %2899  ;;  %v1392_v19 = vmul.f32 %v2898_v61, %v2896_v16  ;;  %v4838_v16 = vld [vmem:[#allocation27_spill] sm:$0xff]  ;;  %v4839_v61 = vld [vmem:[#allocation28_spill] sm:$0xff] }
 0x439   :  { %v2902_v14 = vpop.eup %2901 }
 0x43a   :  { %v1393_v28 = vmul.f32 %v2902_v14, %v2900_v17  ;;  %v4840_v17 = vld [vmem:[#allocation7_spill] sm:$0xff]  ;;  %v4841_v14 = vld [vmem:[#allocation8_spill] sm:$0xff] }
 0x43c   :  { %v1489_v30 = vpack.c.bf16 %v1393_v28, %v1392_v19  ;;  %v4842_v19 = vld [vmem:[#allocation29_spill] sm:$0xff]  ;;  %v4843_v28 = vld [vmem:[#allocation30_spill] sm:$0xff] }
 0x43e   :  { %1523 = vmatmul.mubr.bf16.vlgmr.msra.gmra.mxu0 %v1489_v30  ;;  %1566 = vmatmul.mubr.bf16.vlgmr.msra.gmra.mxu1 %v1489_v30  ;;  %v4844_v30 = vld [vmem:[#allocation31_spill] sm:$0xff] }
 0x43f   :  { %1642 = vmatpush1.bf16.msra.mxu0 %v3759_v42  ;;  %1685 = vmatpush1.bf16.msra.mxu1 %v3765_v45 }
 0x440   :  { %1643 = vmatprep.subr.bf16.mxu0 %v3771_v51  ;;  %1686 = vmatprep.subr.bf16.mxu1 %v3777_v62 }
 0x441   :  { %1673 = vmatprep.mubr.bf16.mxu0 %v4750_v63  ;;  %1716 = vmatprep.mubr.bf16.mxu1 %v4750_v63 }
 0x443   :  { %1644 = vmatpush1.bf16.msra.mxu0 %v3785_v59  ;;  %1687 = vmatpush1.bf16.msra.mxu1 %v3791_v38 }
 0x444   :  { %1645 = vmatprep.subr.bf16.mxu0 %v3797_v60  ;;  %1688 = vmatprep.subr.bf16.mxu1 %v3803_v39 }
 0x447   :  { %1646 = vmatpush1.bf16.msra.mxu0 %v3809_v40  ;;  %1689 = vmatpush1.bf16.msra.mxu1 %v3815_v52 }
 0x448   :  { %1647 = vmatprep.subr.bf16.mxu0 %v3821_v54  ;;  %1690 = vmatprep.subr.bf16.mxu1 %v3827_v43 }
 0x44b   :  { %1648 = vmatpush1.bf16.msra.mxu0 %v3833_v47  ;;  %1691 = vmatpush1.bf16.msra.mxu1 %v3839_v3 }
 0x44c   :  { %1649 = vmatprep.subr.bf16.mxu0 %v3845_v44  ;;  %1692 = vmatprep.subr.bf16.mxu1 %v3851_v2 }
 0x44f   :  { %1650 = vmatpush1.bf16.msra.mxu0 %v3857_v0  ;;  %1693 = vmatpush1.bf16.msra.mxu1 %v3863_v41 }
 0x450   :  { %1651 = vmatprep.subr.bf16.mxu0 %v3869_v50  ;;  %1694 = vmatprep.subr.bf16.mxu1 %v3875_v48 }
 0x453   :  { %1652 = vmatpush1.bf16.msra.mxu0 %v3881_v58  ;;  %1695 = vmatpush1.bf16.msra.mxu1 %v3984_v55 }
 0x454   :  { %1653 = vmatprep.subr.bf16.mxu0 %v3990_v36  ;;  %1696 = vmatprep.subr.bf16.mxu1 %v3996_v4 }
 0x457   :  { %1654 = vmatpush1.bf16.msra.mxu0 %v4002_v6  ;;  %1697 = vmatpush1.bf16.msra.mxu1 %v4008_v8 }
 0x458   :  { %1655 = vmatprep.subr.bf16.mxu0 %v4014_v9  ;;  %1698 = vmatprep.subr.bf16.mxu1 %v4020_v11 }
 0x45b   :  { %1656 = vmatpush1.bf16.msra.mxu0 %v4026_v12  ;;  %1699 = vmatpush1.bf16.msra.mxu1 %v4032_v13 }
 0x45c   :  { %1728 = vmatprep.subr.bf16.mxu0 %v4038_v5  ;;  %1771 = vmatprep.subr.bf16.mxu1 %v4044_v37 }
 0x45e   :  { %1674 = vmatmul.mubr.bf16.vlgmr.msra.gmra.mxu0 %v2764_v26  ;;  %1717 = vmatmul.mubr.bf16.vlgmr.msra.gmra.mxu1 %v2764_v26  ;;  %v4845_v26 = vld [vmem:[#allocation32_spill] sm:$0xff] }
 0x45f   :  { %1729 = vmatpush1.bf16.msra.mxu0 %v4053_v10  ;;  %1772 = vmatpush1.bf16.msra.mxu1 %v4822_v15 }
 0x460   :  { %1730 = vmatprep.subr.bf16.mxu0 %v4823_v18  ;;  %1773 = vmatprep.subr.bf16.mxu1 %v4824_v22 }
 0x461   :  { %1760 = vmatprep.mubr.bf16.mxu0 %v4750_v63  ;;  %1803 = vmatprep.mubr.bf16.mxu1 %v4750_v63 }
 0x463   :  { %1731 = vmatpush1.bf16.msra.mxu0 %v4825_v24  ;;  %1774 = vmatpush1.bf16.msra.mxu1 %v4826_v46 }
 0x464   :  { %1732 = vmatprep.subr.bf16.mxu0 %v4827_v31  ;;  %1775 = vmatprep.subr.bf16.mxu1 %v4828_v27 }
 0x467   :  { %1733 = vmatpush1.bf16.msra.mxu0 %v4829_v57  ;;  %1776 = vmatpush1.bf16.msra.mxu1 %v4830_v23 }
 0x468   :  { %1734 = vmatprep.subr.bf16.mxu0 %v4831_v56  ;;  %1777 = vmatprep.subr.bf16.mxu1 %v4832_v25 }
 0x46b   :  { %1735 = vmatpush1.bf16.msra.mxu0 %v4833_v21  ;;  %1778 = vmatpush1.bf16.msra.mxu1 %v4834_v34 }
 0x46c   :  { %1736 = vmatprep.subr.bf16.mxu0 %v4835_v32  ;;  %1779 = vmatprep.subr.bf16.mxu1 %v4836_v33  ;;  %v4846_v32 = vld [vmem:[#allocation33_spill] sm:$0xff]  ;;  %v4847_v33 = vld [vmem:[#allocation34_spill] sm:$0xff] }
 0x46f   :  { %1737 = vmatpush1.bf16.msra.mxu0 %v4837_v20  ;;  %1780 = vmatpush1.bf16.msra.mxu1 %v4838_v16  ;;  %v4848_v20 = vld [vmem:[#allocation35_spill] sm:$0xff]  ;;  %v4849_v16 = vld [vmem:[#allocation36_spill] sm:$0xff] }
 0x470   :  { %1738 = vmatprep.subr.bf16.mxu0 %v4839_v61  ;;  %1781 = vmatprep.subr.bf16.mxu1 %v4840_v17  ;;  %v4850_v61 = vld [vmem:[#allocation37_spill] sm:$0xff] }
 0x471   :  { %v4851_v17 = vld [vmem:[#allocation9_spill] sm:$0xff] }
 0x473   :  { %1739 = vmatpush1.bf16.msra.mxu0 %v4841_v14  ;;  %1782 = vmatpush1.bf16.msra.mxu1 %v4842_v19  ;;  %v4852_v14 = vld [vmem:[#allocation10_spill] sm:$0xff]  ;;  %v1437_v19 = vpop.f32.mrf.mxu0 }
 0x474   :  { %1740 = vmatprep.subr.bf16.mxu0 %v4843_v28  ;;  %1783 = vmatprep.subr.bf16.mxu1 %v4844_v30  ;;  %v1480_v28 = vpop.f32.mrf.mxu1 }
 0x475   :  { %v1439_v34 = vpop.f32.mrf.mxu0 }
 0x476   :  { %v1482_v30 = vpop.f32.mrf.mxu1 }
 0x477   :  { %1741 = vmatpush1.bf16.msra.mxu0 %v4845_v26  ;;  %1784 = vmatpush1.bf16.msra.mxu1 %v4846_v32  ;;  %v1441_v21 = vpop.f32.mrf.mxu0  ;;  %v1438_v32 = vadd.f32 %v1437_v19, %v3647_v35 }
 0x478   :  { %1742 = vmatprep.subr.bf16.mxu0 %v4847_v33  ;;  %1785 = vmatprep.subr.bf16.mxu1 %v4848_v20  ;;  %v1484_v26 = vpop.f32.mrf.mxu1  ;;  %v1440_v20 = vadd.f32 %v1439_v34, %v3649_v53 }
 0x479   :  { %v1443_v25 = vpop.f32.mrf.mxu0 }
 0x47a   :  { %v1486_v33 = vpop.f32.mrf.mxu1  ;;  %v1444_v31 = vadd.f32 %v1443_v25, %v3649_v53 }
 0x47b   :  { %1743 = vmatpush1.bf16.msra.mxu0 %v4849_v16  ;;  %1786 = vmatpush1.bf16.msra.mxu1 %v4850_v61 }
 0x47c   :  { %1879 = vmatprep.subr.bf16.mxu0 %v4851_v17  ;;  %1922 = vmatprep.subr.bf16.mxu1 %v4852_v14  ;;  %v1442_v17 = vadd.f32 %v1441_v21, %v3647_v35 }
 0x4fe   :  { %v1524_v56 = vpop.f32.mrf.mxu0  ;;  %v1567_v23 = vpop.f32.mrf.mxu1 }
 0x4ff   :  { %v1576_v16 = vadd.f32 %v1524_v56, %v1438_v32  ;;  %v1483_v32 = vadd.f32 %v1482_v30, %v3655_v1 }
 0x500   :  { %v1526_v61 = vpop.f32.mrf.mxu0  ;;  %v1569_v24 = vpop.f32.mrf.mxu1 }
 0x501   :  { %v2585_v57 = vmul.f32 -1.442695, %v1576_v16  ;;  %v1577_v14 = vadd.f32 %v1526_v61, %v1440_v20  ;;  %v1481_v20 = vadd.f32 %v1480_v28, %v3657_v49  ;;  %v1487_v16 = vadd.f32 %v1486_v33, %v3655_v1 }
 0x502   :  { %v1528_v27 = vpop.f32.mrf.mxu0  ;;  %v1571_v34 = vpop.f32.mrf.mxu1  ;;  %v1579_v25 = vadd.f32 %v1569_v24, %v1483_v32 }
 0x503   :  { %2903 = vpow2.f32 %v2585_v57  ;;  %v2587_v46 = vmul.f32 -1.442695, %v1577_v14  ;;  %v1580_v22 = vadd.f32 %v1528_v27, %v1442_v17  ;;  %v1578_v57 = vadd.f32 %v1567_v23, %v1481_v20 }
 0x504   :  { %v1530_v18 = vpop.f32.mrf.mxu0  ;;  %v1573_v21 = vpop.f32.mrf.mxu1  ;;  %v2589_v27 = vmul.f32 -1.442695, %v1579_v25 }
 0x505   :  { %2905 = vpow2.f32 %v2587_v46  ;;  %v2586_v19 = vmul.f32 -1.442695, %v1580_v22  ;;  %v1581_v15 = vadd.f32 %v1530_v18, %v1444_v31  ;;  %v1583_v61 = vadd.f32 %v1573_v21, %v1487_v16 }
 0x506   :  { %v1485_v18 = vadd.f32 %v1484_v26, %v3657_v49 }
 0x507   :  { %2907 = vpow2.f32 %v2586_v19  ;;  %v2588_v56 = vmul.f32 -1.442695, %v1581_v15  ;;  %v2590_v22 = vmul.f32 -1.442695, %v1583_v61 }
 0x508   :  { %v1582_v30 = vadd.f32 %v1571_v34, %v1485_v18 }
 0x509   :  { %2909 = vpow2.f32 %v2588_v56 }
 0x50a   :  { %2911 = vtanh.f32 %v1578_v57 }
 0x510   :  { %v2904_v14 = vpop.eup %2903 }
 0x511   :  { %v1590_v17 = vadd.f32 1.0, %v2904_v14 }
 0x512   :  { %v2906_v46 = vpop.eup %2905 }
 0x513   :  { %2913 = vrcp.f32 %v1590_v17  ;;  %v1602_v15 = vadd.f32 1.0, %v2906_v46 }
 0x514   :  { %v2908_v31 = vpop.eup %2907  ;;  %2915 = vpow2.f32 %v2589_v27 }
 0x515   :  { %2917 = vrcp.f32 %v1602_v15  ;;  %v1591_v28 = vadd.f32 1.0, %v2908_v31 }
 0x516   :  { %v2910_v19 = vpop.eup %2909  ;;  %2919 = vpow2.f32 %v2590_v22 }
 0x517   :  { %2921 = vrcp.f32 %v1591_v28  ;;  %v1603_v24 = vadd.f32 1.0, %v2910_v19  ;;  %v2912_v23 = vpop.eup %2911  ;;  %v4874_v19 = vld [vmem:[#allocation30_spill] sm:$0xff] }
 0x518   :  { %2923 = vtanh.f32 %v1582_v30 }
 0x519   :  { %2925 = vrcp.f32 %v1603_v24  ;;  %v4875_v24 = vld [vmem:[#allocation31_spill] sm:$0xff] }
 0x520   :  { %v2914_v33 = vpop.eup %2913 }
 0x521   :  { %v2916_v56 = vpop.eup %2915  ;;  %v1624_v21 = vmul.f32 %v2914_v33, %v2912_v23  ;;  %v4876_v23 = vld [vmem:[#allocation32_spill] sm:$0xff]  ;;  %v4877_v33 = vld [vmem:[#allocation33_spill] sm:$0xff] }
 0x522   :  { %v2918_v32 = vpop.eup %2917  ;;  %v1616_v25 = vadd.f32 1.0, %v2916_v56  ;;  %v4878_v56 = vld [vmem:[#allocation34_spill] sm:$0xff] }
 0x523   :  { %v2920_v26 = vpop.eup %2919  ;;  %v1622_v20 = vmul.f32 %v2918_v32, %v4243_v29  ;;  %v4879_v32 = vld [vmem:[#allocation35_spill] sm:$0xff] }
 0x524   :  { %v2922_v16 = vpop.eup %2921  ;;  %v1617_v14 = vadd.f32 1.0, %v2920_v26  ;;  %2927 = vrcp.f32 %v1616_v25  ;;  %v4880_v26 = vld [vmem:[#allocation36_spill] sm:$0xff]  ;;  %v1675_v25 = vpop.f32.mrf.mxu0 }
 0x525   :  { %v2924_v57 = vpop.eup %2923  ;;  %v4330_v34 = vadd.f32 %v1624_v21, %v1622_v20  ;;  %v4881_v21 = vld [vmem:[#allocation37_spill] sm:$0xff] }
 0x526   :  { %v2926_v61 = vpop.eup %2925  ;;  %v1625_v27 = vmul.f32 %v2924_v57, %v2922_v16  ;;  %v4882_v20 = vld [vmem:[#allocation9_spill] sm:$0xff]  ;;  %v4883_v16 = vld [vmem:[#allocation10_spill] sm:$0xff]  ;;  %v1718_v57 = vpop.f32.mrf.mxu1 }
 0x527   :  { %v1623_v17 = vmul.f32 %v2926_v61, %v4246_v7  ;;  %2929 = vtanh.f32 %v4330_v34  ;;  %v4873_v7 = vld [vmem:[#allocation29_spill] sm:$0xff]  ;;  %v1677_v61 = vpop.f32.mrf.mxu0 }
 0x528   :  { %2931 = vrcp.f32 %v1617_v14  ;;  %v1720_v14 = vpop.f32.mrf.mxu1 }
 0x529   :  { %v4333_v46 = vadd.f32 %v1625_v27, %v1623_v17  ;;  %v1679_v27 = vpop.f32.mrf.mxu0 }
 0x52a   :  { %v1722_v17 = vpop.f32.mrf.mxu1 }
 0x52b   :  { %2933 = vtanh.f32 %v4333_v46 }
 0x531   :  { %v2928_v18 = vpop.eup %2927 }
 0x534   :  { %v2930_v29 = vpop.eup %2929 }
 0x535   :  { %v2932_v22 = vpop.eup %2931  ;;  %v1630_v31 = vmul.f32 %v2930_v29, %v2928_v18  ;;  %v1681_v18 = vpop.f32.mrf.mxu0  ;;  %v1676_v29 = vadd.f32 %v1675_v25, %v3647_v35 }
 0x538   :  { %v2934_v15 = vpop.eup %2933 }
 0x539   :  { %v1631_v30 = vmul.f32 %v2934_v15, %v2932_v22  ;;  %v1724_v22 = vpop.f32.mrf.mxu1 }
 0x53b   :  { %v1727_v28 = vpack.c.bf16 %v1631_v30, %v1630_v31  ;;  %v1678_v31 = vadd.f32 %v1677_v61, %v3649_v53 }
 0x53d   :  { %1761 = vmatmul.mubr.bf16.vlgmr.msra.gmra.mxu0 %v1727_v28  ;;  %1804 = vmatmul.mubr.bf16.vlgmr.msra.gmra.mxu1 %v1727_v28 }
 0x53e   :  { %1880 = vmatpush1.bf16.msra.mxu0 %v3759_v42  ;;  %1923 = vmatpush1.bf16.msra.mxu1 %v3765_v45  ;;  %v2765_v42 = vld [vmem:[%s4591_s0 + $0x30] sm:$0xff]  }
 0x53f   :  { %1881 = vmatprep.subr.bf16.mxu0 %v3771_v51  ;;  %1924 = vmatprep.subr.bf16.mxu1 %v3777_v62  ;;  %v4853_v45 = vld [vmem:[#allocation11_spill] sm:$0xff]  ;;  %v4854_v51 = vld [vmem:[#allocation12_spill] sm:$0xff]  ;;  %v4855_v62 = vld [vmem:[#allocation13_spill] sm:$0xff] }
 0x540   :  { %1911 = vmatprep.mubr.bf16.mxu0 %v4750_v63  ;;  %1954 = vmatprep.mubr.bf16.mxu1 %v4750_v63 }
 0x542   :  { %1882 = vmatpush1.bf16.msra.mxu0 %v3785_v59  ;;  %1925 = vmatpush1.bf16.msra.mxu1 %v3791_v38  ;;  %v4856_v59 = vld [vmem:[#allocation14_spill] sm:$0xff]  ;;  %v4857_v38 = vld [vmem:[#allocation15_spill] sm:$0xff] }
 0x543   :  { %1883 = vmatprep.subr.bf16.mxu0 %v3797_v60  ;;  %1926 = vmatprep.subr.bf16.mxu1 %v3803_v39  ;;  %v4858_v60 = vld [vmem:[#allocation16_spill] sm:$0xff]  ;;  %v4859_v39 = vld [vmem:[#allocation17_spill] sm:$0xff] }
 0x546   :  { %1884 = vmatpush1.bf16.msra.mxu0 %v3809_v40  ;;  %1927 = vmatpush1.bf16.msra.mxu1 %v3815_v52  ;;  %v4860_v40 = vld [vmem:[#allocation18_spill] sm:$0xff]  ;;  %v4861_v52 = vld [vmem:[#allocation19_spill] sm:$0xff] }
 0x547   :  { %1885 = vmatprep.subr.bf16.mxu0 %v3821_v54  ;;  %1928 = vmatprep.subr.bf16.mxu1 %v3827_v43  ;;  %v4862_v54 = vld [vmem:[#allocation20_spill] sm:$0xff]  ;;  %v4863_v43 = vld [vmem:[#allocation21_spill] sm:$0xff] }
 0x54a   :  { %1886 = vmatpush1.bf16.msra.mxu0 %v3833_v47  ;;  %1929 = vmatpush1.bf16.msra.mxu1 %v3839_v3  ;;  %v4864_v47 = vld [vmem:[#allocation22_spill] sm:$0xff]  ;;  %v4865_v3 = vld [vmem:[#allocation23_spill] sm:$0xff] }
 0x54b   :  { %1887 = vmatprep.subr.bf16.mxu0 %v3845_v44  ;;  %1930 = vmatprep.subr.bf16.mxu1 %v3851_v2  ;;  %v4866_v44 = vld [vmem:[#allocation24_spill] sm:$0xff]  ;;  %v4867_v2 = vld [vmem:[#allocation25_spill] sm:$0xff] }
 0x54e   :  { %1888 = vmatpush1.bf16.msra.mxu0 %v3857_v0  ;;  %1931 = vmatpush1.bf16.msra.mxu1 %v3863_v41  ;;  %v4868_v0 = vld [vmem:[#allocation26_spill] sm:$0xff]  ;;  %v4869_v41 = vld [vmem:[#allocation27_spill] sm:$0xff] }
 0x54f   :  { %1889 = vmatprep.subr.bf16.mxu0 %v3869_v50  ;;  %1932 = vmatprep.subr.bf16.mxu1 %v3875_v48  ;;  %v4870_v50 = vld [vmem:[#allocation28_spill] sm:$0xff]  ;;  %v4871_v48 = vld [vmem:[#allocation7_spill] sm:$0xff] }
 0x552   :  { %1890 = vmatpush1.bf16.msra.mxu0 %v3881_v58  ;;  %1933 = vmatpush1.bf16.msra.mxu1 %v3984_v55  ;;  %v4872_v58 = vld [vmem:[#allocation8_spill] sm:$0xff] }
 0x553   :  { %1891 = vmatprep.subr.bf16.mxu0 %v3990_v36  ;;  %1934 = vmatprep.subr.bf16.mxu1 %v3996_v4 }
 0x556   :  { %1892 = vmatpush1.bf16.msra.mxu0 %v4002_v6  ;;  %1935 = vmatpush1.bf16.msra.mxu1 %v4008_v8 }
 0x557   :  { %1893 = vmatprep.subr.bf16.mxu0 %v4014_v9  ;;  %1936 = vmatprep.subr.bf16.mxu1 %v4020_v11 }
 0x55a   :  { %1894 = vmatpush1.bf16.msra.mxu0 %v4026_v12  ;;  %1937 = vmatpush1.bf16.msra.mxu1 %v4032_v13 }
 0x55b   :  { %1966 = vmatprep.subr.bf16.mxu0 %v4038_v5  ;;  %2009 = vmatprep.subr.bf16.mxu1 %v4044_v37 }
 0x55d   :  { %1912 = vmatmul.mubr.bf16.vlgmr.msra.gmra.mxu0 %v2765_v42  ;;  %1955 = vmatmul.mubr.bf16.vlgmr.msra.gmra.mxu1 %v2765_v42 }
 0x55e   :  { %1967 = vmatpush1.bf16.msra.mxu0 %v4053_v10  ;;  %2010 = vmatpush1.bf16.msra.mxu1 %v4853_v45 }
 0x55f   :  { %1968 = vmatprep.subr.bf16.mxu0 %v4854_v51  ;;  %2011 = vmatprep.subr.bf16.mxu1 %v4855_v62 }
 0x560   :  { %1998 = vmatprep.mubr.bf16.mxu0 %v4750_v63  ;;  %2041 = vmatprep.mubr.bf16.mxu1 %v4750_v63 }
 0x562   :  { %1969 = vmatpush1.bf16.msra.mxu0 %v4856_v59  ;;  %2012 = vmatpush1.bf16.msra.mxu1 %v4857_v38 }
 0x563   :  { %1970 = vmatprep.subr.bf16.mxu0 %v4858_v60  ;;  %2013 = vmatprep.subr.bf16.mxu1 %v4859_v39 }
 0x566   :  { %1971 = vmatpush1.bf16.msra.mxu0 %v4860_v40  ;;  %2014 = vmatpush1.bf16.msra.mxu1 %v4861_v52 }
 0x567   :  { %1972 = vmatprep.subr.bf16.mxu0 %v4862_v54  ;;  %2015 = vmatprep.subr.bf16.mxu1 %v4863_v43 }
 0x56a   :  { %1973 = vmatpush1.bf16.msra.mxu0 %v4864_v47  ;;  %2016 = vmatpush1.bf16.msra.mxu1 %v4865_v3 }
 0x56b   :  { %1974 = vmatprep.subr.bf16.mxu0 %v4866_v44  ;;  %2017 = vmatprep.subr.bf16.mxu1 %v4867_v2 }
 0x56e   :  { %1975 = vmatpush1.bf16.msra.mxu0 %v4868_v0  ;;  %2018 = vmatpush1.bf16.msra.mxu1 %v4869_v41 }
 0x56f   :  { %1976 = vmatprep.subr.bf16.mxu0 %v4870_v50  ;;  %2019 = vmatprep.subr.bf16.mxu1 %v4871_v48 }
 0x572   :  { %1977 = vmatpush1.bf16.msra.mxu0 %v4872_v58  ;;  %2020 = vmatpush1.bf16.msra.mxu1 %v4873_v7 }
 0x573   :  { %1978 = vmatprep.subr.bf16.mxu0 %v4874_v19  ;;  %2021 = vmatprep.subr.bf16.mxu1 %v4875_v24 }
 0x576   :  { %1979 = vmatpush1.bf16.msra.mxu0 %v4876_v23  ;;  %2022 = vmatpush1.bf16.msra.mxu1 %v4877_v33 }
 0x577   :  { %1980 = vmatprep.subr.bf16.mxu0 %v4878_v56  ;;  %2023 = vmatprep.subr.bf16.mxu1 %v4879_v32  ;;  %v1682_v32 = vadd.f32 %v1681_v18, %v3649_v53 }
 0x57a   :  { %1981 = vmatpush1.bf16.msra.mxu0 %v4880_v26  ;;  %2024 = vmatpush1.bf16.msra.mxu1 %v4881_v21 }
 0x57b   :  { %2117 = vmatprep.subr.bf16.mxu0 %v4882_v20  ;;  %2160 = vmatprep.subr.bf16.mxu1 %v4883_v16  ;;  %v1680_v20 = vadd.f32 %v1679_v27, %v3647_v35 }
 0x5fd   :  { %v1762_v15 = vpop.f32.mrf.mxu0  ;;  %v1805_v28 = vpop.f32.mrf.mxu1 }
 0x5fe   :  { %v1814_v30 = vadd.f32 %v1762_v15, %v1676_v29  ;;  %v1721_v15 = vadd.f32 %v1720_v14, %v3655_v1 }
 0x5ff   :  { %v1764_v42 = vpop.f32.mrf.mxu0  ;;  %v1807_v33 = vpop.f32.mrf.mxu1 }
 0x600   :  { %v2594_v21 = vmul.f32 -1.442695, %v1814_v30  ;;  %v1815_v16 = vadd.f32 %v1764_v42, %v1678_v31  ;;  %v1719_v31 = vadd.f32 %v1718_v57, %v3657_v49  ;;  %v1725_v30 = vadd.f32 %v1724_v22, %v3655_v1 }
 0x601   :  { %v1766_v26 = vpop.f32.mrf.mxu0  ;;  %v1809_v61 = vpop.f32.mrf.mxu1  ;;  %v1817_v18 = vadd.f32 %v1807_v33, %v1721_v15 }
 0x602   :  { %2935 = vpow2.f32 %v2594_v21  ;;  %v2596_v56 = vmul.f32 -1.442695, %v1815_v16  ;;  %v1818_v23 = vadd.f32 %v1766_v26, %v1680_v20  ;;  %v1816_v21 = vadd.f32 %v1805_v28, %v1719_v31 }
 0x603   :  { %v1768_v24 = vpop.f32.mrf.mxu0  ;;  %v1811_v27 = vpop.f32.mrf.mxu1  ;;  %v2598_v26 = vmul.f32 -1.442695, %v1817_v18 }
 0x604   :  { %2937 = vpow2.f32 %v2596_v56  ;;  %v2595_v25 = vmul.f32 -1.442695, %v1818_v23  ;;  %v1819_v19 = vadd.f32 %v1768_v24, %v1682_v32  ;;  %v1821_v42 = vadd.f32 %v1811_v27, %v1725_v30 }
 0x605   :  { %v1723_v24 = vadd.f32 %v1722_v17, %v3657_v49 }
 0x606   :  { %2939 = vpow2.f32 %v2595_v25  ;;  %v2597_v29 = vmul.f32 -1.442695, %v1819_v19  ;;  %v2599_v23 = vmul.f32 -1.442695, %v1821_v42 }
 0x607   :  { %v1820_v14 = vadd.f32 %v1809_v61, %v1723_v24 }
 0x608   :  { %2941 = vpow2.f32 %v2597_v29 }
 0x609   :  { %2943 = vtanh.f32 %v1816_v21 }
 0x60f   :  { %v2936_v16 = vpop.eup %2935 }
 0x610   :  { %v1828_v20 = vadd.f32 1.0, %v2936_v16 }
 0x611   :  { %v2938_v56 = vpop.eup %2937 }
 0x612   :  { %2945 = vrcp.f32 %v1828_v20  ;;  %v1840_v19 = vadd.f32 1.0, %v2938_v56 }
 0x613   :  { %v2940_v32 = vpop.eup %2939  ;;  %2947 = vpow2.f32 %v2598_v26 }
 0x614   :  { %2949 = vrcp.f32 %v1840_v19  ;;  %v1829_v57 = vadd.f32 1.0, %v2940_v32 }
 0x615   :  { %v2942_v25 = vpop.eup %2941  ;;  %2951 = vpow2.f32 %v2599_v23 }
 0x616   :  { %2953 = vrcp.f32 %v1829_v57  ;;  %v1841_v33 = vadd.f32 1.0, %v2942_v25  ;;  %v2944_v22 = vpop.eup %2943  ;;  %v3096_v25 = vld [vmem:[%s4592_s1 + $0xe8] ss:$16 sps:$4 sm:$0xff]  }
 0x617   :  { %2955 = vtanh.f32 %v1820_v14 }
 0x618   :  { %2957 = vrcp.f32 %v1841_v33  ;;  %v3097_v33 = vld [vmem:[%s4592_s1 + $0xc4] ss:$16 sps:$4 sm:$0xff]  }
 0x61f   :  { %v2946_v28 = vpop.eup %2945 }
 0x620   :  { %v2948_v29 = vpop.eup %2947  ;;  %v1862_v27 = vmul.f32 %v2946_v28, %v2944_v22  ;;  %v3098_v22 = vld [vmem:[%s4592_s1 + $0xcc] ss:$16 sps:$4 sm:$0xff]   ;;  %v3099_v28 = vld [vmem:[%s4592_s1 + $0xc0] ss:$16 sps:$4 sm:$0xff]  }
 0x621   :  { %v2950_v15 = vpop.eup %2949  ;;  %v1854_v18 = vadd.f32 1.0, %v2948_v29  ;;  %v3100_v29 = vld [vmem:[%s4592_s1 + $0xc8] ss:$16 sps:$4 sm:$0xff]  }
 0x622   :  { %v2952_v17 = vpop.eup %2951  ;;  %v1860_v31 = vmul.f32 %v2950_v15, %v4330_v34  ;;  %v3101_v15 = vld [vmem:[%s4592_s1 + $0xa4] ss:$16 sps:$4 sm:$0xff]  }
 0x623   :  { %v2954_v30 = vpop.eup %2953  ;;  %v1855_v16 = vadd.f32 1.0, %v2952_v17  ;;  %2959 = vrcp.f32 %v1854_v18  ;;  %v3102_v17 = vld [vmem:[%s4592_s1 + $0xac] ss:$16 sps:$4 sm:$0xff]  }
 0x624   :  { %v2956_v21 = vpop.eup %2955  ;;  %v4417_v61 = vadd.f32 %v1862_v27, %v1860_v31  ;;  %v3103_v27 = vld [vmem:[%s4592_s1 + $0xa0] ss:$16 sps:$4 sm:$0xff]   ;;  %v3104_v31 = vld [vmem:[%s4592_s1 + $0xa8] ss:$16 sps:$4 sm:$0xff]   ;;  %v3106_v18 = vld [vmem:[%s4592_s1 + $0x8c] ss:$16 sps:$4 sm:$0xff]  }
 0x625   :  { %v2958_v42 = vpop.eup %2957  ;;  %v1863_v26 = vmul.f32 %v2956_v21, %v2954_v30  ;;  %v3105_v30 = vld [vmem:[%s4592_s1 + $0x84] ss:$16 sps:$4 sm:$0xff]   ;;  %v3107_v21 = vld [vmem:[%s4592_s1 + $0x80] ss:$16 sps:$4 sm:$0xff]  }
 0x626   :  { %v1861_v20 = vmul.f32 %v2958_v42, %v4333_v46  ;;  %2961 = vtanh.f32 %v4417_v61  ;;  %v3095_v46 = vld [vmem:[%s4592_s1 + $0xe0] ss:$16 sps:$4 sm:$0xff]   ;;  %v3108_v42 = vld [vmem:[%s4592_s1 + $0x88] ss:$16 sps:$4 sm:$0xff]  }
 0x627   :  { %2963 = vrcp.f32 %v1855_v16  ;;  %v3109_v16 = vld [vmem:[%s4592_s1 + $0x64] ss:$16 sps:$4 sm:$0xff]  }
 0x628   :  { %v4420_v56 = vadd.f32 %v1863_v26, %v1861_v20  ;;  %v3110_v26 = vld [vmem:[%s4592_s1 + $0x6c] ss:$16 sps:$4 sm:$0xff]   ;;  %v3111_v20 = vld [vmem:[%s4592_s1 + $0x60] ss:$16 sps:$4 sm:$0xff]  }
 0x62a   :  { %2965 = vtanh.f32 %v4420_v56 }
 0x630   :  { %v2960_v24 = vpop.eup %2959 }
 0x633   :  { %v2962_v34 = vpop.eup %2961 }
 0x634   :  { %v2964_v23 = vpop.eup %2963  ;;  %v1868_v32 = vmul.f32 %v2962_v34, %v2960_v24  ;;  %v3112_v24 = vld [vmem:[%s4592_s1 + $0x68] ss:$16 sps:$4 sm:$0xff]   ;;  %v3113_v34 = vld [vmem:[%s4592_s1 + $0x44] ss:$16 sps:$4 sm:$0xff]  }
 0x637   :  { %v2966_v19 = vpop.eup %2965 }
 0x638   :  { %v1869_v14 = vmul.f32 %v2966_v19, %v2964_v23  ;;  %v3114_v23 = vld [vmem:[%s4592_s1 + $0x4c] ss:$16 sps:$4 sm:$0xff]   ;;  %v3115_v19 = vld [vmem:[%s4592_s1 + $0x40] ss:$16 sps:$4 sm:$0xff]  }
 0x63a   :  { %v1965_v57 = vpack.c.bf16 %v1869_v14, %v1868_v32 }
 0x63c   :  { %1999 = vmatmul.mubr.bf16.vlgmr.msra.gmra.mxu0 %v1965_v57  ;;  %2042 = vmatmul.mubr.bf16.vlgmr.msra.gmra.mxu1 %v1965_v57 }
 0x63d   :  { %2118 = vmatpush1.bf16.msra.mxu0 %v3095_v46  ;;  %2161 = vmatpush1.bf16.msra.mxu1 %v3096_v25 }
 0x63e   :  { %2119 = vmatprep.subr.bf16.mxu0 %v3097_v33  ;;  %2162 = vmatprep.subr.bf16.mxu1 %v3098_v22 }
 0x63f   :  { %2149 = vmatprep.mubr.bf16.mxu0 %v4750_v63  ;;  %2192 = vmatprep.mubr.bf16.mxu1 %v4750_v63 }
 0x641   :  { %2120 = vmatpush1.bf16.msra.mxu0 %v3099_v28  ;;  %2163 = vmatpush1.bf16.msra.mxu1 %v3100_v29 }
 0x642   :  { %2121 = vmatprep.subr.bf16.mxu0 %v3101_v15  ;;  %2164 = vmatprep.subr.bf16.mxu1 %v3102_v17 }
 0x645   :  { %2122 = vmatpush1.bf16.msra.mxu0 %v3103_v27  ;;  %2165 = vmatpush1.bf16.msra.mxu1 %v3104_v31 }
 0x646   :  { %2123 = vmatprep.subr.bf16.mxu0 %v3105_v30  ;;  %2166 = vmatprep.subr.bf16.mxu1 %v3106_v18 }
 0x649   :  { %2124 = vmatpush1.bf16.msra.mxu0 %v3107_v21  ;;  %2167 = vmatpush1.bf16.msra.mxu1 %v3108_v42 }
 0x64a   :  { %2125 = vmatprep.subr.bf16.mxu0 %v3109_v16  ;;  %2168 = vmatprep.subr.bf16.mxu1 %v3110_v26 }
 0x64d   :  { %2126 = vmatpush1.bf16.msra.mxu0 %v3111_v20  ;;  %2169 = vmatpush1.bf16.msra.mxu1 %v3112_v24 }
 0x64e   :  { %2127 = vmatprep.subr.bf16.mxu0 %v3113_v34  ;;  %2170 = vmatprep.subr.bf16.mxu1 %v3114_v23 }
 0x651   :  { %2128 = vmatpush1.bf16.msra.mxu0 %v3115_v19  ;;  %2171 = vmatpush1.bf16.msra.mxu1 %v3984_v55  ;;  %v2766_v55 = vld [vmem:[%s4591_s0 + $0x38] sm:$0xff]  }
 0x652   :  { %2129 = vmatprep.subr.bf16.mxu0 %v3990_v36  ;;  %2172 = vmatprep.subr.bf16.mxu1 %v3996_v4  ;;  %v4885_v36 = vld [vmem:[#allocation31_spill] sm:$0xff]  ;;  %v4886_v4 = vld [vmem:[#allocation32_spill] sm:$0xff] }
 0x655   :  { %2130 = vmatpush1.bf16.msra.mxu0 %v4002_v6  ;;  %2173 = vmatpush1.bf16.msra.mxu1 %v4008_v8  ;;  %v4887_v6 = vld [vmem:[#allocation33_spill] sm:$0xff]  ;;  %v4888_v8 = vld [vmem:[#allocation34_spill] sm:$0xff] }
 0x656   :  { %2131 = vmatprep.subr.bf16.mxu0 %v4014_v9  ;;  %2174 = vmatprep.subr.bf16.mxu1 %v4020_v11  ;;  %v4889_v9 = vld [vmem:[#allocation35_spill] sm:$0xff]  ;;  %v4890_v11 = vld [vmem:[#allocation36_spill] sm:$0xff] }
 0x659   :  { %2132 = vmatpush1.bf16.msra.mxu0 %v4026_v12  ;;  %2175 = vmatpush1.bf16.msra.mxu1 %v4032_v13  ;;  %v4891_v12 = vld [vmem:[#allocation37_spill] sm:$0xff]  ;;  %v1913_v13 = vpop.f32.mrf.mxu0 }
 0x65a   :  { %2204 = vmatprep.subr.bf16.mxu0 %v4038_v5  ;;  %2247 = vmatprep.subr.bf16.mxu1 %v4044_v37  ;;  %v1956_v5 = vpop.f32.mrf.mxu1 }
 0x65b   :  { %v1915_v37 = vpop.f32.mrf.mxu0  ;;  %v1957_v25 = vadd.f32 %v1956_v5, %v3657_v49 }
 0x65c   :  { %2150 = vmatmul.mubr.bf16.vlgmr.msra.gmra.mxu0 %v2766_v55  ;;  %2193 = vmatmul.mubr.bf16.vlgmr.msra.gmra.mxu1 %v2766_v55 }
 0x65d   :  { %2205 = vmatpush1.bf16.msra.mxu0 %v4053_v10  ;;  %2248 = vmatpush1.bf16.msra.mxu1 %v4853_v45  ;;  %v1958_v10 = vpop.f32.mrf.mxu1  ;;  %v1917_v45 = vpop.f32.mrf.mxu0 }
 0x65e   :  { %2206 = vmatprep.subr.bf16.mxu0 %v4854_v51  ;;  %2249 = vmatprep.subr.bf16.mxu1 %v4855_v62  ;;  %v1959_v57 = vadd.f32 %v1958_v10, %v3655_v1 }
 0x65f   :  { %2236 = vmatprep.mubr.bf16.mxu0 %v4750_v63  ;;  %2279 = vmatprep.mubr.bf16.mxu1 %v4750_v63  ;;  %v4884_v63 = vld [vmem:[#allocation30_spill] sm:$0xff]  ;;  %v1960_v51 = vpop.f32.mrf.mxu1  ;;  %v1919_v62 = vpop.f32.mrf.mxu0 }
 0x660   :  { %v1961_v30 = vadd.f32 %v1960_v51, %v3657_v49 }
 0x661   :  { %2207 = vmatpush1.bf16.msra.mxu0 %v4856_v59  ;;  %2250 = vmatpush1.bf16.msra.mxu1 %v4857_v38  ;;  %v1914_v59 = vadd.f32 %v1913_v13, %v3647_v35  ;;  %v1962_v38 = vpop.f32.mrf.mxu1 }
 0x662   :  { %2208 = vmatprep.subr.bf16.mxu0 %v4858_v60  ;;  %2251 = vmatprep.subr.bf16.mxu1 %v4859_v39  ;;  %v1916_v39 = vadd.f32 %v1915_v37, %v3649_v53  ;;  %v1963_v33 = vadd.f32 %v1962_v38, %v3655_v1 }
 0x665   :  { %2209 = vmatpush1.bf16.msra.mxu0 %v4860_v40  ;;  %2252 = vmatpush1.bf16.msra.mxu1 %v4861_v52 }
 0x666   :  { %2210 = vmatprep.subr.bf16.mxu0 %v4862_v54  ;;  %2253 = vmatprep.subr.bf16.mxu1 %v4863_v43  ;;  %v1918_v43 = vadd.f32 %v1917_v45, %v3647_v35 }
 0x669   :  { %2211 = vmatpush1.bf16.msra.mxu0 %v4864_v47  ;;  %2254 = vmatpush1.bf16.msra.mxu1 %v4865_v3 }
 0x66a   :  { %2212 = vmatprep.subr.bf16.mxu0 %v4866_v44  ;;  %2255 = vmatprep.subr.bf16.mxu1 %v4867_v2  ;;  %v1920_v2 = vadd.f32 %v1919_v62, %v3649_v53 }
 0x66d   :  { %2213 = vmatpush1.bf16.msra.mxu0 %v4868_v0  ;;  %2256 = vmatpush1.bf16.msra.mxu1 %v4869_v41 }
 0x66e   :  { %2214 = vmatprep.subr.bf16.mxu0 %v4870_v50  ;;  %2257 = vmatprep.subr.bf16.mxu1 %v4871_v48 }
 0x671   :  { %2215 = vmatpush1.bf16.msra.mxu0 %v4872_v58  ;;  %2258 = vmatpush1.bf16.msra.mxu1 %v4873_v7 }
 0x672   :  { %2216 = vmatprep.subr.bf16.mxu0 %v4884_v63  ;;  %2259 = vmatprep.subr.bf16.mxu1 %v4885_v36 }
 0x675   :  { %2217 = vmatpush1.bf16.msra.mxu0 %v4886_v4  ;;  %2260 = vmatpush1.bf16.msra.mxu1 %v4887_v6 }
 0x676   :  { %2218 = vmatprep.subr.bf16.mxu0 %v4888_v8  ;;  %2261 = vmatprep.subr.bf16.mxu1 %v4889_v9 }
 0x679   :  { %2219 = vmatpush1.bf16.msra.mxu0 %v4890_v11  ;;  %2262 = vmatpush1.bf16.msra.mxu1 %v4891_v12 }
 0x6fc   :  { %v2000_v60 = vpop.f32.mrf.mxu0  ;;  %v2043_v52 = vpop.f32.mrf.mxu1 }
 0x6fd   :  { %v2052_v40 = vadd.f32 %v2000_v60, %v1914_v59  ;;  %v2054_v28 = vadd.f32 %v2043_v52, %v1957_v25  ;;  %v2769_v52 = vld [vmem:[%s4595_s4 + $0x28] sm:$0xff]  }
 0x6fe   :  { %v2002_v54 = vpop.f32.mrf.mxu0  ;;  %v2045_v41 = vpop.f32.mrf.mxu1 }
 0x6ff   :  { %v2603_v47 = vmul.f32 -1.442695, %v2052_v40  ;;  %v2053_v3 = vadd.f32 %v2002_v54, %v1916_v39  ;;  %v2055_v22 = vadd.f32 %v2045_v41, %v1959_v57  ;;  %v3140_v39 = vmov 0.0   ;;  %v2768_v40 = vld [vmem:[%s4595_s4 + $0x30] sm:$0xff]   ;;  %v2770_v54 = vld [vmem:[%s4595_s4 + $0x20] sm:$0xff]  }
 0x700   :  { %v2004_v44 = vpop.f32.mrf.mxu0  ;;  %v2047_v32 = vpop.f32.mrf.mxu1  ;;  %2636 = vmatprep.subr.bf16.mxu0 %v3140_v39 }
 0x701   :  { %2967 = vpow2.f32 %v2603_v47  ;;  %v2605_v0 = vmul.f32 -1.442695, %v2053_v3  ;;  %v2056_v50 = vadd.f32 %v2004_v44, %v1918_v43  ;;  %v2607_v17 = vmul.f32 -1.442695, %v2055_v22  ;;  %v2771_v43 = vld [vmem:[%s4595_s4 + $0x18] sm:$0xff]   ;;  %v2772_v47 = vld [vmem:[%s4595_s4 + $0x10] sm:$0xff]  }
 0x702   :  { %v2006_v48 = vpop.f32.mrf.mxu0  ;;  %v2049_v46 = vpop.f32.mrf.mxu1  ;;  %v2058_v16 = vadd.f32 %v2047_v32, %v1961_v30  ;;  %v2773_v3 = vld [vmem:[%s4595_s4 + $0x8] sm:$0xff]   ;;  %v2774_v44 = vld [vmem:[%s4595_s4] sm:$0xff]  }
 0x703   :  { %2969 = vpow2.f32 %v2605_v0  ;;  %v2604_v58 = vmul.f32 -1.442695, %v2056_v50  ;;  %v2057_v7 = vadd.f32 %v2006_v48, %v1920_v2  ;;  %v2059_v29 = vadd.f32 %v2049_v46, %v1963_v33 }
 0x705   :  { %2971 = vpow2.f32 %v2604_v58  ;;  %v2606_v14 = vmul.f32 -1.442695, %v2057_v7  ;;  %v2608_v18 = vmul.f32 -1.442695, %v2059_v29 }
 0x707   :  { %2973 = vpow2.f32 %v2606_v14 }
 0x708   :  { %2975 = vtanh.f32 %v2054_v28 }
 0x70e   :  { %v2968_v15 = vpop.eup %2967 }
 0x70f   :  { %v2066_v27 = vadd.f32 1.0, %v2968_v15 }
 0x710   :  { %v2970_v31 = vpop.eup %2969 }
 0x711   :  { %2977 = vrcp.f32 %v2066_v27  ;;  %v2078_v21 = vadd.f32 1.0, %v2970_v31 }
 0x712   :  { %v2972_v42 = vpop.eup %2971  ;;  %2979 = vpow2.f32 %v2607_v17 }
 0x713   :  { %2981 = vrcp.f32 %v2078_v21  ;;  %v2067_v26 = vadd.f32 1.0, %v2972_v42 }
 0x714   :  { %v2974_v20 = vpop.eup %2973  ;;  %2983 = vpow2.f32 %v2608_v18 }
 0x715   :  { %2985 = vrcp.f32 %v2067_v26  ;;  %v2079_v24 = vadd.f32 1.0, %v2974_v20  ;;  %v2976_v34 = vpop.eup %2975 }
 0x716   :  { %2987 = vtanh.f32 %v2058_v16 }
 0x717   :  { %2989 = vrcp.f32 %v2079_v24 }
 0x71c   :  { %v2151_v2 = vpop.f32.mrf.mxu0  ;;  %v2194_v0 = vpop.f32.mrf.mxu1 }
 0x71d   :  { %v2152_v32 = vadd.f32 %v2151_v2, %v3647_v35 }
 0x71e   :  { %v2978_v23 = vpop.eup %2977  ;;  %v2153_v41 = vpop.f32.mrf.mxu0 }
 0x71f   :  { %v2980_v19 = vpop.eup %2979  ;;  %v2100_v36 = vmul.f32 %v2978_v23, %v2976_v34  ;;  %v2196_v50 = vpop.f32.mrf.mxu1  ;;  %v2154_v46 = vadd.f32 %v2153_v41, %v3649_v53  ;;  %v2195_v34 = vadd.f32 %v2194_v0, %v3657_v49 }
 0x720   :  { %v2982_v55 = vpop.eup %2981  ;;  %v2092_v8 = vadd.f32 1.0, %v2980_v19  ;;  %v2155_v48 = vpop.f32.mrf.mxu0  ;;  %v2197_v24 = vadd.f32 %v2196_v50, %v3655_v1 }
 0x721   :  { %v2984_v63 = vpop.eup %2983  ;;  %v2098_v4 = vmul.f32 %v2982_v55, %v4417_v61  ;;  %v2198_v58 = vpop.f32.mrf.mxu1  ;;  %v2156_v28 = vadd.f32 %v2155_v48, %v3647_v35 }
 0x722   :  { %v2986_v6 = vpop.eup %2985  ;;  %v2093_v13 = vadd.f32 1.0, %v2984_v63  ;;  %2991 = vrcp.f32 %v2092_v8  ;;  %v2157_v7 = vpop.f32.mrf.mxu0  ;;  %v2199_v8 = vadd.f32 %v2198_v58, %v3657_v49 }
 0x723   :  { %v2988_v9 = vpop.eup %2987  ;;  %v4544_v11 = vadd.f32 %v2100_v36, %v2098_v4  ;;  %v2200_v14 = vpop.f32.mrf.mxu1  ;;  %v2158_v27 = vadd.f32 %v2157_v7, %v3649_v53  ;;  %v2618_v7 = vld [vmem:[%s4596_s5] ss:$0 sm:$0xff] }
 0x724   :  { %v2990_v12 = vpop.eup %2989  ;;  %v2101_v5 = vmul.f32 %v2988_v9, %v2986_v6  ;;  %v2201_v23 = vadd.f32 %v2200_v14, %v3655_v1 }
 0x725   :  { %v2099_v37 = vmul.f32 %v2990_v12, %v4420_v56  ;;  %2993 = vtanh.f32 %v4544_v11  ;;  %v2767_v56 = vld [vmem:[%s4595_s4 + $0x38] sm:$0xff]  }
 0x726   :  { %2995 = vrcp.f32 %v2093_v13 }
 0x727   :  { %v4547_v10 = vadd.f32 %v2101_v5, %v2099_v37 }
 0x729   :  { %2997 = vtanh.f32 %v4547_v10 }
 0x72f   :  { %v2992_v45 = vpop.eup %2991 }
 0x732   :  { %v2994_v61 = vpop.eup %2993 }
 0x733   :  { %v2996_v51 = vpop.eup %2995  ;;  %v2106_v59 = vmul.f32 %v2994_v61, %v2992_v45 }
 0x736   :  { %v2998_v62 = vpop.eup %2997 }
 0x737   :  { %v2107_v38 = vmul.f32 %v2998_v62, %v2996_v51 }
 0x739   :  { %v2203_v60 = vpack.c.bf16 %v2107_v38, %v2106_v59 }
 0x73b   :  { %2237 = vmatmul.mubr.bf16.vlgmr.msra.gmra.mxu0 %v2203_v60  ;;  %2280 = vmatmul.mubr.bf16.vlgmr.msra.gmra.mxu1 %v2203_v60 }
 0x73c   :  { %2637 = vmatpush3.bf16.msra.mxu0 %v2767_v56  ;;  %2652 = vmatprep.mubr.msk.bf16.mxu0 %vm3141_vm0, %v3140_v39 }
 0x73d   :  { %2638 = vmatprep.subr.bf16.mxu0 %v3140_v39 }
 0x740   :  { %2639 = vmatpush3.bf16.msra.mxu0 %v2768_v40 }
 0x741   :  { %2640 = vmatprep.subr.bf16.mxu0 %v3140_v39 }
 0x744   :  { %2641 = vmatpush3.bf16.msra.mxu0 %v2769_v52 }
 0x745   :  { %2642 = vmatprep.subr.bf16.mxu0 %v3140_v39 }
 0x748   :  { %2643 = vmatpush3.bf16.msra.mxu0 %v2770_v54 }
 0x749   :  { %2644 = vmatprep.subr.bf16.mxu0 %v3140_v39 }
 0x74c   :  { %2645 = vmatpush3.bf16.msra.mxu0 %v2771_v43 }
 0x74d   :  { %2646 = vmatprep.subr.bf16.mxu0 %v3140_v39 }
 0x750   :  { %2647 = vmatpush3.bf16.msra.mxu0 %v2772_v47 }
 0x751   :  { %2648 = vmatprep.subr.bf16.mxu0 %v3140_v39 }
 0x754   :  { %2649 = vmatpush3.bf16.msra.mxu0 %v2773_v3 }
 0x755   :  { %2650 = vmatprep.subr.bf16.mxu0 %v3140_v39 }
 0x758   :  { %2651 = vmatpush3.bf16.msra.mxu0 %v2774_v44 }
 0x7fb   :  { %v2238_v57 = vpop.f32.mrf.mxu0  ;;  %v2281_v33 = vpop.f32.mrf.mxu1 }
 0x7fc   :  { %v2290_v25 = vadd.f32 %v2238_v57, %v2152_v32  ;;  %v2292_v19 = vadd.f32 %v2281_v33, %v2195_v34 }
 0x7fd   :  { %v2240_v22 = vpop.f32.mrf.mxu0  ;;  %v2283_v30 = vpop.f32.mrf.mxu1 }
 0x7fe   :  { %v2612_v29 = vmul.f32 -1.442695, %v2290_v25  ;;  %v2291_v15 = vadd.f32 %v2240_v22, %v2154_v46  ;;  %v2293_v53 = vadd.f32 %v2283_v30, %v2197_v24 }
 0x7ff   :  { %v2242_v17 = vpop.f32.mrf.mxu0  ;;  %v2285_v26 = vpop.f32.mrf.mxu1 }
 0x800   :  { %2999 = vpow2.f32 %v2612_v29  ;;  %v2614_v31 = vmul.f32 -1.442695, %v2291_v15  ;;  %v2294_v18 = vadd.f32 %v2242_v17, %v2156_v28  ;;  %v2616_v36 = vmul.f32 -1.442695, %v2293_v53 }
 0x801   :  { %v2244_v21 = vpop.f32.mrf.mxu0  ;;  %v2287_v35 = vpop.f32.mrf.mxu1  ;;  %v2296_v5 = vadd.f32 %v2285_v26, %v2199_v8 }
 0x802   :  { %3001 = vpow2.f32 %v2614_v31  ;;  %v2613_v42 = vmul.f32 -1.442695, %v2294_v18  ;;  %v2295_v16 = vadd.f32 %v2244_v21, %v2158_v27  ;;  %v2297_v55 = vadd.f32 %v2287_v35, %v2201_v23 }
 0x804   :  { %3003 = vpow2.f32 %v2613_v42  ;;  %v2615_v20 = vmul.f32 -1.442695, %v2295_v16  ;;  %v2617_v9 = vmul.f32 -1.442695, %v2297_v55 }
 0x806   :  { %3005 = vpow2.f32 %v2615_v20 }
 0x807   :  { %3007 = vtanh.f32 %v2292_v19 }
 0x80d   :  { %v3000_v63 = vpop.eup %2999 }
 0x80e   :  { %v2304_v4 = vadd.f32 1.0, %v3000_v63 }
 0x80f   :  { %v3002_v6 = vpop.eup %3001 }
 0x810   :  { %3009 = vrcp.f32 %v2304_v4  ;;  %v2316_v12 = vadd.f32 1.0, %v3002_v6 }
 0x811   :  { %v3004_v13 = vpop.eup %3003  ;;  %3011 = vpow2.f32 %v2616_v36 }
 0x812   :  { %3013 = vrcp.f32 %v2316_v12  ;;  %v2305_v37 = vadd.f32 1.0, %v3004_v13 }
 0x813   :  { %v3006_v45 = vpop.eup %3005  ;;  %3015 = vpow2.f32 %v2617_v9 }
 0x814   :  { %3017 = vrcp.f32 %v2305_v37  ;;  %v2317_v1 = vadd.f32 1.0, %v3006_v45  ;;  %v3008_v61 = vpop.eup %3007 }
 0x815   :  { %3019 = vtanh.f32 %v2296_v5 }
 0x816   :  { %3021 = vrcp.f32 %v2317_v1 }
 0x81d   :  { %v3010_v51 = vpop.eup %3009 }
 0x81e   :  { %v3012_v62 = vpop.eup %3011  ;;  %v2338_v38 = vmul.f32 %v3010_v51, %v3008_v61 }
 0x81f   :  { %v3014_v59 = vpop.eup %3013  ;;  %v2330_v39 = vadd.f32 1.0, %v3012_v62 }
 0x820   :  { %v3016_v49 = vpop.eup %3015  ;;  %v2336_v60 = vmul.f32 %v3014_v59, %v4544_v11 }
 0x821   :  { %v3018_v56 = vpop.eup %3017  ;;  %v2331_v43 = vadd.f32 1.0, %v3016_v49  ;;  %3023 = vrcp.f32 %v2330_v39 }
 0x822   :  { %v3020_v40 = vpop.eup %3019  ;;  %v2340_v52 = vadd.f32 %v2338_v38, %v2336_v60 }
 0x823   :  { %v3022_v54 = vpop.eup %3021  ;;  %v2339_v47 = vmul.f32 %v3020_v40, %v3018_v56 }
 0x824   :  { %v2337_v3 = vmul.f32 %v3022_v54, %v4547_v10  ;;  %3025 = vtanh.f32 %v2340_v52 }
 0x825   :  { %3027 = vrcp.f32 %v2331_v43 }
 0x826   :  { %v2341_v44 = vadd.f32 %v2339_v47, %v2337_v3 }
 0x828   :  { %3029 = vtanh.f32 %v2341_v44 }
 0x82e   :  { %v3024_v2 = vpop.eup %3023 }
 0x831   :  { %v3026_v0 = vpop.eup %3025 }
 0x832   :  { %v3028_v41 = vpop.eup %3027  ;;  %v2344_v48 = vmul.f32 %v3026_v0, %v3024_v2 }
 0x835   :  { %v3030_v50 = vpop.eup %3029 }
 0x836   :  { %v2345_v11 = vmul.f32 %v3030_v50, %v3028_v41 }
 0x838   :  { %v2353_v58 = vpack.c.bf16 %v2345_v11, %v2344_v48 }
 0x83a   :  { %2653 = vmatmul.mubr.bf16.vlgmr.msra.gmra.mxu0 %v2353_v58 }
 0x8fa   :  { %v2459_v32 = vpop.f32.mrf.mxu0 }
 0x8fb   :  { %v2460_v14 = vadd.f32 %v2618_v7, %v2459_v32 }
 0x8fc   :  { %v2654_v10 = vpop.f32.mrf.mxu0 }
 0x8fd   :  { %2466 = vst [vmem:[#allocation4] sm:$0xff] %v2460_v14 }
 0x8fe   :  { %v2462_v57 = vpop.f32.mrf.mxu0 }
 0x8ff   :  { %v2463_v46 = vadd.f32 %v2618_v7, %v2462_v57 }
 0x900   :  { %v2655_v25 = vpop.f32.mrf.mxu0 }
 0x901   :  { %2467 = vst [vmem:[#allocation4 + $0x8] sm:$0xff] %v2463_v46 }
 0x902   :  { %3127 = shalt.err (!%p3124_p4)
}
 0x903   :  { %s3143_s8 = smov 128   ;;  %s3144_s5 = smov 8  }
 0x904   :  { %2479 = dma.vmem_to_hbm [thread:$0]  %s2474_s30, 256, %s4597_s6, [#allocation5], %s3143_s8, %s3143_s8, %s3144_s5  }
 0x905   :  { %3136 = dma.done.wait [#allocation5], 256  }
 0x906   :  { %3137 = vsyncadd [#allocation5], 4294967040 }
 0x907   :  { %2483 = vsyncpa [#allocation5], 1 }

// kernel: _forward_padded.2
= control target key start
LH: loop header
LB: loop body
LE: loop exit
PB: predicated region body
PF: predicated region fallthrough
CT: control target
= control target key end

     0   :  { %9 = vsyncpa [#allocation5], 0  ;;  %s2850_s15 = smov [#allocation4]   ;;  %s3582_s0 = inlined_call_operand.vmem [shape: f32[8,16,8], index: 0, kind: input, shape index: {}]   ;;  %s3583_s1 = inlined_call_operand.vmem [shape: bf16[8,512], index: 1, kind: input, shape index: {}]   ;;  %s3584_s2 = inlined_call_operand.hbm [shape: bf16[128,512], index: 2, kind: input, shape index: {}]   ;;  %s3585_s3 = inlined_call_operand.vmem [shape: f32[1,512], index: 3, kind: input, shape index: {}]   ;;  %s3586_s4 = inlined_call_operand.vmem [shape: bf16[8,16,128], index: 4, kind: output, shape index: {}]  }
   0x1   :  { %s19_s16 = sshll.u32 %s2850_s15, 4  ;;  %s20_s16 = int_to_ptr.vmem [resolvable:$true] %s19_s16 }
   0x2   :  { %s2836_s17 = scalar_lea.vmem %s20_s16, 4096  ;;  %p2841_p1 = scmp.lt.s32.totalorder %s20_s16, %s20_s16 }
   0x3   :  { %p2837_p0 = scmp.ne.s32.totalorder %s20_s16, %s2836_s17  ;;  %p2842_p2 = scmp.lt.s32.totalorder %s2836_s17, %s2836_s17 }
   0x5   :  { %p2843_p3 = por %p2842_p2, %p2841_p1 }
   0x7   :  { %p2844_p4 = pnand %p2843_p3, %p2837_p0 }
   0x9   :  { %2847 = shalt.err (!%p2844_p4)
}
   0xa   :  { %s2851_s18 = smov 256   ;;  %s2852_s19 = smov 16  }
   0xb   :  { %25 = dma.hbm_to_vmem [thread:$0]  %s3584_s2, 4096, %s20_s16, [#allocation5], %s2851_s18, %s2851_s18, %s2852_s19  }
   0xc   :  { %2848 = dma.done.wait [#allocation5], 4096  }
   0xd   :  { %2849 = vsyncadd [#allocation5], 4294963200  ;;  %v3587_v0 = vmov 0   ;;  %v40_v1 = vld [vmem:[%s3583_s1] sm:$0xff]  ;;  %vm117_vm0 = vcmask 1043456   ;;  %v41_v2 = vld [vmem:[%s3583_s1 + $0x8] sm:$0xff]  ;;  %v76_v48 = vlaneseq }
   0xe   :  { %162 = vmatprep.mubr.bf16.mxu0 %v3587_v0  ;;  %205 = vmatprep.mubr.bf16.mxu1 %v3587_v0  ;;  %v100_v3 = vld [vmem:[%s3582_s0] sm:$0xff]  ;;  %v2894_v4 = vcombine.high %v40_v1, %v40_v1  ;;  %v2896_v5 = vcombine.high %v41_v2, %v41_v2  ;;  %v2260_v6 = vcombine.low %v40_v1, %v40_v1  ;;  %v101_v8 = vld [vmem:[%s3582_s0 + $0x8] sm:$0xff]  ;;  %vm113_vm1 = vcmask 64512   ;;  %v2308_v45 = vld [vmem:[%s3582_s0 + $0x10] sm:$0xff] }
   0xf   :  { %v2262_v7 = vcombine.low %v41_v2, %v41_v2  ;;  %v2901_v9 = vld [vmem:[#allocation4 + $0xe4] ss:$16 sps:$4 sm:$0xff]   ;;  %v102_v12 = vpack.c.bf16 %v101_v8, %v100_v3  ;;  %v2913_v13 = vld [vmem:[#allocation4 + $0xec] ss:$16 sps:$4 sm:$0xff]   ;;  %v2915_v14 = vld [vmem:[#allocation4 + $0xe0] ss:$16 sps:$4 sm:$0xff]  }
  0x10   :  { %3599 = vst [vmem:[#allocation7_spill] sm:$0xff] %v2894_v4  ;;  %3600 = vst [vmem:[#allocation8_spill] sm:$0xff] %v2896_v5  ;;  %2264 = vmatprep.subr.msk.bf16.mxu0 %vm117_vm0, %v2894_v4  ;;  %2266 = vmatprep.subr.msk.bf16.mxu1 %vm117_vm0, %v2896_v5  ;;  %v2908_v10 = vsel %vm117_vm0, %v2260_v6, 0  ;;  %v2919_v15 = vld [vmem:[#allocation4 + $0xe8] ss:$16 sps:$4 sm:$0xff]   ;;  %v2854_v44 = vmov 0.0|0.0  }
  0x11   :  { %v2911_v11 = vsel %vm117_vm0, %v2262_v7, 0  ;;  %145 = vmatpush1.bf16.msra.mxu0 %v2908_v10  ;;  %v2923_v16 = vld [vmem:[#allocation4 + $0xc4] ss:$16 sps:$4 sm:$0xff]   ;;  %v2925_v17 = vld [vmem:[#allocation4 + $0xcc] ss:$16 sps:$4 sm:$0xff]   ;;  %v77_v50 = vshrl.u32 %v76_v48, 7 }
  0x12   :  { %188 = vmatpush1.bf16.msra.mxu1 %v2911_v11  ;;  %377 = vmatprep.subr.bf16.mxu0 %v2901_v9  ;;  %v2929_v18 = vld [vmem:[#allocation4 + $0xc0] ss:$16 sps:$4 sm:$0xff]   ;;  %v2933_v19 = vld [vmem:[#allocation4 + $0xc8] ss:$16 sps:$4 sm:$0xff]   ;;  %v2937_v20 = vld [vmem:[#allocation4 + $0xa4] ss:$16 sps:$4 sm:$0xff]  }
  0x13   :  { %420 = vmatprep.subr.bf16.mxu1 %v2913_v13  ;;  %v2939_v21 = vld [vmem:[#allocation4 + $0xac] ss:$16 sps:$4 sm:$0xff]   ;;  %v2943_v22 = vld [vmem:[#allocation4 + $0xa0] ss:$16 sps:$4 sm:$0xff]   ;;  %v2945_v23 = vld [vmem:[#allocation4 + $0xa8] ss:$16 sps:$4 sm:$0xff]  }
  0x14   :  { %2265 = vmatmul.mubr.msk.bf16.vlgmr.msra.gmra.mxu0 %vm113_vm1, %v102_v12  ;;  %v2949_v24 = vld [vmem:[#allocation4 + $0x84] ss:$16 sps:$4 sm:$0xff]   ;;  %v2953_v25 = vld [vmem:[#allocation4 + $0x8c] ss:$16 sps:$4 sm:$0xff]   ;;  %v2955_v26 = vld [vmem:[#allocation4 + $0x80] ss:$16 sps:$4 sm:$0xff]  }
  0x15   :  { %2267 = vmatmul.mubr.msk.bf16.vlgmr.msra.gmra.mxu1 %vm113_vm1, %v102_v12  ;;  %378 = vmatpush1.bf16.msra.mxu0 %v2915_v14  ;;  %v2959_v27 = vld [vmem:[#allocation4 + $0x88] ss:$16 sps:$4 sm:$0xff]   ;;  %v2963_v28 = vld [vmem:[#allocation4 + $0x64] ss:$16 sps:$4 sm:$0xff]   ;;  %v2965_v29 = vld [vmem:[#allocation4 + $0x6c] ss:$16 sps:$4 sm:$0xff]  }
  0x16   :  { %421 = vmatpush1.bf16.msra.mxu1 %v2919_v15  ;;  %379 = vmatprep.subr.bf16.mxu0 %v2923_v16  ;;  %v2967_v30 = vld [vmem:[#allocation4 + $0x60] ss:$16 sps:$4 sm:$0xff]   ;;  %v2969_v31 = vld [vmem:[#allocation4 + $0x68] ss:$16 sps:$4 sm:$0xff]   ;;  %v2973_v32 = vld [vmem:[#allocation4 + $0x44] ss:$16 sps:$4 sm:$0xff]  }
  0x17   :  { %422 = vmatprep.subr.bf16.mxu1 %v2925_v17  ;;  %409 = vmatprep.mubr.bf16.mxu0 %v3587_v0  ;;  %v2977_v33 = vld [vmem:[#allocation4 + $0x4c] ss:$16 sps:$4 sm:$0xff]   ;;  %v2981_v34 = vld [vmem:[#allocation4 + $0x40] ss:$16 sps:$4 sm:$0xff]   ;;  %v2983_v35 = vld [vmem:[#allocation4 + $0x48] ss:$16 sps:$4 sm:$0xff]  }
  0x18   :  { %452 = vmatprep.mubr.bf16.mxu1 %v3587_v0  ;;  %v2987_v36 = vld [vmem:[#allocation4 + $0x24] ss:$16 sps:$4 sm:$0xff]   ;;  %v2989_v37 = vld [vmem:[#allocation4 + $0x2c] ss:$16 sps:$4 sm:$0xff]   ;;  %v2993_v38 = vld [vmem:[#allocation4 + $0x20] ss:$16 sps:$4 sm:$0xff]  }
  0x19   :  { %380 = vmatpush1.bf16.msra.mxu0 %v2929_v18  ;;  %v2995_v39 = vld [vmem:[#allocation4 + $0x28] ss:$16 sps:$4 sm:$0xff]   ;;  %v2999_v40 = vld [vmem:[#allocation4 + $0x4] ss:$16 sps:$4 sm:$0xff]   ;;  %v3001_v41 = vld [vmem:[#allocation4 + $0xc] ss:$16 sps:$4 sm:$0xff]  }
  0x1a   :  { %423 = vmatpush1.bf16.msra.mxu1 %v2933_v19  ;;  %381 = vmatprep.subr.bf16.mxu0 %v2937_v20  ;;  %v3005_v42 = vld [vmem:[#allocation4] ss:$16 sps:$4 sm:$0xff]   ;;  %v3007_v43 = vld [vmem:[#allocation4 + $0x8] ss:$16 sps:$4 sm:$0xff]   ;;  %v78_v53 = vsub.s32 0, %v77_v50  ;;  %v82_v56 = vsub.s32 1, %v77_v50 }
  0x1b   :  { %424 = vmatprep.subr.bf16.mxu1 %v2939_v21  ;;  %3601 = vst [vmem:[#allocation9_spill] sm:$0xff] %v3007_v43  ;;  %v2309_v46 = vld [vmem:[%s3582_s0 + $0x18] sm:$0xff]  ;;  %v74_v55 = vld [vmem:[%s3585_s3] sm:$0xf] }
  0x1c   :  { %v532_v47 = vpack.c.bf16 %v2309_v46, %v2308_v45  ;;  %v3070_v58 = vrot.slane %v74_v55, %v78_v53  ;;  %v3072_v60 = vrot.slane %v74_v55, %v82_v56  ;;  %v90_v45 = vsub.s32 3, %v77_v50 }
  0x1d   :  { %382 = vmatpush1.bf16.msra.mxu0 %v2943_v22 }
  0x1e   :  { %425 = vmatpush1.bf16.msra.mxu1 %v2945_v23  ;;  %383 = vmatprep.subr.bf16.mxu0 %v2949_v24 }
  0x1f   :  { %426 = vmatprep.subr.bf16.mxu1 %v2953_v25 }
  0x21   :  { %384 = vmatpush1.bf16.msra.mxu0 %v2955_v26 }
  0x22   :  { %427 = vmatpush1.bf16.msra.mxu1 %v2959_v27  ;;  %385 = vmatprep.subr.bf16.mxu0 %v2963_v28 }
  0x23   :  { %428 = vmatprep.subr.bf16.mxu1 %v2965_v29 }
  0x25   :  { %386 = vmatpush1.bf16.msra.mxu0 %v2967_v30 }
  0x26   :  { %429 = vmatpush1.bf16.msra.mxu1 %v2969_v31  ;;  %387 = vmatprep.subr.bf16.mxu0 %v2973_v32 }
  0x27   :  { %430 = vmatprep.subr.bf16.mxu1 %v2977_v33 }
  0x29   :  { %388 = vmatpush1.bf16.msra.mxu0 %v2981_v34 }
  0x2a   :  { %431 = vmatpush1.bf16.msra.mxu1 %v2983_v35  ;;  %389 = vmatprep.subr.bf16.mxu0 %v2987_v36 }
  0x2b   :  { %432 = vmatprep.subr.bf16.mxu1 %v2989_v37 }
  0x2d   :  { %390 = vmatpush1.bf16.msra.mxu0 %v2993_v38 }
  0x2e   :  { %433 = vmatpush1.bf16.msra.mxu1 %v2995_v39  ;;  %391 = vmatprep.subr.bf16.mxu0 %v2999_v40 }
  0x2f   :  { %434 = vmatprep.subr.bf16.mxu1 %v3001_v41 }
  0x31   :  { %392 = vmatpush1.bf16.msra.mxu0 %v3005_v42 }
  0x32   :  { %435 = vmatpush1.bf16.msra.mxu1 %v3007_v43  ;;  %2310 = vmatprep.subr.msk.bf16.mxu0 %vm117_vm0, %v2894_v4 }
  0x33   :  { %2312 = vmatprep.subr.msk.bf16.mxu1 %vm117_vm0, %v2896_v5 }
  0x34   :  { %410 = vmatmul.mubr.bf16.vlgmr.msra.gmra.mxu0 %v2854_v44 }
  0x35   :  { %453 = vmatmul.mubr.bf16.vlgmr.msra.gmra.mxu1 %v2854_v44  ;;  %551 = vmatpush1.bf16.msra.mxu0 %v2908_v10 }
  0x36   :  { %568 = vmatprep.mubr.bf16.mxu0 %v3587_v0  ;;  %594 = vmatpush1.bf16.msra.mxu1 %v2911_v11 }
  0x37   :  { %611 = vmatprep.mubr.bf16.mxu1 %v3587_v0  ;;  %622 = vmatprep.subr.bf16.mxu0 %v2901_v9 }
  0x38   :  { %665 = vmatprep.subr.bf16.mxu1 %v2913_v13 }
  0x3c   :  { %2311 = vmatmul.mubr.msk.bf16.vlgmr.msra.gmra.mxu0 %vm113_vm1, %v532_v47 }
  0x3d   :  { %2313 = vmatmul.mubr.msk.bf16.vlgmr.msra.gmra.mxu1 %vm113_vm1, %v532_v47  ;;  %623 = vmatpush1.bf16.msra.mxu0 %v2915_v14 }
  0x3e   :  { %666 = vmatpush1.bf16.msra.mxu1 %v2919_v15  ;;  %624 = vmatprep.subr.bf16.mxu0 %v2923_v16 }
  0x3f   :  { %667 = vmatprep.subr.bf16.mxu1 %v2925_v17  ;;  %654 = vmatprep.mubr.bf16.mxu0 %v3587_v0 }
  0x40   :  { %697 = vmatprep.mubr.bf16.mxu1 %v3587_v0 }
  0x41   :  { %625 = vmatpush1.bf16.msra.mxu0 %v2929_v18 }
  0x42   :  { %668 = vmatpush1.bf16.msra.mxu1 %v2933_v19  ;;  %626 = vmatprep.subr.bf16.mxu0 %v2937_v20 }
  0x43   :  { %669 = vmatprep.subr.bf16.mxu1 %v2939_v21 }
  0x45   :  { %627 = vmatpush1.bf16.msra.mxu0 %v2943_v22 }
  0x46   :  { %670 = vmatpush1.bf16.msra.mxu1 %v2945_v23  ;;  %628 = vmatprep.subr.bf16.mxu0 %v2949_v24 }
  0x47   :  { %671 = vmatprep.subr.bf16.mxu1 %v2953_v25 }
  0x49   :  { %629 = vmatpush1.bf16.msra.mxu0 %v2955_v26 }
  0x4a   :  { %672 = vmatpush1.bf16.msra.mxu1 %v2959_v27  ;;  %630 = vmatprep.subr.bf16.mxu0 %v2963_v28 }
  0x4b   :  { %673 = vmatprep.subr.bf16.mxu1 %v2965_v29 }
  0x4d   :  { %631 = vmatpush1.bf16.msra.mxu0 %v2967_v30 }
  0x4e   :  { %674 = vmatpush1.bf16.msra.mxu1 %v2969_v31  ;;  %632 = vmatprep.subr.bf16.mxu0 %v2973_v32 }
  0x4f   :  { %675 = vmatprep.subr.bf16.mxu1 %v2977_v33 }
  0x51   :  { %633 = vmatpush1.bf16.msra.mxu0 %v2981_v34 }
  0x52   :  { %676 = vmatpush1.bf16.msra.mxu1 %v2983_v35  ;;  %634 = vmatprep.subr.bf16.mxu0 %v2987_v36 }
  0x53   :  { %677 = vmatprep.subr.bf16.mxu1 %v2989_v37 }
  0x55   :  { %635 = vmatpush1.bf16.msra.mxu0 %v2993_v38 }
  0x56   :  { %678 = vmatpush1.bf16.msra.mxu1 %v2995_v39  ;;  %636 = vmatprep.subr.bf16.mxu0 %v2999_v40 }
  0x57   :  { %679 = vmatprep.subr.bf16.mxu1 %v3001_v41 }
  0x59   :  { %637 = vmatpush1.bf16.msra.mxu0 %v3005_v42 }
  0x5a   :  { %680 = vmatpush1.bf16.msra.mxu1 %v3007_v43  ;;  %2326 = vmatprep.subr.msk.bf16.mxu0 %vm117_vm0, %v2894_v4 }
  0x5b   :  { %2328 = vmatprep.subr.msk.bf16.mxu1 %vm117_vm0, %v2896_v5 }
  0xd4   :  { %v164_v49 = vpop.f32.mrf.mxu0 }
  0xd5   :  { %v207_v51 = vpop.f32.mrf.mxu1  ;;  %v165_v62 = vadd.f32 %v164_v49, %v3070_v58  ;;  %v86_v49 = vsub.s32 2, %v77_v50 }
  0xd6   :  { %v166_v52 = vpop.f32.mrf.mxu0 }
  0xd7   :  { %v209_v54 = vpop.f32.mrf.mxu1  ;;  %v167_v2 = vadd.f32 %v166_v52, %v3072_v60 }
  0xd8   :  { %v168_v57 = vpop.f32.mrf.mxu0 }
  0xd9   :  { %v211_v59 = vpop.f32.mrf.mxu1  ;;  %v169_v8 = vadd.f32 %v168_v57, %v3070_v58 }
  0xda   :  { %v170_v61 = vpop.f32.mrf.mxu0 }
  0xdb   :  { %v213_v63 = vpop.f32.mrf.mxu1  ;;  %v171_v47 = vadd.f32 %v170_v61, %v3072_v60 }
  0xf4   :  { %v411_v1 = vpop.f32.mrf.mxu0 }
  0xf5   :  { %v463_v3 = vadd.f32 %v411_v1, %v165_v62  ;;  %v454_v6 = vpop.f32.mrf.mxu1  ;;  %v3078_v62 = vrot.slane %v74_v55, %v90_v45 }
  0xf6   :  { %v413_v7 = vpop.f32.mrf.mxu0 }
  0xf7   :  { %v2300_v12 = vmul.f32 -1.442695, %v463_v3  ;;  %v464_v44 = vadd.f32 %v413_v7, %v167_v2  ;;  %v456_v53 = vpop.f32.mrf.mxu1  ;;  %v3080_v3 = vrot.slane %v74_v55, %v86_v49  ;;  %v210_v2 = vadd.f32 %v209_v54, %v3078_v62 }
  0xf8   :  { %v415_v46 = vpop.f32.mrf.mxu0 }
  0xf9   :  { %2540 = vpow2.f32 %v2300_v12  ;;  %v2302_v48 = vmul.f32 -1.442695, %v464_v44  ;;  %v467_v56 = vadd.f32 %v415_v46, %v169_v8  ;;  %v458_v1 = vpop.f32.mrf.mxu1  ;;  %v208_v7 = vadd.f32 %v207_v51, %v3080_v3 }
  0xfa   :  { %v417_v0 = vpop.f32.mrf.mxu0  ;;  %v214_v8 = vadd.f32 %v213_v63, %v3078_v62  ;;  %v466_v50 = vadd.f32 %v456_v53, %v210_v2 }
  0xfb   :  { %2542 = vpow2.f32 %v2302_v48  ;;  %v2301_v5 = vmul.f32 -1.442695, %v467_v56  ;;  %v468_v52 = vadd.f32 %v417_v0, %v171_v47  ;;  %v460_v61 = vpop.f32.mrf.mxu1  ;;  %v465_v12 = vadd.f32 %v454_v6, %v208_v7 }
  0xfc   :  { %v470_v44 = vadd.f32 %v460_v61, %v214_v8  ;;  %v2304_v0 = vmul.f32 -1.442695, %v466_v50 }
  0xfd   :  { %2544 = vpow2.f32 %v2301_v5  ;;  %v2303_v57 = vmul.f32 -1.442695, %v468_v52  ;;  %v212_v5 = vadd.f32 %v211_v59, %v3080_v3 }
  0xfe   :  { %v2305_v55 = vmul.f32 -1.442695, %v470_v44 }
  0xff   :  { %2546 = vpow2.f32 %v2303_v57  ;;  %v469_v54 = vadd.f32 %v458_v1, %v212_v5 }
 0x100   :  { %2548 = vtanh.f32 %v465_v12 }
 0x106   :  { %v2541_v46 = vpop.eup %2540 }
 0x107   :  { %v477_v45 = vadd.f32 1.0, %v2541_v46 }
 0x108   :  { %v2543_v47 = vpop.eup %2542 }
 0x109   :  { %2550 = vrcp.f32 %v477_v45  ;;  %v489_v48 = vadd.f32 1.0, %v2543_v47 }
 0x10a   :  { %v2545_v56 = vpop.eup %2544  ;;  %2552 = vpow2.f32 %v2304_v0 }
 0x10b   :  { %2554 = vrcp.f32 %v489_v48  ;;  %v478_v51 = vadd.f32 1.0, %v2545_v56 }
 0x10c   :  { %v2547_v49 = vpop.eup %2546  ;;  %2556 = vpow2.f32 %v2305_v55 }
 0x10d   :  { %2558 = vrcp.f32 %v478_v51  ;;  %v490_v63 = vadd.f32 1.0, %v2547_v49  ;;  %v2549_v6 = vpop.eup %2548  ;;  %v3602_v49 = vmov 0  }
 0x10e   :  { %2560 = vtanh.f32 %v469_v54 }
 0x10f   :  { %2562 = vrcp.f32 %v490_v63  ;;  %v2324_v63 = vld [vmem:[%s3582_s0 + $0x20] sm:$0xff] }
 0x116   :  { %v2551_v53 = vpop.eup %2550 }
 0x117   :  { %v2553_v52 = vpop.eup %2552  ;;  %v511_v61 = vmul.f32 %v2551_v53, %v2549_v6  ;;  %v2325_v6 = vld [vmem:[%s3582_s0 + $0x28] sm:$0xff] }
 0x118   :  { %v2555_v57 = vpop.eup %2554  ;;  %v503_v8 = vadd.f32 1.0, %v2553_v52  ;;  %v778_v53 = vpack.c.bf16 %v2325_v6, %v2324_v63  ;;  %v3603_v52 = vld [vmem:[#allocation8_spill] sm:$0xff] }
 0x119   :  { %v2557_v59 = vpop.eup %2556  ;;  %v509_v2 = vmul.f32 0.0, %v2555_v57  ;;  %v570_v57 = vpop.f32.mrf.mxu0 }
 0x11a   :  { %v2559_v7 = vpop.eup %2558  ;;  %v504_v44 = vadd.f32 1.0, %v2557_v59  ;;  %2564 = vrcp.f32 %v503_v8  ;;  %v613_v59 = vpop.f32.mrf.mxu1 }
 0x11b   :  { %v2561_v50 = vpop.eup %2560  ;;  %v3086_v12 = vadd.f32 %v511_v61, %v509_v2  ;;  %v572_v2 = vpop.f32.mrf.mxu0 }
 0x11c   :  { %v2563_v1 = vpop.eup %2562  ;;  %v512_v0 = vmul.f32 %v2561_v50, %v2559_v7  ;;  %v615_v61 = vpop.f32.mrf.mxu1 }
 0x11d   :  { %v510_v46 = vmul.f32 0.0, %v2563_v1  ;;  %2566 = vtanh.f32 %v3086_v12  ;;  %v574_v7 = vpop.f32.mrf.mxu0  ;;  %v571_v1 = vadd.f32 %v570_v57, %v3070_v58 }
 0x11e   :  { %2568 = vrcp.f32 %v504_v44  ;;  %v617_v8 = vpop.f32.mrf.mxu1 }
 0x11f   :  { %v3089_v45 = vadd.f32 %v512_v0, %v510_v46  ;;  %v576_v50 = vpop.f32.mrf.mxu0  ;;  %v573_v0 = vadd.f32 %v572_v2, %v3072_v60 }
 0x120   :  { %v619_v44 = vpop.f32.mrf.mxu1  ;;  %v577_v63 = vadd.f32 %v576_v50, %v3072_v60 }
 0x121   :  { %2570 = vtanh.f32 %v3089_v45 }
 0x127   :  { %v2565_v47 = vpop.eup %2564 }
 0x12a   :  { %v2567_v5 = vpop.eup %2566 }
 0x12b   :  { %v2569_v55 = vpop.eup %2568  ;;  %v517_v56 = vmul.f32 %v2567_v5, %v2565_v47 }
 0x12e   :  { %v2571_v48 = vpop.eup %2570 }
 0x12f   :  { %v518_v54 = vmul.f32 %v2571_v48, %v2569_v55  ;;  %v575_v48 = vadd.f32 %v574_v7, %v3070_v58 }
 0x131   :  { %v519_v51 = vpack.c.bf16 %v518_v54, %v517_v56 }
 0x133   :  { %2440 = vst [vmem:[%s3586_s4] sm:$0xff] %v519_v51   ;;  %655 = vmatmul.mubr.bf16.vlgmr.msra.gmra.mxu0 %v519_v51  ;;  %698 = vmatmul.mubr.bf16.vlgmr.msra.gmra.mxu1 %v519_v51 }
 0x134   :  { %797 = vmatpush1.bf16.msra.mxu0 %v2908_v10  ;;  %814 = vmatprep.mubr.bf16.mxu0 %v3602_v49 }
 0x135   :  { %840 = vmatpush1.bf16.msra.mxu1 %v2911_v11  ;;  %857 = vmatprep.mubr.bf16.mxu1 %v3602_v49 }
 0x136   :  { %868 = vmatprep.subr.bf16.mxu0 %v2901_v9  ;;  %911 = vmatprep.subr.bf16.mxu1 %v2913_v13 }
 0x13b   :  { %2327 = vmatmul.mubr.msk.bf16.vlgmr.msra.gmra.mxu0 %vm113_vm1, %v778_v53  ;;  %2329 = vmatmul.mubr.msk.bf16.vlgmr.msra.gmra.mxu1 %vm113_vm1, %v778_v53 }
 0x13c   :  { %869 = vmatpush1.bf16.msra.mxu0 %v2915_v14  ;;  %912 = vmatpush1.bf16.msra.mxu1 %v2919_v15 }
 0x13d   :  { %870 = vmatprep.subr.bf16.mxu0 %v2923_v16  ;;  %913 = vmatprep.subr.bf16.mxu1 %v2925_v17 }
 0x13e   :  { %900 = vmatprep.mubr.bf16.mxu0 %v3602_v49  ;;  %943 = vmatprep.mubr.bf16.mxu1 %v3602_v49 }
 0x140   :  { %871 = vmatpush1.bf16.msra.mxu0 %v2929_v18  ;;  %914 = vmatpush1.bf16.msra.mxu1 %v2933_v19 }
 0x141   :  { %872 = vmatprep.subr.bf16.mxu0 %v2937_v20  ;;  %915 = vmatprep.subr.bf16.mxu1 %v2939_v21 }
 0x144   :  { %873 = vmatpush1.bf16.msra.mxu0 %v2943_v22  ;;  %916 = vmatpush1.bf16.msra.mxu1 %v2945_v23 }
 0x145   :  { %874 = vmatprep.subr.bf16.mxu0 %v2949_v24  ;;  %917 = vmatprep.subr.bf16.mxu1 %v2953_v25 }
 0x148   :  { %875 = vmatpush1.bf16.msra.mxu0 %v2955_v26  ;;  %918 = vmatpush1.bf16.msra.mxu1 %v2959_v27 }
 0x149   :  { %876 = vmatprep.subr.bf16.mxu0 %v2963_v28  ;;  %919 = vmatprep.subr.bf16.mxu1 %v2965_v29 }
 0x14c   :  { %877 = vmatpush1.bf16.msra.mxu0 %v2967_v30  ;;  %920 = vmatpush1.bf16.msra.mxu1 %v2969_v31 }
 0x14d   :  { %878 = vmatprep.subr.bf16.mxu0 %v2973_v32  ;;  %921 = vmatprep.subr.bf16.mxu1 %v2977_v33 }
 0x150   :  { %879 = vmatpush1.bf16.msra.mxu0 %v2981_v34  ;;  %922 = vmatpush1.bf16.msra.mxu1 %v2983_v35 }
 0x151   :  { %880 = vmatprep.subr.bf16.mxu0 %v2987_v36  ;;  %923 = vmatprep.subr.bf16.mxu1 %v2989_v37 }
 0x154   :  { %881 = vmatpush1.bf16.msra.mxu0 %v2993_v38  ;;  %924 = vmatpush1.bf16.msra.mxu1 %v2995_v39 }
 0x155   :  { %882 = vmatprep.subr.bf16.mxu0 %v2999_v40  ;;  %925 = vmatprep.subr.bf16.mxu1 %v3001_v41 }
 0x158   :  { %883 = vmatpush1.bf16.msra.mxu0 %v3005_v42  ;;  %926 = vmatpush1.bf16.msra.mxu1 %v3007_v43 }
 0x159   :  { %2342 = vmatprep.subr.msk.bf16.mxu0 %vm117_vm0, %v2894_v4  ;;  %2344 = vmatprep.subr.msk.bf16.mxu1 %vm117_vm0, %v3603_v52 }
 0x1f3   :  { %v656_v46 = vpop.f32.mrf.mxu0  ;;  %v699_v5 = vpop.f32.mrf.mxu1 }
 0x1f4   :  { %v708_v47 = vadd.f32 %v656_v46, %v571_v1  ;;  %v616_v46 = vadd.f32 %v615_v61, %v3078_v62 }
 0x1f5   :  { %v658_v55 = vpop.f32.mrf.mxu0  ;;  %v701_v53 = vpop.f32.mrf.mxu1 }
 0x1f6   :  { %v2314_v56 = vmul.f32 -1.442695, %v708_v47  ;;  %v709_v54 = vadd.f32 %v658_v55, %v573_v0  ;;  %v614_v0 = vadd.f32 %v613_v59, %v3080_v3  ;;  %v620_v47 = vadd.f32 %v619_v44, %v3078_v62 }
 0x1f7   :  { %v660_v51 = vpop.f32.mrf.mxu0  ;;  %v703_v2 = vpop.f32.mrf.mxu1  ;;  %v711_v50 = vadd.f32 %v701_v53, %v616_v46 }
 0x1f8   :  { %2572 = vpow2.f32 %v2314_v56  ;;  %v2316_v6 = vmul.f32 -1.442695, %v709_v54  ;;  %v712_v52 = vadd.f32 %v660_v51, %v575_v48  ;;  %v710_v55 = vadd.f32 %v699_v5, %v614_v0 }
 0x1f9   :  { %v662_v4 = vpop.f32.mrf.mxu0  ;;  %v705_v7 = vpop.f32.mrf.mxu1  ;;  %v2318_v48 = vmul.f32 -1.442695, %v711_v50 }
 0x1fa   :  { %2574 = vpow2.f32 %v2316_v6  ;;  %v2315_v57 = vmul.f32 -1.442695, %v712_v52  ;;  %v713_v43 = vadd.f32 %v662_v4, %v577_v63  ;;  %v715_v56 = vadd.f32 %v705_v7, %v620_v47 }
 0x1fb   :  { %v618_v4 = vadd.f32 %v617_v8, %v3080_v3 }
 0x1fc   :  { %2576 = vpow2.f32 %v2315_v57  ;;  %v2317_v1 = vmul.f32 -1.442695, %v713_v43  ;;  %v2319_v52 = vmul.f32 -1.442695, %v715_v56 }
 0x1fd   :  { %v714_v61 = vadd.f32 %v703_v2, %v618_v4 }
 0x1fe   :  { %2578 = vpow2.f32 %v2317_v1 }
 0x1ff   :  { %2580 = vtanh.f32 %v710_v55 }
 0x205   :  { %v2573_v54 = vpop.eup %2572 }
 0x206   :  { %v722_v51 = vadd.f32 1.0, %v2573_v54 }
 0x207   :  { %v2575_v6 = vpop.eup %2574 }
 0x208   :  { %2582 = vrcp.f32 %v722_v51  ;;  %v734_v43 = vadd.f32 1.0, %v2575_v6 }
 0x209   :  { %v2577_v63 = vpop.eup %2576  ;;  %2584 = vpow2.f32 %v2318_v48 }
 0x20a   :  { %2586 = vrcp.f32 %v734_v43  ;;  %v723_v59 = vadd.f32 1.0, %v2577_v63 }
 0x20b   :  { %v2579_v57 = vpop.eup %2578  ;;  %2588 = vpow2.f32 %v2319_v52 }
 0x20c   :  { %2590 = vrcp.f32 %v723_v59  ;;  %v735_v44 = vadd.f32 1.0, %v2579_v57  ;;  %v2581_v5 = vpop.eup %2580  ;;  %v2341_v57 = vld [vmem:[%s3582_s0 + $0x38] sm:$0xff] }
 0x20d   :  { %2592 = vtanh.f32 %v714_v61 }
 0x20e   :  { %2594 = vrcp.f32 %v735_v44 }
 0x215   :  { %v2583_v53 = vpop.eup %2582 }
 0x216   :  { %v2585_v1 = vpop.eup %2584  ;;  %v756_v7 = vmul.f32 %v2583_v53, %v2581_v5 }
 0x217   :  { %v2587_v46 = vpop.eup %2586  ;;  %v748_v50 = vadd.f32 1.0, %v2585_v1 }
 0x218   :  { %v2589_v8 = vpop.eup %2588  ;;  %v754_v0 = vmul.f32 %v2587_v46, %v3086_v12 }
 0x219   :  { %v2591_v47 = vpop.eup %2590  ;;  %v749_v54 = vadd.f32 1.0, %v2589_v8  ;;  %2596 = vrcp.f32 %v748_v50 }
 0x21a   :  { %v2593_v55 = vpop.eup %2592  ;;  %v3154_v2 = vadd.f32 %v756_v7, %v754_v0 }
 0x21b   :  { %v2595_v56 = vpop.eup %2594  ;;  %v757_v48 = vmul.f32 %v2593_v55, %v2591_v47 }
 0x21c   :  { %v755_v51 = vmul.f32 %v2595_v56, %v3089_v45  ;;  %2598 = vtanh.f32 %v3154_v2  ;;  %v2340_v45 = vld [vmem:[%s3582_s0 + $0x30] sm:$0xff] }
 0x21d   :  { %2600 = vrcp.f32 %v749_v54  ;;  %v1024_v44 = vpack.c.bf16 %v2341_v57, %v2340_v45 }
 0x21e   :  { %v3157_v6 = vadd.f32 %v757_v48, %v755_v51 }
 0x220   :  { %2602 = vtanh.f32 %v3157_v6 }
 0x226   :  { %v2597_v4 = vpop.eup %2596 }
 0x229   :  { %v2599_v12 = vpop.eup %2598 }
 0x22a   :  { %v2601_v52 = vpop.eup %2600  ;;  %v762_v63 = vmul.f32 %v2599_v12, %v2597_v4 }
 0x22d   :  { %v2603_v43 = vpop.eup %2602 }
 0x22e   :  { %v763_v61 = vmul.f32 %v2603_v43, %v2601_v52 }
 0x230   :  { %v764_v59 = vpack.c.bf16 %v763_v61, %v762_v63 }
 0x232   :  { %2476 = vst [vmem:[%s3586_s4 + $0x8] sm:$0xff] %v764_v59   ;;  %901 = vmatmul.mubr.bf16.vlgmr.msra.gmra.mxu0 %v764_v59  ;;  %944 = vmatmul.mubr.bf16.vlgmr.msra.gmra.mxu1 %v764_v59 }
 0x233   :  { %1043 = vmatpush1.bf16.msra.mxu0 %v2908_v10  ;;  %1060 = vmatprep.mubr.bf16.mxu0 %v3602_v49 }
 0x234   :  { %1086 = vmatpush1.bf16.msra.mxu1 %v2911_v11  ;;  %1103 = vmatprep.mubr.bf16.mxu1 %v3602_v49 }
 0x235   :  { %1114 = vmatprep.subr.bf16.mxu0 %v2901_v9  ;;  %1157 = vmatprep.subr.bf16.mxu1 %v2913_v13  ;;  %v3604_v9 = vld [vmem:[#allocation9_spill] sm:$0xff]  ;;  %v3605_v13 = vld [vmem:[#allocation7_spill] sm:$0xff] }
 0x23a   :  { %2343 = vmatmul.mubr.msk.bf16.vlgmr.msra.gmra.mxu0 %vm113_vm1, %v1024_v44  ;;  %2345 = vmatmul.mubr.msk.bf16.vlgmr.msra.gmra.mxu1 %vm113_vm1, %v1024_v44 }
 0x23b   :  { %1115 = vmatpush1.bf16.msra.mxu0 %v2915_v14  ;;  %1158 = vmatpush1.bf16.msra.mxu1 %v2919_v15  ;;  %v3606_v14 = vld [vmem:[#allocation8_spill] sm:$0xff]  ;;  %v816_v15 = vpop.f32.mrf.mxu0 }
 0x23c   :  { %1116 = vmatprep.subr.bf16.mxu0 %v2923_v16  ;;  %1159 = vmatprep.subr.bf16.mxu1 %v2925_v17  ;;  %v859_v16 = vpop.f32.mrf.mxu1  ;;  %v817_v46 = vadd.f32 %v816_v15, %v3070_v58 }
 0x23d   :  { %1146 = vmatprep.mubr.bf16.mxu0 %v3602_v49  ;;  %1189 = vmatprep.mubr.bf16.mxu1 %v3602_v49  ;;  %v818_v17 = vpop.f32.mrf.mxu0 }
 0x23e   :  { %v819_v0 = vadd.f32 %v818_v17, %v3072_v60  ;;  %v860_v17 = vadd.f32 %v859_v16, %v3080_v3 }
 0x23f   :  { %1117 = vmatpush1.bf16.msra.mxu0 %v2929_v18  ;;  %1160 = vmatpush1.bf16.msra.mxu1 %v2933_v19  ;;  %v861_v18 = vpop.f32.mrf.mxu1  ;;  %v820_v5 = vpop.f32.mrf.mxu0 }
 0x240   :  { %1118 = vmatprep.subr.bf16.mxu0 %v2937_v20  ;;  %1161 = vmatprep.subr.bf16.mxu1 %v2939_v21  ;;  %v821_v56 = vadd.f32 %v820_v5, %v3070_v58  ;;  %v862_v44 = vadd.f32 %v861_v18, %v3078_v62 }
 0x241   :  { %v863_v53 = vpop.f32.mrf.mxu1  ;;  %v822_v1 = vpop.f32.mrf.mxu0 }
 0x242   :  { %v823_v4 = vadd.f32 %v822_v1, %v3072_v60 }
 0x243   :  { %1119 = vmatpush1.bf16.msra.mxu0 %v2943_v22  ;;  %1162 = vmatpush1.bf16.msra.mxu1 %v2945_v23  ;;  %v865_v8 = vpop.f32.mrf.mxu1 }
 0x244   :  { %1120 = vmatprep.subr.bf16.mxu0 %v2949_v24  ;;  %1163 = vmatprep.subr.bf16.mxu1 %v2953_v25  ;;  %v866_v5 = vadd.f32 %v865_v8, %v3078_v62 }
 0x247   :  { %1121 = vmatpush1.bf16.msra.mxu0 %v2955_v26  ;;  %1164 = vmatpush1.bf16.msra.mxu1 %v2959_v27 }
 0x248   :  { %1122 = vmatprep.subr.bf16.mxu0 %v2963_v28  ;;  %1165 = vmatprep.subr.bf16.mxu1 %v2965_v29 }
 0x24b   :  { %1123 = vmatpush1.bf16.msra.mxu0 %v2967_v30  ;;  %1166 = vmatpush1.bf16.msra.mxu1 %v2969_v31 }
 0x24c   :  { %1124 = vmatprep.subr.bf16.mxu0 %v2973_v32  ;;  %1167 = vmatprep.subr.bf16.mxu1 %v2977_v33 }
 0x24f   :  { %1125 = vmatpush1.bf16.msra.mxu0 %v2981_v34  ;;  %1168 = vmatpush1.bf16.msra.mxu1 %v2983_v35 }
 0x250   :  { %1126 = vmatprep.subr.bf16.mxu0 %v2987_v36  ;;  %1169 = vmatprep.subr.bf16.mxu1 %v2989_v37 }
 0x253   :  { %1127 = vmatpush1.bf16.msra.mxu0 %v2993_v38  ;;  %1170 = vmatpush1.bf16.msra.mxu1 %v2995_v39 }
 0x254   :  { %1128 = vmatprep.subr.bf16.mxu0 %v2999_v40  ;;  %1171 = vmatprep.subr.bf16.mxu1 %v3001_v41 }
 0x257   :  { %1129 = vmatpush1.bf16.msra.mxu0 %v3005_v42  ;;  %1172 = vmatpush1.bf16.msra.mxu1 %v3604_v9 }
 0x258   :  { %2358 = vmatprep.subr.msk.bf16.mxu0 %vm117_vm0, %v3605_v13  ;;  %2360 = vmatprep.subr.msk.bf16.mxu1 %vm117_vm0, %v3606_v14 }
 0x2f2   :  { %v902_v7 = vpop.f32.mrf.mxu0  ;;  %v945_v50 = vpop.f32.mrf.mxu1 }
 0x2f3   :  { %v954_v47 = vadd.f32 %v902_v7, %v817_v46  ;;  %v956_v46 = vadd.f32 %v945_v50, %v860_v17 }
 0x2f4   :  { %v904_v55 = vpop.f32.mrf.mxu0  ;;  %v947_v52 = vpop.f32.mrf.mxu1 }
 0x2f5   :  { %v2330_v54 = vmul.f32 -1.442695, %v954_v47  ;;  %v955_v48 = vadd.f32 %v904_v55, %v819_v0  ;;  %v957_v1 = vadd.f32 %v947_v52, %v862_v44 }
 0x2f6   :  { %v906_v51 = vpop.f32.mrf.mxu0  ;;  %v949_v45 = vpop.f32.mrf.mxu1 }
 0x2f7   :  { %2604 = vpow2.f32 %v2330_v54  ;;  %v2332_v12 = vmul.f32 -1.442695, %v955_v48  ;;  %v958_v43 = vadd.f32 %v906_v51, %v821_v56  ;;  %v2334_v47 = vmul.f32 -1.442695, %v957_v1 }
 0x2f8   :  { %v908_v63 = vpop.f32.mrf.mxu0  ;;  %v951_v15 = vpop.f32.mrf.mxu1  ;;  %v864_v54 = vadd.f32 %v863_v53, %v3080_v3 }
 0x2f9   :  { %2606 = vpow2.f32 %v2332_v12  ;;  %v2331_v61 = vmul.f32 -1.442695, %v958_v43  ;;  %v959_v59 = vadd.f32 %v908_v63, %v823_v4  ;;  %v961_v7 = vadd.f32 %v951_v15, %v866_v5 }
 0x2fa   :  { %v960_v18 = vadd.f32 %v949_v45, %v864_v54 }
 0x2fb   :  { %2608 = vpow2.f32 %v2331_v61  ;;  %v2333_v57 = vmul.f32 -1.442695, %v959_v59  ;;  %v2335_v48 = vmul.f32 -1.442695, %v961_v7 }
 0x2fd   :  { %2610 = vpow2.f32 %v2333_v57 }
 0x2fe   :  { %2612 = vtanh.f32 %v956_v46 }
 0x304   :  { %v2605_v0 = vpop.eup %2604 }
 0x305   :  { %v968_v55 = vadd.f32 1.0, %v2605_v0 }
 0x306   :  { %v2607_v56 = vpop.eup %2606 }
 0x307   :  { %2614 = vrcp.f32 %v968_v55  ;;  %v980_v51 = vadd.f32 1.0, %v2607_v56 }
 0x308   :  { %v2609_v4 = vpop.eup %2608  ;;  %2616 = vpow2.f32 %v2334_v47 }
 0x309   :  { %2618 = vrcp.f32 %v980_v51  ;;  %v969_v16 = vadd.f32 1.0, %v2609_v4  ;;  %v3240_v51 = vld [vmem:[#allocation4 + $0xec] ss:$16 sps:$4 sm:$0xff]   ;;  %v2356_v4 = vld [vmem:[%s3582_s0 + $0x40] sm:$0xff] }
 0x30a   :  { %v2611_v12 = vpop.eup %2610  ;;  %2620 = vpow2.f32 %v2335_v48 }
 0x30b   :  { %2622 = vrcp.f32 %v969_v16  ;;  %v981_v8 = vadd.f32 1.0, %v2611_v12  ;;  %v2613_v50 = vpop.eup %2612  ;;  %v3251_v12 = vld [vmem:[#allocation4 + $0xe0] ss:$16 sps:$4 sm:$0xff]  }
 0x30c   :  { %2624 = vtanh.f32 %v960_v18  ;;  %v2357_v18 = vld [vmem:[%s3582_s0 + $0x48] sm:$0xff] }
 0x30d   :  { %2626 = vrcp.f32 %v981_v8  ;;  %v1270_v16 = vpack.c.bf16 %v2357_v18, %v2356_v4  ;;  %v3254_v8 = vld [vmem:[#allocation4 + $0xe8] ss:$16 sps:$4 sm:$0xff]  }
 0x314   :  { %v2615_v52 = vpop.eup %2614 }
 0x315   :  { %v2617_v43 = vpop.eup %2616  ;;  %v1002_v61 = vmul.f32 %v2615_v52, %v2613_v50  ;;  %v3257_v50 = vld [vmem:[#allocation4 + $0xc4] ss:$16 sps:$4 sm:$0xff]   ;;  %v3260_v52 = vld [vmem:[#allocation4 + $0xcc] ss:$16 sps:$4 sm:$0xff]  }
 0x316   :  { %v2619_v63 = vpop.eup %2618  ;;  %v994_v44 = vadd.f32 1.0, %v2617_v43  ;;  %v3265_v43 = vld [vmem:[#allocation4 + $0xc0] ss:$16 sps:$4 sm:$0xff]  }
 0x317   :  { %v2621_v53 = vpop.eup %2620  ;;  %v1000_v59 = vmul.f32 %v2619_v63, %v3154_v2 }
 0x318   :  { %v2623_v57 = vpop.eup %2622  ;;  %v995_v5 = vadd.f32 1.0, %v2621_v53  ;;  %2628 = vrcp.f32 %v994_v44 }
 0x319   :  { %v2625_v15 = vpop.eup %2624  ;;  %v3223_v45 = vadd.f32 %v1002_v61, %v1000_v59 }
 0x31a   :  { %v2627_v17 = vpop.eup %2626  ;;  %v1003_v1 = vmul.f32 %v2625_v15, %v2623_v57 }
 0x31b   :  { %v1001_v46 = vmul.f32 %v2627_v17, %v3157_v6  ;;  %2630 = vtanh.f32 %v3223_v45  ;;  %v3237_v6 = vld [vmem:[#allocation4 + $0xe4] ss:$16 sps:$4 sm:$0xff]  }
 0x31c   :  { %2632 = vrcp.f32 %v995_v5 }
 0x31d   :  { %v3226_v7 = vadd.f32 %v1003_v1, %v1001_v46 }
 0x31f   :  { %2634 = vtanh.f32 %v3226_v7 }
 0x325   :  { %v2629_v0 = vpop.eup %2628 }
 0x328   :  { %v2631_v2 = vpop.eup %2630 }
 0x329   :  { %v2633_v47 = vpop.eup %2632  ;;  %v1008_v56 = vmul.f32 %v2631_v2, %v2629_v0 }
 0x32c   :  { %v2635_v55 = vpop.eup %2634 }
 0x32d   :  { %v1009_v54 = vmul.f32 %v2635_v55, %v2633_v47 }
 0x32f   :  { %v1010_v48 = vpack.c.bf16 %v1009_v54, %v1008_v56 }
 0x331   :  { %2477 = vst [vmem:[%s3586_s4 + $0x10] sm:$0xff] %v1010_v48   ;;  %1147 = vmatmul.mubr.bf16.vlgmr.msra.gmra.mxu0 %v1010_v48  ;;  %1190 = vmatmul.mubr.bf16.vlgmr.msra.gmra.mxu1 %v1010_v48 }
 0x332   :  { %1289 = vmatpush1.bf16.msra.mxu0 %v2908_v10  ;;  %1306 = vmatprep.mubr.bf16.mxu0 %v3602_v49 }
 0x333   :  { %1332 = vmatpush1.bf16.msra.mxu1 %v2911_v11  ;;  %1349 = vmatprep.mubr.bf16.mxu1 %v3602_v49 }
 0x334   :  { %1360 = vmatprep.subr.bf16.mxu0 %v3237_v6  ;;  %1403 = vmatprep.subr.bf16.mxu1 %v3240_v51 }
 0x339   :  { %2359 = vmatmul.mubr.msk.bf16.vlgmr.msra.gmra.mxu0 %vm113_vm1, %v1270_v16  ;;  %2361 = vmatmul.mubr.msk.bf16.vlgmr.msra.gmra.mxu1 %vm113_vm1, %v1270_v16 }
 0x33a   :  { %1361 = vmatpush1.bf16.msra.mxu0 %v3251_v12  ;;  %1404 = vmatpush1.bf16.msra.mxu1 %v3254_v8 }
 0x33b   :  { %1362 = vmatprep.subr.bf16.mxu0 %v3257_v50  ;;  %1405 = vmatprep.subr.bf16.mxu1 %v3260_v52 }
 0x33c   :  { %1392 = vmatprep.mubr.bf16.mxu0 %v3602_v49  ;;  %1435 = vmatprep.mubr.bf16.mxu1 %v3602_v49 }
 0x33e   :  { %1363 = vmatpush1.bf16.msra.mxu0 %v3265_v43  ;;  %1406 = vmatpush1.bf16.msra.mxu1 %v2933_v19  ;;  %v1062_v19 = vpop.f32.mrf.mxu0 }
 0x33f   :  { %1364 = vmatprep.subr.bf16.mxu0 %v2937_v20  ;;  %1407 = vmatprep.subr.bf16.mxu1 %v2939_v21  ;;  %v1105_v20 = vpop.f32.mrf.mxu1 }
 0x340   :  { %v1064_v21 = vpop.f32.mrf.mxu0  ;;  %v1106_v57 = vadd.f32 %v1105_v20, %v3080_v3 }
 0x342   :  { %1365 = vmatpush1.bf16.msra.mxu0 %v2943_v22  ;;  %1408 = vmatpush1.bf16.msra.mxu1 %v2945_v23  ;;  %v1107_v22 = vpop.f32.mrf.mxu1  ;;  %v1066_v23 = vpop.f32.mrf.mxu0 }
 0x343   :  { %1366 = vmatprep.subr.bf16.mxu0 %v2949_v24  ;;  %1409 = vmatprep.subr.bf16.mxu1 %v2953_v25  ;;  %v1108_v61 = vadd.f32 %v1107_v22, %v3078_v62 }
 0x344   :  { %v1109_v24 = vpop.f32.mrf.mxu1  ;;  %v1068_v25 = vpop.f32.mrf.mxu0 }
 0x345   :  { %v1110_v47 = vadd.f32 %v1109_v24, %v3080_v3 }
 0x346   :  { %1367 = vmatpush1.bf16.msra.mxu0 %v2955_v26  ;;  %1410 = vmatpush1.bf16.msra.mxu1 %v2959_v27  ;;  %v1063_v26 = vadd.f32 %v1062_v19, %v3070_v58  ;;  %v1111_v27 = vpop.f32.mrf.mxu1 }
 0x347   :  { %1368 = vmatprep.subr.bf16.mxu0 %v2963_v28  ;;  %1411 = vmatprep.subr.bf16.mxu1 %v2965_v29  ;;  %v1065_v29 = vadd.f32 %v1064_v21, %v3072_v60  ;;  %v1112_v44 = vadd.f32 %v1111_v27, %v3078_v62 }
 0x34a   :  { %1369 = vmatpush1.bf16.msra.mxu0 %v2967_v30  ;;  %1412 = vmatpush1.bf16.msra.mxu1 %v2969_v31 }
 0x34b   :  { %1370 = vmatprep.subr.bf16.mxu0 %v2973_v32  ;;  %1413 = vmatprep.subr.bf16.mxu1 %v2977_v33  ;;  %v1067_v33 = vadd.f32 %v1066_v23, %v3070_v58 }
 0x34e   :  { %1371 = vmatpush1.bf16.msra.mxu0 %v2981_v34  ;;  %1414 = vmatpush1.bf16.msra.mxu1 %v2983_v35 }
 0x34f   :  { %1372 = vmatprep.subr.bf16.mxu0 %v2987_v36  ;;  %1415 = vmatprep.subr.bf16.mxu1 %v2989_v37  ;;  %v1069_v37 = vadd.f32 %v1068_v25, %v3072_v60 }
 0x352   :  { %1373 = vmatpush1.bf16.msra.mxu0 %v2993_v38  ;;  %1416 = vmatpush1.bf16.msra.mxu1 %v2995_v39 }
 0x353   :  { %1374 = vmatprep.subr.bf16.mxu0 %v2999_v40  ;;  %1417 = vmatprep.subr.bf16.mxu1 %v3001_v41 }
 0x356   :  { %1375 = vmatpush1.bf16.msra.mxu0 %v3005_v42  ;;  %1418 = vmatpush1.bf16.msra.mxu1 %v3604_v9 }
 0x357   :  { %2374 = vmatprep.subr.msk.bf16.mxu0 %vm117_vm0, %v3605_v13  ;;  %2376 = vmatprep.subr.msk.bf16.mxu1 %vm117_vm0, %v3606_v14 }
 0x3f1   :  { %v1148_v28 = vpop.f32.mrf.mxu0  ;;  %v1191_v31 = vpop.f32.mrf.mxu1 }
 0x3f2   :  { %v1200_v30 = vadd.f32 %v1148_v28, %v1063_v26  ;;  %v1202_v17 = vadd.f32 %v1191_v31, %v1106_v57  ;;  %v3352_v57 = vld [vmem:[#allocation4 + $0x84] ss:$16 sps:$4 sm:$0xff]  }
 0x3f3   :  { %v1150_v32 = vpop.f32.mrf.mxu0  ;;  %v1193_v39 = vpop.f32.mrf.mxu1 }
 0x3f4   :  { %v2346_v34 = vmul.f32 -1.442695, %v1200_v30  ;;  %v1201_v35 = vadd.f32 %v1150_v32, %v1065_v29  ;;  %v1203_v15 = vadd.f32 %v1193_v39, %v1108_v61  ;;  %v3346_v61 = vld [vmem:[#allocation4 + $0xa0] ss:$16 sps:$4 sm:$0xff]  }
 0x3f5   :  { %v1152_v36 = vpop.f32.mrf.mxu0  ;;  %v1195_v63 = vpop.f32.mrf.mxu1 }
 0x3f6   :  { %2636 = vpow2.f32 %v2346_v34  ;;  %v2348_v38 = vmul.f32 -1.442695, %v1201_v35  ;;  %v1204_v40 = vadd.f32 %v1152_v36, %v1067_v33  ;;  %v2350_v46 = vmul.f32 -1.442695, %v1203_v15  ;;  %v3358_v15 = vld [vmem:[#allocation4 + $0x80] ss:$16 sps:$4 sm:$0xff]  }
 0x3f7   :  { %v1154_v41 = vpop.f32.mrf.mxu0  ;;  %v1197_v59 = vpop.f32.mrf.mxu1  ;;  %v1206_v48 = vadd.f32 %v1195_v63, %v1110_v47  ;;  %v3340_v63 = vld [vmem:[#allocation4 + $0xa4] ss:$16 sps:$4 sm:$0xff]   ;;  %v3379_v47 = vld [vmem:[#allocation4 + $0x4c] ss:$16 sps:$4 sm:$0xff]  }
 0x3f8   :  { %2638 = vpow2.f32 %v2348_v38  ;;  %v2347_v42 = vmul.f32 -1.442695, %v1204_v40  ;;  %v1205_v9 = vadd.f32 %v1154_v41, %v1069_v37  ;;  %v1207_v5 = vadd.f32 %v1197_v59, %v1112_v44  ;;  %v2373_v41 = vld [vmem:[%s3582_s0 + $0x58] sm:$0xff] }
 0x3f9   :  { %v3349_v59 = vld [vmem:[#allocation4 + $0xa8] ss:$16 sps:$4 sm:$0xff]   ;;  %v3355_v44 = vld [vmem:[#allocation4 + $0x8c] ss:$16 sps:$4 sm:$0xff]  }
 0x3fa   :  { %2640 = vpow2.f32 %v2347_v42  ;;  %v2349_v53 = vmul.f32 -1.442695, %v1205_v9  ;;  %v2351_v55 = vmul.f32 -1.442695, %v1207_v5  ;;  %v3337_v9 = vld [vmem:[#allocation4 + $0xc8] ss:$16 sps:$4 sm:$0xff]  }
 0x3fb   :  { %v3364_v5 = vld [vmem:[#allocation4 + $0x64] ss:$16 sps:$4 sm:$0xff]  }
 0x3fc   :  { %2642 = vpow2.f32 %v2349_v53  ;;  %v3343_v53 = vld [vmem:[#allocation4 + $0xac] ss:$16 sps:$4 sm:$0xff]  }
 0x3fd   :  { %2644 = vtanh.f32 %v1202_v17  ;;  %v3361_v17 = vld [vmem:[#allocation4 + $0x88] ss:$16 sps:$4 sm:$0xff]  }
 0x403   :  { %v2637_v1 = vpop.eup %2636 }
 0x404   :  { %v1214_v0 = vadd.f32 1.0, %v2637_v1  ;;  %v3367_v1 = vld [vmem:[#allocation4 + $0x6c] ss:$16 sps:$4 sm:$0xff]  }
 0x405   :  { %v2639_v2 = vpop.eup %2638 }
 0x406   :  { %2646 = vrcp.f32 %v1214_v0  ;;  %v1226_v56 = vadd.f32 1.0, %v2639_v2  ;;  %v3373_v0 = vld [vmem:[#allocation4 + $0x68] ss:$16 sps:$4 sm:$0xff]   ;;  %v3376_v2 = vld [vmem:[#allocation4 + $0x44] ss:$16 sps:$4 sm:$0xff]  }
 0x407   :  { %v2641_v54 = vpop.eup %2640  ;;  %2648 = vpow2.f32 %v2350_v46  ;;  %v3370_v46 = vld [vmem:[#allocation4 + $0x60] ss:$16 sps:$4 sm:$0xff]  }
 0x408   :  { %2650 = vrcp.f32 %v1226_v56  ;;  %v1215_v4 = vadd.f32 1.0, %v2641_v54  ;;  %v3385_v56 = vld [vmem:[#allocation4 + $0x48] ss:$16 sps:$4 sm:$0xff]   ;;  %v3388_v54 = vld [vmem:[#allocation4 + $0x24] ss:$16 sps:$4 sm:$0xff]  }
 0x409   :  { %v2643_v18 = vpop.eup %2642  ;;  %2652 = vpow2.f32 %v2351_v55  ;;  %v3382_v55 = vld [vmem:[#allocation4 + $0x40] ss:$16 sps:$4 sm:$0xff]  }
 0x40a   :  { %2654 = vrcp.f32 %v1215_v4  ;;  %v1227_v16 = vadd.f32 1.0, %v2643_v18  ;;  %v2645_v19 = vpop.eup %2644  ;;  %v3394_v4 = vld [vmem:[#allocation4 + $0x20] ss:$16 sps:$4 sm:$0xff]   ;;  %v3397_v18 = vld [vmem:[#allocation4 + $0x28] ss:$16 sps:$4 sm:$0xff]  }
 0x40b   :  { %2656 = vtanh.f32 %v1206_v48  ;;  %v3391_v48 = vld [vmem:[#allocation4 + $0x2c] ss:$16 sps:$4 sm:$0xff]  }
 0x40c   :  { %2658 = vrcp.f32 %v1227_v16  ;;  %v3400_v16 = vld [vmem:[#allocation4 + $0x4] ss:$16 sps:$4 sm:$0xff]  }
 0x413   :  { %v2647_v20 = vpop.eup %2646 }
 0x414   :  { %v2649_v21 = vpop.eup %2648  ;;  %v1248_v24 = vmul.f32 %v2647_v20, %v2645_v19  ;;  %v3403_v19 = vld [vmem:[#allocation4 + $0xc] ss:$16 sps:$4 sm:$0xff]   ;;  %v3406_v20 = vld [vmem:[#allocation4] ss:$16 sps:$4 sm:$0xff]  }
 0x415   :  { %v2651_v22 = vpop.eup %2650  ;;  %v1240_v27 = vadd.f32 1.0, %v2649_v21  ;;  %v3409_v21 = vld [vmem:[#allocation4 + $0x8] ss:$16 sps:$4 sm:$0xff]  }
 0x416   :  { %v2653_v23 = vpop.eup %2652  ;;  %v1246_v25 = vmul.f32 %v2651_v22, %v3223_v45  ;;  %3607 = vst [vmem:[#allocation9_spill] sm:$0xff] %v3409_v21  ;;  %v1308_v22 = vpop.f32.mrf.mxu0 }
 0x417   :  { %v2655_v26 = vpop.eup %2654  ;;  %v1241_v31 = vadd.f32 1.0, %v2653_v23  ;;  %2660 = vrcp.f32 %v1240_v27  ;;  %v1351_v23 = vpop.f32.mrf.mxu1 }
 0x418   :  { %v2657_v28 = vpop.eup %2656  ;;  %v3306_v29 = vadd.f32 %v1248_v24, %v1246_v25  ;;  %v1310_v24 = vpop.f32.mrf.mxu0 }
 0x419   :  { %v2659_v30 = vpop.eup %2658  ;;  %v1249_v32 = vmul.f32 %v2657_v28, %v2655_v26  ;;  %v1353_v25 = vpop.f32.mrf.mxu1 }
 0x41a   :  { %v1247_v33 = vmul.f32 %v2659_v30, %v3226_v7  ;;  %2662 = vtanh.f32 %v3306_v29  ;;  %v2372_v7 = vld [vmem:[%s3582_s0 + $0x50] sm:$0xff]  ;;  %v1312_v26 = vpop.f32.mrf.mxu0  ;;  %v1309_v30 = vadd.f32 %v1308_v22, %v3070_v58 }
 0x41b   :  { %2664 = vrcp.f32 %v1241_v31  ;;  %v1516_v42 = vpack.c.bf16 %v2373_v41, %v2372_v7  ;;  %v1355_v27 = vpop.f32.mrf.mxu1 }
 0x41c   :  { %v3309_v34 = vadd.f32 %v1249_v32, %v1247_v33  ;;  %v1314_v28 = vpop.f32.mrf.mxu0  ;;  %v1311_v33 = vadd.f32 %v1310_v24, %v3072_v60 }
 0x41d   :  { %v1357_v31 = vpop.f32.mrf.mxu1  ;;  %v1315_v7 = vadd.f32 %v1314_v28, %v3072_v60 }
 0x41e   :  { %2666 = vtanh.f32 %v3309_v34 }
 0x424   :  { %v2661_v35 = vpop.eup %2660 }
 0x427   :  { %v2663_v45 = vpop.eup %2662 }
 0x428   :  { %v2665_v36 = vpop.eup %2664  ;;  %v1254_v38 = vmul.f32 %v2663_v45, %v2661_v35 }
 0x42b   :  { %v2667_v37 = vpop.eup %2666 }
 0x42c   :  { %v1255_v39 = vmul.f32 %v2667_v37, %v2665_v36  ;;  %v1313_v37 = vadd.f32 %v1312_v26, %v3070_v58 }
 0x42e   :  { %v1256_v40 = vpack.c.bf16 %v1255_v39, %v1254_v38 }
 0x430   :  { %2478 = vst [vmem:[%s3586_s4 + $0x18] sm:$0xff] %v1256_v40   ;;  %1393 = vmatmul.mubr.bf16.vlgmr.msra.gmra.mxu0 %v1256_v40  ;;  %1436 = vmatmul.mubr.bf16.vlgmr.msra.gmra.mxu1 %v1256_v40 }
 0x431   :  { %1535 = vmatpush1.bf16.msra.mxu0 %v2908_v10  ;;  %1552 = vmatprep.mubr.bf16.mxu0 %v3602_v49 }
 0x432   :  { %1578 = vmatpush1.bf16.msra.mxu1 %v2911_v11  ;;  %1595 = vmatprep.mubr.bf16.mxu1 %v3602_v49 }
 0x433   :  { %1606 = vmatprep.subr.bf16.mxu0 %v3237_v6  ;;  %1649 = vmatprep.subr.bf16.mxu1 %v3240_v51 }
 0x438   :  { %2375 = vmatmul.mubr.msk.bf16.vlgmr.msra.gmra.mxu0 %vm113_vm1, %v1516_v42  ;;  %2377 = vmatmul.mubr.msk.bf16.vlgmr.msra.gmra.mxu1 %vm113_vm1, %v1516_v42 }
 0x439   :  { %1607 = vmatpush1.bf16.msra.mxu0 %v3251_v12  ;;  %1650 = vmatpush1.bf16.msra.mxu1 %v3254_v8 }
 0x43a   :  { %1608 = vmatprep.subr.bf16.mxu0 %v3257_v50  ;;  %1651 = vmatprep.subr.bf16.mxu1 %v3260_v52 }
 0x43b   :  { %1638 = vmatprep.mubr.bf16.mxu0 %v3602_v49  ;;  %1681 = vmatprep.mubr.bf16.mxu1 %v3602_v49 }
 0x43d   :  { %1609 = vmatpush1.bf16.msra.mxu0 %v3265_v43  ;;  %1652 = vmatpush1.bf16.msra.mxu1 %v3337_v9 }
 0x43e   :  { %1610 = vmatprep.subr.bf16.mxu0 %v3340_v63  ;;  %1653 = vmatprep.subr.bf16.mxu1 %v3343_v53 }
 0x441   :  { %1611 = vmatpush1.bf16.msra.mxu0 %v3346_v61  ;;  %1654 = vmatpush1.bf16.msra.mxu1 %v3349_v59 }
 0x442   :  { %1612 = vmatprep.subr.bf16.mxu0 %v3352_v57  ;;  %1655 = vmatprep.subr.bf16.mxu1 %v3355_v44 }
 0x445   :  { %1613 = vmatpush1.bf16.msra.mxu0 %v3358_v15  ;;  %1656 = vmatpush1.bf16.msra.mxu1 %v3361_v17 }
 0x446   :  { %1614 = vmatprep.subr.bf16.mxu0 %v3364_v5  ;;  %1657 = vmatprep.subr.bf16.mxu1 %v3367_v1 }
 0x449   :  { %1615 = vmatpush1.bf16.msra.mxu0 %v3370_v46  ;;  %1658 = vmatpush1.bf16.msra.mxu1 %v3373_v0 }
 0x44a   :  { %1616 = vmatprep.subr.bf16.mxu0 %v3376_v2  ;;  %1659 = vmatprep.subr.bf16.mxu1 %v3379_v47 }
 0x44d   :  { %1617 = vmatpush1.bf16.msra.mxu0 %v3382_v55  ;;  %1660 = vmatpush1.bf16.msra.mxu1 %v3385_v56 }
 0x44e   :  { %1618 = vmatprep.subr.bf16.mxu0 %v3388_v54  ;;  %1661 = vmatprep.subr.bf16.mxu1 %v3391_v48 }
 0x451   :  { %1619 = vmatpush1.bf16.msra.mxu0 %v3394_v4  ;;  %1662 = vmatpush1.bf16.msra.mxu1 %v3397_v18 }
 0x452   :  { %1620 = vmatprep.subr.bf16.mxu0 %v3400_v16  ;;  %1663 = vmatprep.subr.bf16.mxu1 %v3403_v19 }
 0x455   :  { %1621 = vmatpush1.bf16.msra.mxu0 %v3406_v20  ;;  %1664 = vmatpush1.bf16.msra.mxu1 %v3409_v21 }
 0x456   :  { %2390 = vmatprep.subr.msk.bf16.mxu0 %vm117_vm0, %v3605_v13  ;;  %2392 = vmatprep.subr.msk.bf16.mxu1 %vm117_vm0, %v3606_v14 }
 0x4f0   :  { %v1394_v32 = vpop.f32.mrf.mxu0  ;;  %v1437_v45 = vpop.f32.mrf.mxu1 }
 0x4f1   :  { %v1446_v35 = vadd.f32 %v1394_v32, %v1309_v30  ;;  %v1354_v32 = vadd.f32 %v1353_v25, %v3078_v62 }
 0x4f2   :  { %v1396_v36 = vpop.f32.mrf.mxu0  ;;  %v1439_v42 = vpop.f32.mrf.mxu1 }
 0x4f3   :  { %v2362_v38 = vmul.f32 -1.442695, %v1446_v35  ;;  %v1447_v39 = vadd.f32 %v1396_v36, %v1311_v33  ;;  %v1352_v33 = vadd.f32 %v1351_v23, %v3080_v3  ;;  %v1358_v35 = vadd.f32 %v1357_v31, %v3078_v62 }
 0x4f4   :  { %v1398_v40 = vpop.f32.mrf.mxu0  ;;  %v1441_v24 = vpop.f32.mrf.mxu1  ;;  %v1449_v28 = vadd.f32 %v1439_v42, %v1354_v32 }
 0x4f5   :  { %2668 = vpow2.f32 %v2362_v38  ;;  %v2364_v41 = vmul.f32 -1.442695, %v1447_v39  ;;  %v1450_v14 = vadd.f32 %v1398_v40, %v1313_v37  ;;  %v1448_v36 = vadd.f32 %v1437_v45, %v1352_v33 }
 0x4f6   :  { %v1400_v13 = vpop.f32.mrf.mxu0  ;;  %v1443_v26 = vpop.f32.mrf.mxu1  ;;  %v2366_v37 = vmul.f32 -1.442695, %v1449_v28 }
 0x4f7   :  { %2670 = vpow2.f32 %v2364_v41  ;;  %v2363_v22 = vmul.f32 -1.442695, %v1450_v14  ;;  %v1451_v21 = vadd.f32 %v1400_v13, %v1315_v7  ;;  %v1453_v38 = vadd.f32 %v1443_v26, %v1358_v35 }
 0x4f8   :  { %v1356_v13 = vadd.f32 %v1355_v27, %v3080_v3 }
 0x4f9   :  { %2672 = vpow2.f32 %v2363_v22  ;;  %v2365_v30 = vmul.f32 -1.442695, %v1451_v21  ;;  %v2367_v14 = vmul.f32 -1.442695, %v1453_v38 }
 0x4fa   :  { %v1452_v25 = vadd.f32 %v1441_v24, %v1356_v13 }
 0x4fb   :  { %2674 = vpow2.f32 %v2365_v30 }
 0x4fc   :  { %2676 = vtanh.f32 %v1448_v36 }
 0x502   :  { %v2669_v39 = vpop.eup %2668 }
 0x503   :  { %v1460_v40 = vadd.f32 1.0, %v2669_v39 }
 0x504   :  { %v2671_v41 = vpop.eup %2670 }
 0x505   :  { %2678 = vrcp.f32 %v1460_v40  ;;  %v1472_v21 = vadd.f32 1.0, %v2671_v41 }
 0x506   :  { %v2673_v7 = vpop.eup %2672  ;;  %2680 = vpow2.f32 %v2366_v37 }
 0x507   :  { %2682 = vrcp.f32 %v1472_v21  ;;  %v1461_v23 = vadd.f32 1.0, %v2673_v7 }
 0x508   :  { %v2675_v22 = vpop.eup %2674  ;;  %2684 = vpow2.f32 %v2367_v14 }
 0x509   :  { %2686 = vrcp.f32 %v1461_v23  ;;  %v1473_v31 = vadd.f32 1.0, %v2675_v22  ;;  %v2677_v45 = vpop.eup %2676  ;;  %v2389_v22 = vld [vmem:[%s3582_s0 + $0x68] sm:$0xff] }
 0x50a   :  { %2688 = vtanh.f32 %v1452_v25 }
 0x50b   :  { %2690 = vrcp.f32 %v1473_v31 }
 0x512   :  { %v2679_v42 = vpop.eup %2678 }
 0x513   :  { %v2681_v30 = vpop.eup %2680  ;;  %v1494_v26 = vmul.f32 %v2679_v42, %v2677_v45  ;;  %v3608_v45 = vld [vmem:[#allocation9_spill] sm:$0xff]  ;;  %v3609_v42 = vld [vmem:[#allocation7_spill] sm:$0xff] }
 0x514   :  { %v2683_v32 = vpop.eup %2682  ;;  %v1486_v28 = vadd.f32 1.0, %v2681_v30  ;;  %v3610_v30 = vld [vmem:[#allocation8_spill] sm:$0xff] }
 0x515   :  { %v2685_v27 = vpop.eup %2684  ;;  %v1492_v33 = vmul.f32 %v2683_v32, %v3306_v29  ;;  %v1554_v32 = vpop.f32.mrf.mxu0 }
 0x516   :  { %v2687_v35 = vpop.eup %2686  ;;  %v1487_v39 = vadd.f32 1.0, %v2685_v27  ;;  %2692 = vrcp.f32 %v1486_v28  ;;  %v1597_v27 = vpop.f32.mrf.mxu1 }
 0x517   :  { %v2689_v36 = vpop.eup %2688  ;;  %v3425_v24 = vadd.f32 %v1494_v26, %v1492_v33  ;;  %v1556_v26 = vpop.f32.mrf.mxu0 }
 0x518   :  { %v2691_v38 = vpop.eup %2690  ;;  %v1495_v37 = vmul.f32 %v2689_v36, %v2687_v35  ;;  %v1599_v33 = vpop.f32.mrf.mxu1 }
 0x519   :  { %v1493_v40 = vmul.f32 %v2691_v38, %v3309_v34  ;;  %2694 = vtanh.f32 %v3425_v24  ;;  %v2388_v34 = vld [vmem:[%s3582_s0 + $0x60] sm:$0xff]  ;;  %v1558_v35 = vpop.f32.mrf.mxu0  ;;  %v1555_v38 = vadd.f32 %v1554_v32, %v3070_v58 }
 0x51a   :  { %2696 = vrcp.f32 %v1487_v39  ;;  %v1762_v31 = vpack.c.bf16 %v2389_v22, %v2388_v34  ;;  %v1601_v28 = vpop.f32.mrf.mxu1 }
 0x51b   :  { %v3428_v41 = vadd.f32 %v1495_v37, %v1493_v40  ;;  %v1560_v36 = vpop.f32.mrf.mxu0  ;;  %v1557_v40 = vadd.f32 %v1556_v26, %v3072_v60 }
 0x51c   :  { %v1603_v39 = vpop.f32.mrf.mxu1  ;;  %v1561_v34 = vadd.f32 %v1560_v36, %v3072_v60 }
 0x51d   :  { %2698 = vtanh.f32 %v3428_v41 }
 0x523   :  { %v2693_v13 = vpop.eup %2692 }
 0x526   :  { %v2695_v29 = vpop.eup %2694 }
 0x527   :  { %v2697_v14 = vpop.eup %2696  ;;  %v1500_v7 = vmul.f32 %v2695_v29, %v2693_v13 }
 0x52a   :  { %v2699_v21 = vpop.eup %2698 }
 0x52b   :  { %v1501_v25 = vmul.f32 %v2699_v21, %v2697_v14  ;;  %v1559_v21 = vadd.f32 %v1558_v35, %v3070_v58 }
 0x52d   :  { %v1502_v23 = vpack.c.bf16 %v1501_v25, %v1500_v7 }
 0x52f   :  { %2479 = vst [vmem:[%s3586_s4 + $0x20] sm:$0xff] %v1502_v23   ;;  %1639 = vmatmul.mubr.bf16.vlgmr.msra.gmra.mxu0 %v1502_v23  ;;  %1682 = vmatmul.mubr.bf16.vlgmr.msra.gmra.mxu1 %v1502_v23 }
 0x530   :  { %1781 = vmatpush1.bf16.msra.mxu0 %v2908_v10  ;;  %1798 = vmatprep.mubr.bf16.mxu0 %v3602_v49 }
 0x531   :  { %1824 = vmatpush1.bf16.msra.mxu1 %v2911_v11  ;;  %1841 = vmatprep.mubr.bf16.mxu1 %v3602_v49 }
 0x532   :  { %1852 = vmatprep.subr.bf16.mxu0 %v3237_v6  ;;  %1895 = vmatprep.subr.bf16.mxu1 %v3240_v51 }
 0x537   :  { %2391 = vmatmul.mubr.msk.bf16.vlgmr.msra.gmra.mxu0 %vm113_vm1, %v1762_v31  ;;  %2393 = vmatmul.mubr.msk.bf16.vlgmr.msra.gmra.mxu1 %vm113_vm1, %v1762_v31 }
 0x538   :  { %1853 = vmatpush1.bf16.msra.mxu0 %v3251_v12  ;;  %1896 = vmatpush1.bf16.msra.mxu1 %v3254_v8 }
 0x539   :  { %1854 = vmatprep.subr.bf16.mxu0 %v3257_v50  ;;  %1897 = vmatprep.subr.bf16.mxu1 %v3260_v52 }
 0x53a   :  { %1884 = vmatprep.mubr.bf16.mxu0 %v3602_v49  ;;  %1927 = vmatprep.mubr.bf16.mxu1 %v3602_v49 }
 0x53c   :  { %1855 = vmatpush1.bf16.msra.mxu0 %v3265_v43  ;;  %1898 = vmatpush1.bf16.msra.mxu1 %v3337_v9 }
 0x53d   :  { %1856 = vmatprep.subr.bf16.mxu0 %v3340_v63  ;;  %1899 = vmatprep.subr.bf16.mxu1 %v3343_v53 }
 0x540   :  { %1857 = vmatpush1.bf16.msra.mxu0 %v3346_v61  ;;  %1900 = vmatpush1.bf16.msra.mxu1 %v3349_v59 }
 0x541   :  { %1858 = vmatprep.subr.bf16.mxu0 %v3352_v57  ;;  %1901 = vmatprep.subr.bf16.mxu1 %v3355_v44 }
 0x544   :  { %1859 = vmatpush1.bf16.msra.mxu0 %v3358_v15  ;;  %1902 = vmatpush1.bf16.msra.mxu1 %v3361_v17 }
 0x545   :  { %1860 = vmatprep.subr.bf16.mxu0 %v3364_v5  ;;  %1903 = vmatprep.subr.bf16.mxu1 %v3367_v1 }
 0x548   :  { %1861 = vmatpush1.bf16.msra.mxu0 %v3370_v46  ;;  %1904 = vmatpush1.bf16.msra.mxu1 %v3373_v0 }
 0x549   :  { %1862 = vmatprep.subr.bf16.mxu0 %v3376_v2  ;;  %1905 = vmatprep.subr.bf16.mxu1 %v3379_v47 }
 0x54c   :  { %1863 = vmatpush1.bf16.msra.mxu0 %v3382_v55  ;;  %1906 = vmatpush1.bf16.msra.mxu1 %v3385_v56 }
 0x54d   :  { %1864 = vmatprep.subr.bf16.mxu0 %v3388_v54  ;;  %1907 = vmatprep.subr.bf16.mxu1 %v3391_v48 }
 0x550   :  { %1865 = vmatpush1.bf16.msra.mxu0 %v3394_v4  ;;  %1908 = vmatpush1.bf16.msra.mxu1 %v3397_v18 }
 0x551   :  { %1866 = vmatprep.subr.bf16.mxu0 %v3400_v16  ;;  %1909 = vmatprep.subr.bf16.mxu1 %v3403_v19 }
 0x554   :  { %1867 = vmatpush1.bf16.msra.mxu0 %v3406_v20  ;;  %1910 = vmatpush1.bf16.msra.mxu1 %v3608_v45 }
 0x555   :  { %2406 = vmatprep.subr.msk.bf16.mxu0 %vm117_vm0, %v3609_v42  ;;  %2408 = vmatprep.subr.msk.bf16.mxu1 %vm117_vm0, %v3610_v30 }
 0x5ef   :  { %v1640_v37 = vpop.f32.mrf.mxu0  ;;  %v1683_v29 = vpop.f32.mrf.mxu1 }
 0x5f0   :  { %v1692_v13 = vadd.f32 %v1640_v37, %v1555_v38  ;;  %v1600_v37 = vadd.f32 %v1599_v33, %v3078_v62 }
 0x5f1   :  { %v1642_v14 = vpop.f32.mrf.mxu0  ;;  %v1685_v31 = vpop.f32.mrf.mxu1 }
 0x5f2   :  { %v2378_v7 = vmul.f32 -1.442695, %v1692_v13  ;;  %v1693_v25 = vadd.f32 %v1642_v14, %v1557_v40  ;;  %v1598_v40 = vadd.f32 %v1597_v27, %v3080_v3  ;;  %v1604_v13 = vadd.f32 %v1603_v39, %v3078_v62 }
 0x5f3   :  { %v1644_v23 = vpop.f32.mrf.mxu0  ;;  %v1687_v26 = vpop.f32.mrf.mxu1  ;;  %v1695_v36 = vadd.f32 %v1685_v31, %v1600_v37 }
 0x5f4   :  { %2700 = vpow2.f32 %v2378_v7  ;;  %v2380_v22 = vmul.f32 -1.442695, %v1693_v25  ;;  %v1696_v42 = vadd.f32 %v1644_v23, %v1559_v21  ;;  %v1694_v14 = vadd.f32 %v1683_v29, %v1598_v40 }
 0x5f5   :  { %v1646_v30 = vpop.f32.mrf.mxu0  ;;  %v1689_v35 = vpop.f32.mrf.mxu1  ;;  %v2382_v21 = vmul.f32 -1.442695, %v1695_v36 }
 0x5f6   :  { %2702 = vpow2.f32 %v2380_v22  ;;  %v2379_v32 = vmul.f32 -1.442695, %v1696_v42  ;;  %v1697_v45 = vadd.f32 %v1646_v30, %v1561_v34  ;;  %v1699_v7 = vadd.f32 %v1689_v35, %v1604_v13 }
 0x5f7   :  { %v1602_v34 = vadd.f32 %v1601_v28, %v3080_v3 }
 0x5f8   :  { %2704 = vpow2.f32 %v2379_v32  ;;  %v2381_v38 = vmul.f32 -1.442695, %v1697_v45  ;;  %v2383_v42 = vmul.f32 -1.442695, %v1699_v7 }
 0x5f9   :  { %v1698_v33 = vadd.f32 %v1687_v26, %v1602_v34 }
 0x5fa   :  { %2706 = vpow2.f32 %v2381_v38 }
 0x5fb   :  { %2708 = vtanh.f32 %v1694_v14 }
 0x601   :  { %v2701_v25 = vpop.eup %2700 }
 0x602   :  { %v1706_v23 = vadd.f32 1.0, %v2701_v25 }
 0x603   :  { %v2703_v22 = vpop.eup %2702 }
 0x604   :  { %2710 = vrcp.f32 %v1706_v23  ;;  %v1718_v45 = vadd.f32 1.0, %v2703_v22 }
 0x605   :  { %v2705_v30 = vpop.eup %2704  ;;  %2712 = vpow2.f32 %v2382_v21 }
 0x606   :  { %2714 = vrcp.f32 %v1718_v45  ;;  %v1707_v27 = vadd.f32 1.0, %v2705_v30 }
 0x607   :  { %v2707_v32 = vpop.eup %2706  ;;  %2716 = vpow2.f32 %v2383_v42 }
 0x608   :  { %2718 = vrcp.f32 %v1707_v27  ;;  %v1719_v39 = vadd.f32 1.0, %v2707_v32  ;;  %v2709_v29 = vpop.eup %2708  ;;  %v2405_v32 = vld [vmem:[%s3582_s0 + $0x78] sm:$0xff] }
 0x609   :  { %2720 = vtanh.f32 %v1698_v33 }
 0x60a   :  { %2722 = vrcp.f32 %v1719_v39 }
 0x611   :  { %v2711_v31 = vpop.eup %2710 }
 0x612   :  { %v2713_v38 = vpop.eup %2712  ;;  %v1740_v35 = vmul.f32 %v2711_v31, %v2709_v29 }
 0x613   :  { %v2715_v37 = vpop.eup %2714  ;;  %v1732_v36 = vadd.f32 1.0, %v2713_v38 }
 0x614   :  { %v2717_v28 = vpop.eup %2716  ;;  %v1738_v40 = vmul.f32 %v2715_v37, %v3425_v24 }
 0x615   :  { %v2719_v13 = vpop.eup %2718  ;;  %v1733_v25 = vadd.f32 1.0, %v2717_v28  ;;  %2724 = vrcp.f32 %v1732_v36 }
 0x616   :  { %v2721_v14 = vpop.eup %2720  ;;  %v3494_v26 = vadd.f32 %v1740_v35, %v1738_v40 }
 0x617   :  { %v2723_v7 = vpop.eup %2722  ;;  %v1741_v21 = vmul.f32 %v2721_v14, %v2719_v13 }
 0x618   :  { %v1739_v23 = vmul.f32 %v2723_v7, %v3428_v41  ;;  %2726 = vtanh.f32 %v3494_v26  ;;  %v2404_v41 = vld [vmem:[%s3582_s0 + $0x70] sm:$0xff] }
 0x619   :  { %2728 = vrcp.f32 %v1733_v25  ;;  %v2008_v39 = vpack.c.bf16 %v2405_v32, %v2404_v41 }
 0x61a   :  { %v3497_v22 = vadd.f32 %v1741_v21, %v1739_v23 }
 0x61c   :  { %2730 = vtanh.f32 %v3497_v22 }
 0x622   :  { %v2725_v34 = vpop.eup %2724 }
 0x625   :  { %v2727_v24 = vpop.eup %2726 }
 0x626   :  { %v2729_v42 = vpop.eup %2728  ;;  %v1746_v30 = vmul.f32 %v2727_v24, %v2725_v34 }
 0x629   :  { %v2731_v45 = vpop.eup %2730 }
 0x62a   :  { %v1747_v33 = vmul.f32 %v2731_v45, %v2729_v42 }
 0x62c   :  { %v1748_v27 = vpack.c.bf16 %v1747_v33, %v1746_v30 }
 0x62e   :  { %2480 = vst [vmem:[%s3586_s4 + $0x28] sm:$0xff] %v1748_v27   ;;  %1885 = vmatmul.mubr.bf16.vlgmr.msra.gmra.mxu0 %v1748_v27  ;;  %1928 = vmatmul.mubr.bf16.vlgmr.msra.gmra.mxu1 %v1748_v27 }
 0x62f   :  { %2027 = vmatpush1.bf16.msra.mxu0 %v2908_v10  ;;  %2044 = vmatprep.mubr.bf16.mxu0 %v3602_v49  ;;  %v3611_v10 = vld [vmem:[#allocation9_spill] sm:$0xff] }
 0x630   :  { %2070 = vmatpush1.bf16.msra.mxu1 %v2911_v11  ;;  %2087 = vmatprep.mubr.bf16.mxu1 %v3602_v49  ;;  %v1800_v11 = vpop.f32.mrf.mxu0 }
 0x631   :  { %2098 = vmatprep.subr.bf16.mxu0 %v3237_v6  ;;  %2141 = vmatprep.subr.bf16.mxu1 %v3240_v51 }
 0x632   :  { %v1802_v6 = vpop.f32.mrf.mxu0 }
 0x636   :  { %2407 = vmatmul.mubr.msk.bf16.vlgmr.msra.gmra.mxu0 %vm113_vm1, %v2008_v39  ;;  %2409 = vmatmul.mubr.msk.bf16.vlgmr.msra.gmra.mxu1 %vm113_vm1, %v2008_v39 }
 0x637   :  { %2099 = vmatpush1.bf16.msra.mxu0 %v3251_v12  ;;  %2142 = vmatpush1.bf16.msra.mxu1 %v3254_v8  ;;  %v1804_v12 = vpop.f32.mrf.mxu0 }
 0x638   :  { %2100 = vmatprep.subr.bf16.mxu0 %v3257_v50  ;;  %2143 = vmatprep.subr.bf16.mxu1 %v3260_v52  ;;  %v1801_v52 = vadd.f32 %v1800_v11, %v3070_v58 }
 0x639   :  { %2130 = vmatprep.mubr.bf16.mxu0 %v3602_v49  ;;  %2173 = vmatprep.mubr.bf16.mxu1 %v3602_v49  ;;  %v1843_v49 = vpop.f32.mrf.mxu1  ;;  %v1806_v50 = vpop.f32.mrf.mxu0 }
 0x63b   :  { %2101 = vmatpush1.bf16.msra.mxu0 %v3265_v43  ;;  %2144 = vmatpush1.bf16.msra.mxu1 %v3337_v9  ;;  %v1845_v51 = vpop.f32.mrf.mxu1 }
 0x63c   :  { %2102 = vmatprep.subr.bf16.mxu0 %v3340_v63  ;;  %2145 = vmatprep.subr.bf16.mxu1 %v3343_v53  ;;  %v1803_v63 = vadd.f32 %v1802_v6, %v3072_v60 }
 0x63d   :  { %v1847_v8 = vpop.f32.mrf.mxu1 }
 0x63e   :  { %v1848_v35 = vadd.f32 %v1847_v8, %v3080_v3 }
 0x63f   :  { %2103 = vmatpush1.bf16.msra.mxu0 %v3346_v61  ;;  %2146 = vmatpush1.bf16.msra.mxu1 %v3349_v59  ;;  %v1849_v43 = vpop.f32.mrf.mxu1 }
 0x640   :  { %2104 = vmatprep.subr.bf16.mxu0 %v3352_v57  ;;  %2147 = vmatprep.subr.bf16.mxu1 %v3355_v44  ;;  %v1805_v57 = vadd.f32 %v1804_v12, %v3070_v58 }
 0x643   :  { %2105 = vmatpush1.bf16.msra.mxu0 %v3358_v15  ;;  %2148 = vmatpush1.bf16.msra.mxu1 %v3361_v17 }
 0x644   :  { %2106 = vmatprep.subr.bf16.mxu0 %v3364_v5  ;;  %2149 = vmatprep.subr.bf16.mxu1 %v3367_v1  ;;  %v1807_v5 = vadd.f32 %v1806_v50, %v3072_v60 }
 0x647   :  { %2107 = vmatpush1.bf16.msra.mxu0 %v3370_v46  ;;  %2150 = vmatpush1.bf16.msra.mxu1 %v3373_v0 }
 0x648   :  { %2108 = vmatprep.subr.bf16.mxu0 %v3376_v2  ;;  %2151 = vmatprep.subr.bf16.mxu1 %v3379_v47 }
 0x64b   :  { %2109 = vmatpush1.bf16.msra.mxu0 %v3382_v55  ;;  %2152 = vmatpush1.bf16.msra.mxu1 %v3385_v56 }
 0x64c   :  { %2110 = vmatprep.subr.bf16.mxu0 %v3388_v54  ;;  %2153 = vmatprep.subr.bf16.mxu1 %v3391_v48  ;;  %v1846_v48 = vadd.f32 %v1845_v51, %v3078_v62 }
 0x64f   :  { %2111 = vmatpush1.bf16.msra.mxu0 %v3394_v4  ;;  %2154 = vmatpush1.bf16.msra.mxu1 %v3397_v18  ;;  %v1844_v18 = vadd.f32 %v1843_v49, %v3080_v3 }
 0x650   :  { %2112 = vmatprep.subr.bf16.mxu0 %v3400_v16  ;;  %2155 = vmatprep.subr.bf16.mxu1 %v3403_v19  ;;  %v1850_v16 = vadd.f32 %v1849_v43, %v3078_v62 }
 0x653   :  { %2113 = vmatpush1.bf16.msra.mxu0 %v3406_v20  ;;  %2156 = vmatpush1.bf16.msra.mxu1 %v3611_v10 }
 0x6ee   :  { %v1886_v9 = vpop.f32.mrf.mxu0  ;;  %v1929_v61 = vpop.f32.mrf.mxu1 }
 0x6ef   :  { %v1938_v53 = vadd.f32 %v1886_v9, %v1801_v52  ;;  %v1940_v20 = vadd.f32 %v1929_v61, %v1844_v18 }
 0x6f0   :  { %v1888_v59 = vpop.f32.mrf.mxu0  ;;  %v1931_v46 = vpop.f32.mrf.mxu1 }
 0x6f1   :  { %v2394_v44 = vmul.f32 -1.442695, %v1938_v53  ;;  %v1939_v15 = vadd.f32 %v1888_v59, %v1803_v63  ;;  %v1941_v19 = vadd.f32 %v1931_v46, %v1846_v48 }
 0x6f2   :  { %v1890_v17 = vpop.f32.mrf.mxu0  ;;  %v1933_v56 = vpop.f32.mrf.mxu1 }
 0x6f3   :  { %2732 = vpow2.f32 %v2394_v44  ;;  %v2396_v1 = vmul.f32 -1.442695, %v1939_v15  ;;  %v1942_v0 = vadd.f32 %v1890_v17, %v1805_v57  ;;  %v2398_v38 = vmul.f32 -1.442695, %v1941_v19 }
 0x6f4   :  { %v1892_v2 = vpop.f32.mrf.mxu0  ;;  %v1935_v4 = vpop.f32.mrf.mxu1  ;;  %v1944_v14 = vadd.f32 %v1933_v56, %v1848_v35 }
 0x6f5   :  { %2734 = vpow2.f32 %v2396_v1  ;;  %v2395_v47 = vmul.f32 -1.442695, %v1942_v0  ;;  %v1943_v55 = vadd.f32 %v1892_v2, %v1807_v5  ;;  %v1945_v29 = vadd.f32 %v1935_v4, %v1850_v16 }
 0x6f6   :  { %v2089_v63 = vpop.f32.mrf.mxu1 }
 0x6f7   :  { %2736 = vpow2.f32 %v2395_v47  ;;  %v2397_v54 = vmul.f32 -1.442695, %v1943_v55  ;;  %v2399_v40 = vmul.f32 -1.442695, %v1945_v29 }
 0x6f8   :  { %v2091_v61 = vpop.f32.mrf.mxu1 }
 0x6f9   :  { %2738 = vpow2.f32 %v2397_v54 }
 0x6fa   :  { %2740 = vtanh.f32 %v1940_v20  ;;  %v2093_v57 = vpop.f32.mrf.mxu1 }
 0x6fc   :  { %v2095_v17 = vpop.f32.mrf.mxu1 }
 0x6fd   :  { %v2096_v35 = vadd.f32 %v2095_v17, %v3078_v62 }
 0x700   :  { %v2733_v31 = vpop.eup %2732 }
 0x701   :  { %v1952_v37 = vadd.f32 1.0, %v2733_v31 }
 0x702   :  { %v2735_v28 = vpop.eup %2734 }
 0x703   :  { %2742 = vrcp.f32 %v1952_v37  ;;  %v1964_v13 = vadd.f32 1.0, %v2735_v28  ;;  %v2092_v37 = vadd.f32 %v2091_v61, %v3078_v62  ;;  %v2090_v28 = vadd.f32 %v2089_v63, %v3080_v3 }
 0x704   :  { %v2737_v36 = vpop.eup %2736  ;;  %2744 = vpow2.f32 %v2398_v38 }
 0x705   :  { %2746 = vrcp.f32 %v1964_v13  ;;  %v1953_v7 = vadd.f32 1.0, %v2737_v36 }
 0x706   :  { %v2739_v25 = vpop.eup %2738  ;;  %2748 = vpow2.f32 %v2399_v40 }
 0x707   :  { %2750 = vrcp.f32 %v1953_v7  ;;  %v1965_v21 = vadd.f32 1.0, %v2739_v25  ;;  %v2741_v23 = vpop.eup %2740 }
 0x708   :  { %2752 = vtanh.f32 %v1944_v14 }
 0x709   :  { %2754 = vrcp.f32 %v1965_v21  ;;  %v2094_v21 = vadd.f32 %v2093_v57, %v3080_v3 }
 0x710   :  { %v2743_v34 = vpop.eup %2742 }
 0x711   :  { %v2745_v24 = vpop.eup %2744  ;;  %v1986_v30 = vmul.f32 %v2743_v34, %v2741_v23 }
 0x712   :  { %v2747_v42 = vpop.eup %2746  ;;  %v1978_v41 = vadd.f32 1.0, %v2745_v24 }
 0x713   :  { %v2749_v45 = vpop.eup %2748  ;;  %v1984_v33 = vmul.f32 %v2747_v42, %v3494_v26 }
 0x714   :  { %v2751_v27 = vpop.eup %2750  ;;  %v1979_v11 = vadd.f32 1.0, %v2749_v45  ;;  %2756 = vrcp.f32 %v1978_v41 }
 0x715   :  { %v2753_v32 = vpop.eup %2752  ;;  %v3559_v39 = vadd.f32 %v1986_v30, %v1984_v33 }
 0x716   :  { %v2755_v10 = vpop.eup %2754  ;;  %v1987_v49 = vmul.f32 %v2753_v32, %v2751_v27 }
 0x717   :  { %v1985_v6 = vmul.f32 %v2755_v10, %v3497_v22  ;;  %2758 = vtanh.f32 %v3559_v39  ;;  %v2046_v22 = vpop.f32.mrf.mxu0 }
 0x718   :  { %2760 = vrcp.f32 %v1979_v11  ;;  %v2047_v15 = vadd.f32 %v2046_v22, %v3070_v58 }
 0x719   :  { %v3562_v51 = vadd.f32 %v1987_v49, %v1985_v6  ;;  %v2048_v53 = vpop.f32.mrf.mxu0 }
 0x71a   :  { %v2049_v1 = vadd.f32 %v2048_v53, %v3072_v60 }
 0x71b   :  { %2762 = vtanh.f32 %v3562_v51  ;;  %v2050_v59 = vpop.f32.mrf.mxu0 }
 0x71c   :  { %v2051_v47 = vadd.f32 %v2050_v59, %v3070_v58 }
 0x71d   :  { %v2052_v44 = vpop.f32.mrf.mxu0 }
 0x71e   :  { %v2053_v48 = vadd.f32 %v2052_v44, %v3072_v60 }
 0x721   :  { %v2757_v12 = vpop.eup %2756 }
 0x724   :  { %v2759_v26 = vpop.eup %2758 }
 0x725   :  { %v2761_v8 = vpop.eup %2760  ;;  %v1992_v52 = vmul.f32 %v2759_v26, %v2757_v12 }
 0x728   :  { %v2763_v50 = vpop.eup %2762 }
 0x729   :  { %v1993_v43 = vmul.f32 %v2763_v50, %v2761_v8 }
 0x72b   :  { %v1994_v9 = vpack.c.bf16 %v1993_v43, %v1992_v52 }
 0x72d   :  { %2481 = vst [vmem:[%s3586_s4 + $0x30] sm:$0xff] %v1994_v9   ;;  %2131 = vmatmul.mubr.bf16.vlgmr.msra.gmra.mxu0 %v1994_v9  ;;  %2174 = vmatmul.mubr.bf16.vlgmr.msra.gmra.mxu1 %v1994_v9 }
 0x7ed   :  { %v2132_v5 = vpop.f32.mrf.mxu0  ;;  %v2175_v0 = vpop.f32.mrf.mxu1 }
 0x7ee   :  { %v2184_v46 = vadd.f32 %v2132_v5, %v2047_v15  ;;  %v2186_v40 = vadd.f32 %v2175_v0, %v2090_v28 }
 0x7ef   :  { %v2134_v2 = vpop.f32.mrf.mxu0  ;;  %v2177_v18 = vpop.f32.mrf.mxu1 }
 0x7f0   :  { %v2410_v55 = vmul.f32 -1.442695, %v2184_v46  ;;  %v2185_v56 = vadd.f32 %v2134_v2, %v2049_v1  ;;  %v2187_v60 = vadd.f32 %v2177_v18, %v2092_v37 }
 0x7f1   :  { %v2136_v54 = vpop.f32.mrf.mxu0  ;;  %v2179_v31 = vpop.f32.mrf.mxu1 }
 0x7f2   :  { %2764 = vpow2.f32 %v2410_v55  ;;  %v2412_v4 = vmul.f32 -1.442695, %v2185_v56  ;;  %v2188_v16 = vadd.f32 %v2136_v54, %v2051_v47  ;;  %v2414_v14 = vmul.f32 -1.442695, %v2187_v60 }
 0x7f3   :  { %v2138_v19 = vpop.f32.mrf.mxu0  ;;  %v2181_v58 = vpop.f32.mrf.mxu1  ;;  %v2190_v42 = vadd.f32 %v2179_v31, %v2094_v21 }
 0x7f4   :  { %2766 = vpow2.f32 %v2412_v4  ;;  %v2411_v20 = vmul.f32 -1.442695, %v2188_v16  ;;  %v2189_v29 = vadd.f32 %v2138_v19, %v2053_v48  ;;  %v2191_v13 = vadd.f32 %v2181_v58, %v2096_v35 }
 0x7f6   :  { %2768 = vpow2.f32 %v2411_v20  ;;  %v2413_v38 = vmul.f32 -1.442695, %v2189_v29  ;;  %v2415_v23 = vmul.f32 -1.442695, %v2191_v13 }
 0x7f8   :  { %2770 = vpow2.f32 %v2413_v38 }
 0x7f9   :  { %2772 = vtanh.f32 %v2186_v40 }
 0x7ff   :  { %v2765_v36 = vpop.eup %2764 }
 0x800   :  { %v2198_v7 = vadd.f32 1.0, %v2765_v36 }
 0x801   :  { %v2767_v25 = vpop.eup %2766 }
 0x802   :  { %2774 = vrcp.f32 %v2198_v7  ;;  %v2210_v34 = vadd.f32 1.0, %v2767_v25 }
 0x803   :  { %v2769_v24 = vpop.eup %2768  ;;  %2776 = vpow2.f32 %v2414_v14 }
 0x804   :  { %2778 = vrcp.f32 %v2210_v34  ;;  %v2199_v45 = vadd.f32 1.0, %v2769_v24 }
 0x805   :  { %v2771_v30 = vpop.eup %2770  ;;  %2780 = vpow2.f32 %v2415_v23 }
 0x806   :  { %2782 = vrcp.f32 %v2199_v45  ;;  %v2211_v62 = vadd.f32 1.0, %v2771_v30  ;;  %v2773_v33 = vpop.eup %2772 }
 0x807   :  { %2784 = vtanh.f32 %v2190_v42 }
 0x808   :  { %2786 = vrcp.f32 %v2211_v62 }
 0x80f   :  { %v2775_v27 = vpop.eup %2774 }
 0x810   :  { %v2777_v41 = vpop.eup %2776  ;;  %v2232_v10 = vmul.f32 %v2775_v27, %v2773_v33 }
 0x811   :  { %v2779_v32 = vpop.eup %2778  ;;  %v2224_v6 = vadd.f32 1.0, %v2777_v41 }
 0x812   :  { %v2781_v3 = vpop.eup %2780  ;;  %v2230_v11 = vmul.f32 %v2779_v32, %v3559_v39 }
 0x813   :  { %v2783_v49 = vpop.eup %2782  ;;  %v2225_v50 = vadd.f32 1.0, %v2781_v3  ;;  %2788 = vrcp.f32 %v2224_v6 }
 0x814   :  { %v2785_v12 = vpop.eup %2784  ;;  %v2234_v26 = vadd.f32 %v2232_v10, %v2230_v11 }
 0x815   :  { %v2787_v8 = vpop.eup %2786  ;;  %v2233_v52 = vmul.f32 %v2785_v12, %v2783_v49 }
 0x816   :  { %v2231_v43 = vmul.f32 %v2787_v8, %v3562_v51  ;;  %2790 = vtanh.f32 %v2234_v26 }
 0x817   :  { %2792 = vrcp.f32 %v2225_v50 }
 0x818   :  { %v2235_v9 = vadd.f32 %v2233_v52, %v2231_v43 }
 0x81a   :  { %2794 = vtanh.f32 %v2235_v9 }
 0x820   :  { %v2789_v22 = vpop.eup %2788 }
 0x823   :  { %v2791_v63 = vpop.eup %2790 }
 0x824   :  { %v2793_v53 = vpop.eup %2792  ;;  %v2238_v59 = vmul.f32 %v2791_v63, %v2789_v22 }
 0x827   :  { %v2795_v61 = vpop.eup %2794 }
 0x828   :  { %v2239_v39 = vmul.f32 %v2795_v61, %v2793_v53 }
 0x82a   :  { %v2474_v57 = vpack.c.bf16 %v2239_v39, %v2238_v59 }
 0x82c   :  { %2482 = vst [vmem:[%s3586_s4 + $0x38] sm:$0xff] %v2474_v57  }
 0x82d   :  { %2259 = vsyncpa [#allocation5], 1 }

</bundles_post_ra>
